<compile_context>
chip_gen: v7x
topology: tpu7x:2x2x1
jax: 0.10.0
libtpu: 0.0.40
codegen_flags: <defaults>
</compile_context>

<pallas_src>
import jax
import jax.numpy as jnp
from jax.experimental import pallas as pl
from jax.experimental.pallas import tpu as pltpu


def scm_kernel(x_ref, w1_ref, b1_ref, w2_ref, b2_ref, o_ref):
    # Linear1 (+bias) + ReLU. Native dtype into the MXU, f32 accumulate.
    h = jnp.dot(x_ref[...], w1_ref[...], preferred_element_type=jnp.float32)
    h = jnp.maximum(h + b1_ref[...], 0.0)

    # Linear2 (+bias).
    y = jnp.dot(h.astype(w2_ref.dtype), w2_ref[...],
                preferred_element_type=jnp.float32)
    y = y + b2_ref[...]

    # F.normalize(dim=-1): y / max(||y||, 1e-12) == y * rsqrt(max(||y||^2, 1e-24)).
    # rsqrt goes to the EUP slot; avoids sqrt + per-element divide on the VALU.
    sumsq = jnp.sum(y * y, axis=-1, keepdims=True)
    inv_norm = jax.lax.rsqrt(jnp.maximum(sumsq, 1e-24))
    o_ref[...] = (y * inv_norm).astype(o_ref.dtype)


def _pick_row_tile(batch):
    # MXU-friendly row tiles; prefer >= 2 grid steps (v7x has 2 TensorCores that
    # only both run when the "parallel" grid axis has >= 2 steps).
    for cand in (256, 128, 64, 32, 16, 8):
        if batch % cand == 0 and batch // cand >= 2:
            return cand
    return batch  # tiny batch: whole thing in a single grid step


def scm_forward(x, w1, b1, w2, b2, *, tm=None):
    """x: (B, dim). w1: (dim, hidden), b1: (hidden,), w2: (hidden, dim), b2: (dim,).

    Weights are stored pre-transposed as (in, out) so the kernel does plain
    row-major matmuls (feature dim on TPU lanes)."""
    B, dim = x.shape
    hidden = w1.shape[1]

    if tm is None:
        tm = _pick_row_tile(B)
    assert B % tm == 0, "batch must be divisible by the row tile"

    b1_2d = b1.reshape(1, hidden)
    b2_2d = b2.reshape(1, dim)

    # VMEM budget: single-buffered weights + double-buffered x/out tiles + f32 temps.
    w_bytes = int((w1.size + b1.size + w2.size + b2.size) * w1.dtype.itemsize)
    io_bytes = int(2 * 2 * tm * dim * x.dtype.itemsize)       # x + out, double-buffered
    tmp_bytes = int(tm * (hidden + dim) * 4)                  # f32 intermediates
    vmem_limit = int(min(max(2 * (w_bytes + io_bytes + tmp_bytes), 32 * 2**20),
                         64 * 2**20))                         # stay under v7x's 64 MiB

    cost = pl.CostEstimate(
        flops=int(4 * B * dim * hidden),                      # two B x dim x hidden matmuls
        transcendentals=int(B),                               # one rsqrt per row
        bytes_accessed=int((x.size + B * dim) * x.dtype.itemsize + w_bytes),
    )

    return pl.pallas_call(
        scm_kernel,
        out_shape=jax.ShapeDtypeStruct((B, dim), x.dtype),
        grid_spec=pltpu.PrefetchScalarGridSpec(
            num_scalar_prefetch=0,
            grid=(B // tm,),
            in_specs=[
                # x row tile (double-buffered across grid steps).
                pl.BlockSpec((tm, dim), lambda i: (i, 0)),
                # Grid-invariant weights / biases: single-buffer them.
                pl.BlockSpec((dim, hidden), lambda i: (0, 0),
                             pipeline_mode=pl.Buffered(1)),
                pl.BlockSpec((1, hidden), lambda i: (0, 0),
                             pipeline_mode=pl.Buffered(1)),
                pl.BlockSpec((hidden, dim), lambda i: (0, 0),
                             pipeline_mode=pl.Buffered(1)),
                pl.BlockSpec((1, dim), lambda i: (0, 0),
                             pipeline_mode=pl.Buffered(1)),
            ],
            out_specs=pl.BlockSpec((tm, dim), lambda i: (i, 0)),
        ),
        compiler_params=pltpu.CompilerParams(
            dimension_semantics=("parallel",),
            vmem_limit_bytes=vmem_limit,
        ),
        cost_estimate=cost,
    )(x, w1, b1_2d, w2, b2_2d)


def scm_reference(x, w1, b1, w2, b2):
    # High-precision reference (avoid XLA's default reduced-precision f32 matmul).
    hp = jax.lax.Precision.HIGHEST
    h = jnp.maximum(jnp.dot(x, w1, precision=hp) + b1, 0.0)
    y = jnp.dot(h, w2, precision=hp) + b2
    n = jnp.sqrt(jnp.sum(y * y, axis=-1, keepdims=True))
    return y / jnp.maximum(n, 1e-12)


if __name__ == "__main__":
    # Shapes consistent with SCM(dim=256) -> hidden = 4 * 256 = 1024.
    # B=256 gives tm=128 and a 2-step parallel grid (both v7x TensorCores busy).
    B, dim = 256, 256
    hidden = 4 * 256

    key = jax.random.PRNGKey(0)
    kx, kw1, kb1, kw2, kb2 = jax.random.split(key, 5)

    x = jax.random.normal(kx, (B, dim), dtype=jnp.float32)

    # Deterministic init mimicking nn.Linear default: U(-1/sqrt(fan_in), 1/sqrt(fan_in)).
    lim1 = 1.0 / jnp.sqrt(jnp.float32(dim))
    lim2 = 1.0 / jnp.sqrt(jnp.float32(hidden))
    w1 = jax.random.uniform(kw1, (dim, hidden), jnp.float32, -lim1, lim1)   # (in, out)
    b1 = jax.random.uniform(kb1, (hidden,), jnp.float32, -lim1, lim1)
    w2 = jax.random.uniform(kw2, (hidden, dim), jnp.float32, -lim2, lim2)   # (in, out)
    b2 = jax.random.uniform(kb2, (dim,), jnp.float32, -lim2, lim2)

    out = jax.block_until_ready(scm_forward(x, w1, b1, w2, b2))

    ref = scm_reference(x, w1, b1, w2, b2)
    assert out.shape == (B, dim)
    assert jnp.allclose(out, ref, atol=1e-4, rtol=1e-4), "mismatch vs reference"

    print("KERNEL_OK")
</pallas_src>

<mosaic_0001>
module attributes {stable_mosaic.version = 11 : i64} {
  func.func @scm_kernel(%arg0: i32, %arg1: memref<128x256xf32, #tpu.memory_space<vmem>>, %arg2: memref<256x1024xf32, #tpu.memory_space<vmem>>, %arg3: memref<1x1024xf32, #tpu.memory_space<vmem>>, %arg4: memref<1024x256xf32, #tpu.memory_space<vmem>>, %arg5: memref<1x256xf32, #tpu.memory_space<vmem>>, %arg6: memref<128x256xf32, #tpu.memory_space<vmem>>) attributes {dimension_semantics = [#tpu.dimension_semantics<parallel>], iteration_bounds = array<i64: 2>, scalar_prefetch = 0 : i64, scratch_operands = 0 : i64, tpu.core_type = #tpu.core_type<tc>, window_params = [{transform_indices = @transform_0, window_bounds = array<i64: 128, 256>}, {pipeline_mode = #tpu.pipeline_mode<synchronous>, transform_indices = @transform_1, window_bounds = array<i64: 256, 1024>}, {pipeline_mode = #tpu.pipeline_mode<synchronous>, transform_indices = @transform_2, window_bounds = array<i64: 1, 1024>}, {pipeline_mode = #tpu.pipeline_mode<synchronous>, transform_indices = @transform_3, window_bounds = array<i64: 1024, 256>}, {pipeline_mode = #tpu.pipeline_mode<synchronous>, transform_indices = @transform_4, window_bounds = array<i64: 1, 256>}, {transform_indices = @transform_5, window_bounds = array<i64: 128, 256>}]} {
    %c0 = arith.constant 0 : index
    %c0_0 = arith.constant 0 : index
    %0 = vector.load %arg1[%c0, %c0_0] : memref<128x256xf32, #tpu.memory_space<vmem>>, vector<128x256xf32>
    %c0_1 = arith.constant 0 : index
    %c0_2 = arith.constant 0 : index
    %1 = vector.load %arg2[%c0_1, %c0_2] : memref<256x1024xf32, #tpu.memory_space<vmem>>, vector<256x1024xf32>
    %cst = arith.constant dense<0.000000e+00> : vector<128x1024xf32>
    %2 = tpu.matmul %0, %1, %cst {dimension_numbers = #tpu.dot_dimension_numbers<[1], [0], [0], [1], [0, 0, 1, 1], [], []>} : vector<128x256xf32>, vector<256x1024xf32>, vector<128x1024xf32> -> vector<128x1024xf32>
    %c0_3 = arith.constant 0 : index
    %c0_4 = arith.constant 0 : index
    %3 = vector.load %arg3[%c0_3, %c0_4] : memref<1x1024xf32, #tpu.memory_space<vmem>>, vector<1x1024xf32>
    %4 = vector.broadcast %3 : vector<1x1024xf32> to vector<128x1024xf32>
    %5 = arith.addf %2, %4 : vector<128x1024xf32>
    %cst_5 = arith.constant 0.000000e+00 : f32
    %6 = vector.broadcast %cst_5 : f32 to vector<128x1024xf32>
    %7 = arith.maximumf %5, %6 : vector<128x1024xf32>
    %c0_6 = arith.constant 0 : index
    %c0_7 = arith.constant 0 : index
    %8 = vector.load %arg4[%c0_6, %c0_7] : memref<1024x256xf32, #tpu.memory_space<vmem>>, vector<1024x256xf32>
    %cst_8 = arith.constant dense<0.000000e+00> : vector<128x256xf32>
    %9 = tpu.matmul %7, %8, %cst_8 {dimension_numbers = #tpu.dot_dimension_numbers<[1], [0], [0], [1], [0, 0, 1, 1], [], []>} : vector<128x1024xf32>, vector<1024x256xf32>, vector<128x256xf32> -> vector<128x256xf32>
    %c0_9 = arith.constant 0 : index
    %c0_10 = arith.constant 0 : index
    %10 = vector.load %arg5[%c0_9, %c0_10] : memref<1x256xf32, #tpu.memory_space<vmem>>, vector<1x256xf32>
    %11 = vector.broadcast %10 : vector<1x256xf32> to vector<128x256xf32>
    %12 = arith.addf %9, %11 : vector<128x256xf32>
    %13 = arith.mulf %12, %12 : vector<128x256xf32>
    %cst_11 = arith.constant dense<0.000000e+00> : vector<128xf32>
    %14 = vector.multi_reduction <add>, %13, %cst_11 [1] : vector<128x256xf32> to vector<128xf32>
    %15 = vector.shape_cast %14 : vector<128xf32> to vector<128x1xf32>
    %cst_12 = arith.constant 1.000000e-24 : f32
    %16 = vector.broadcast %cst_12 : f32 to vector<128x1xf32>
    %17 = arith.maximumf %15, %16 : vector<128x1xf32>
    %18 = math.rsqrt %17 : vector<128x1xf32>
    %19 = vector.broadcast %18 : vector<128x1xf32> to vector<128x256xf32>
    %20 = arith.mulf %12, %19 : vector<128x256xf32>
    %c0_13 = arith.constant 0 : index
    %c0_14 = arith.constant 0 : index
    %21 = vector.load %arg6[%c0_13, %c0_14] : memref<128x256xf32, #tpu.memory_space<vmem>>, vector<128x256xf32>
    tpu.vector_store %arg6[%c0_13, %c0_14], %20 {strides = array<i32>} : memref<128x256xf32, #tpu.memory_space<vmem>>, vector<128x256xf32>,
    return
  }
  func.func @transform_0(%arg0: i32) -> (i32, i32) {
    %c0_i32 = arith.constant 0 : i32
    %c0_i32_0 = arith.constant 0 : i32
    return %arg0, %c0_i32 : i32, i32
  }
  func.func @transform_1(%arg0: i32) -> (i32, i32) {
    %c0_i32 = arith.constant 0 : i32
    %c0_i32_0 = arith.constant 0 : i32
    %c0_i32_1 = arith.constant 0 : i32
    return %c0_i32, %c0_i32_0 : i32, i32
  }
  func.func @transform_2(%arg0: i32) -> (i32, i32) {
    %c0_i32 = arith.constant 0 : i32
    %c0_i32_0 = arith.constant 0 : i32
    %c0_i32_1 = arith.constant 0 : i32
    return %c0_i32, %c0_i32_0 : i32, i32
  }
  func.func @transform_3(%arg0: i32) -> (i32, i32) {
    %c0_i32 = arith.constant 0 : i32
    %c0_i32_0 = arith.constant 0 : i32
    %c0_i32_1 = arith.constant 0 : i32
    return %c0_i32, %c0_i32_0 : i32, i32
  }
  func.func @transform_4(%arg0: i32) -> (i32, i32) {
    %c0_i32 = arith.constant 0 : i32
    %c0_i32_0 = arith.constant 0 : i32
    %c0_i32_1 = arith.constant 0 : i32
    return %c0_i32, %c0_i32_0 : i32, i32
  }
  func.func @transform_5(%arg0: i32) -> (i32, i32) {
    %c0_i32 = arith.constant 0 : i32
    %c0_i32_0 = arith.constant 0 : i32
    return %arg0, %c0_i32 : i32, i32
  }
}

</mosaic_0001>

<bundles_post_ra>
// kernel: tpu_custom_call.1
= control target key start
LH: loop header
LB: loop body
LE: loop exit
PB: predicated region body
PF: predicated region fallthrough
CT: control target
= control target key end

     0   :  { %10 = vsyncpa [#allocation3], 0  ;;  %s4546_s0 = inlined_call_operand.hbm [shape: f32[256,256], index: 0, kind: input, shape index: {}]   ;;  %s4547_s1 = inlined_call_operand.hbm [shape: f32[256,1024], index: 1, kind: input, shape index: {}]   ;;  %s4548_s2 = inlined_call_operand.hbm [shape: f32[1,1024], index: 2, kind: input, shape index: {}]   ;;  %s4549_s3 = inlined_call_operand.hbm [shape: f32[1024,256], index: 3, kind: input, shape index: {}]   ;;  %s4550_s4 = inlined_call_operand.vmem [shape: f32[1,256], index: 4, kind: input, shape index: {}]   ;;  %s4551_s5 = inlined_call_operand.hbm [shape: f32[256,256], index: 5, kind: output, shape index: {}]  }
   0x1   :  { %12 = vsyncpa [#allocation3 + $0x1], 0 }
   0x2   :  { %13 = vsyncpa [#allocation6], 0 }
   0x3   :  { %14 = vsyncpa [#allocation9], 0 }
   0x4   :  { %15 = vsyncpa [#allocation4], 0 }
   0x5   :  { %17 = vsyncpa [#allocation4 + $0x1], 0  ;;  %s3640_s18 = smov 0   ;;  %s3642_s19 = smov 0  }
   0x6   :  { %s3644_s20 = smov 0   ;;  %s3646_s21 = smov 0  }
   0x7 LB: > { %s3661_s22 = sadd.s32 4294967295, %s3597_s21   ;;  %s2595_s23 = sadd.s32 4294967294, %s3597_s21   ;;  %s3597_s21 = sphi %s3646_s21, %s4574_s21   ;;  %s3593_s20 = sphi %s3644_s20, %s4573_s20   ;;  %s3589_s19 = sphi %s3642_s19, %s4572_s19   ;;  %s3585_s18 = sphi %s3640_s18, %s4571_s18  }
   0x8   : > { %p43_p0 = scmp.ne.s32.totalorder %s3589_s19, %s3585_s18  ;;  %p4552_p1 = scmp.eq.s32.totalorder %s3661_s22, 0 }
   0x9   : > { %p157_p3 = scmp.eq.s32.totalorder %s2595_s23, 1  ;;  %p2596_p5 = scmp.ge.s32.totalorder %s3597_s21, 1 }
   0xa   : > { %p3670_p4 = por %p4552_p1, %p43_p0  ;;  %p164_p7 = scmp.lt.s32.totalorder %s3597_s21, 3 }
   0xb   : > { %p3675_p6 = por %p157_p3, %p43_p0  ;;  %s3599_s27 = smov [#allocation5]  }
   0xc   : > { %s4555_s24 = scalar_select %p3670_p4, 1, 0 }
   0xd   : > { %s4556_s25 = scalar_select %p3675_p6, 1, 0 }
   0xe   : > { %p3680_p8 = pnand %p2596_p5, %p164_p7  ;;  %s176_s28 = sshll.u32 %s3599_s27, 4  ;;  %s3684_s28 = int_to_ptr.vmem [resolvable:$true] %s176_s28 }
   0xf   : > { %s3600_s30 = smov [#allocation7]   ;;  %s3601_s7 = smov [#allocation8]  }
  0x10   : > { %s4557_s26 = scalar_select %p3680_p8, 1, 0 }
  0x11   : > { %p3277_p9 = pneg %p3680_p8  ;;  %s190_s6 = sshll.u32 %s3600_s30, 4  ;;  %s3695_s6 = int_to_ptr.vmem [resolvable:$true] %s190_s6 }
  0x12   : > { %s3697_s8 = sshll.u32 %s3601_s7, 4  ;;  %s3409_s11 = scalar_lea.hbm %s4547_s1, 32768  ;;  %s201_s8 = int_to_ptr.vmem [resolvable:$true] %s3697_s8 }
  0x13   : > { %p3691_p11 = pnand %p3277_p9, %p4552_p1  ;;  %p3410_p12 = scmp.ne.s32.totalorder %s4547_s1, %s3409_s11 }
  0x14   : > { %p3416_p5 = scmp.lt.u32.totalorder %s3409_s11, %s4547_s1 }
  0x15   : > { %p3707_p13 = pneg %p3691_p11 }
  0x17   : > { %p3412_p0 = pnand %p3707_p13, %p3410_p12 }
  0x19   : > { %p3413_p3 = pneg %p3412_p0 }
  0x1b   : > { %p3418_p7 = pnand %p3416_p5, %p3413_p3 }
  0x1d   : > { %3421 = shalt.err (!%p3418_p7)
}
  0x1e   : > { %s3422_s17 = scalar_lea.vmem %s3684_s28, 32768  ;;  %p3430_p2 = scmp.lt.s32.totalorder %s3684_s28, %s3684_s28 }
  0x1f   : > { %p3423_p9 = scmp.ne.s32.totalorder %s3684_s28, %s3422_s17  ;;  %p3431_p6 = scmp.lt.s32.totalorder %s3422_s17, %s3422_s17 }
  0x21   : > { %p3425_p10 = pnand %p3423_p9, %p3707_p13  ;;  %p3432_p12 = por %p3431_p6, %p3430_p2 }
  0x23   : > { %p3426_p1 = pneg %p3425_p10 }
  0x25   : > { %p3433_p0 = pnand %p3432_p12, %p3426_p1 }
  0x27   : > { %3436 = shalt.err (!%p3433_p0)
}
  0x28   : > { %s3602_s23 = smov 1024   ;;  %s3603_s27 = smov 64  }
  0x29   : > { %3280 = dma.hbm_to_vmem [thread:$0]  (!%p3691_p11), %s4547_s1, 32768, %s3684_s28, [#allocation6], %s3602_s23, %s3602_s23, %s3603_s27  }
  0x2a   : > { %s3437_s11 = scalar_lea.hbm %s4548_s2, 128 }
  0x2b   : > { %p3438_p2 = scmp.ne.s32.totalorder %s4548_s2, %s3437_s11  ;;  %p3444_p10 = scmp.lt.u32.totalorder %s3437_s11, %s4548_s2 }
  0x2d   : > { %p3440_p1 = pnand %p3438_p2, %p3707_p13 }
  0x2f   : > { %p3441_p6 = pneg %p3440_p1 }
  0x31   : > { %p3446_p3 = pnand %p3444_p10, %p3441_p6 }
  0x33   : > { %3449 = shalt.err (!%p3446_p3)
}
  0x34   : > { %s3450_s28 = scalar_lea.vmem %s3695_s6, 128  ;;  %p3458_p12 = scmp.lt.s32.totalorder %s3695_s6, %s3695_s6 }
  0x35   : > { %p3451_p5 = scmp.ne.s32.totalorder %s3695_s6, %s3450_s28  ;;  %p3459_p0 = scmp.lt.s32.totalorder %s3450_s28, %s3450_s28 }
  0x37   : > { %p3453_p7 = pnand %p3451_p5, %p3707_p13  ;;  %p3460_p2 = por %p3459_p0, %p3458_p12 }
  0x39   : > { %p3454_p9 = pneg %p3453_p7 }
  0x3b   : > { %p3461_p1 = pnand %p3460_p2, %p3454_p9 }
  0x3d   : > { %3464 = shalt.err (!%p3461_p1)
}
  0x3e   : > { %3283 = dma.hbm_to_vmem [thread:$0]  (!%p3691_p11), %s4548_s2, 128, %s3695_s6, [#allocation6]  }
  0x3f   : > { %s3465_s7 = scalar_lea.hbm %s4549_s3, 32768 }
  0x40   : > { %p3466_p6 = scmp.ne.s32.totalorder %s4549_s3, %s3465_s7  ;;  %p3472_p5 = scmp.lt.u32.totalorder %s3465_s7, %s4549_s3 }
  0x42   : > { %p3468_p10 = pnand %p3466_p6, %p3707_p13 }
  0x44   : > { %p3469_p3 = pneg %p3468_p10 }
  0x46   : > { %p3474_p7 = pnand %p3472_p5, %p3469_p3 }
  0x48   : > { %3477 = shalt.err (!%p3474_p7)
}
  0x49   : > { %s3478_s13 = scalar_lea.vmem %s201_s8, 32768  ;;  %p3486_p2 = scmp.lt.s32.totalorder %s201_s8, %s201_s8 }
  0x4a   : > { %p3479_p9 = scmp.ne.s32.totalorder %s201_s8, %s3478_s13  ;;  %p3487_p1 = scmp.lt.s32.totalorder %s3478_s13, %s3478_s13 }
  0x4c   : > { %p3481_p12 = pnand %p3479_p9, %p3707_p13  ;;  %p3488_p4 = por %p3487_p1, %p3486_p2 }
  0x4e   : > { %p3482_p0 = pneg %p3481_p12 }
  0x50   : > { %p3489_p8 = pnand %p3488_p4, %p3482_p0 }
  0x52   : > { %3492 = shalt.err (!%p3489_p8)
}
  0x53   : > { %s3604_s6 = smov 256   ;;  %s3605_s14 = smov 16  }
  0x54   : > { %3286 = dma.hbm_to_vmem [thread:$0]  (!%p3691_p11), %s4549_s3, 32768, %s201_s8, [#allocation9], %s3604_s6, %s3604_s6, %s3605_s14  }
  0x55   : > { %s3774_s28 = sadd.s32 1, %s3597_s21   ;;  %s30_s23 = sadd.s32 1, %s3593_s20 }
  0x56   : > { %s27_s17 = ssub.s32 %s3597_s21, %s3774_s28  ;;  %p37_p8 = scmp.ne.s32.totalorder %s3593_s20, %s3589_s19 }
  0x57   : > { %p28_p4 = scmp.eq.s32.totalorder %s27_s17, 0  ;;  %p38_p13 = scmp.eq.s32.totalorder %s3597_s21, 0 }
  0x58   : > { %p3298_p6 = scmp.lt.s32.totalorder %s3597_s21, 2  ;;  %p4560_p3 = scmp.eq.s32.totalorder %s3661_s22, 1 }
  0x59   : > { %s3784_s27 = scalar_select %p28_p4, %s3593_s20, %s30_s23  }
  0x5a   : > { %p39_p10 = por %p38_p13, %p37_p8  ;;  %p3788_p5 = por %p4560_p3, %p37_p8 }
  0x5b   : > { %s217_s30 = sand.u32 1, %s3593_s20   ;;  %s2618_s7 = sshll.u32 %s3597_s21, 12 }
  0x5c   : > { %s2601_s8 = sshll.u32 %s217_s30, 8  ;;  %s3797_s11 = scalar_lea.hbm %s4546_s0, %s2618_s7 }
  0x5d   : > { %s221_s12 = scalar_lea.vmem [#allocation2], %s2601_s8  ;;  %p3799_p11 = pnand %p3298_p6, %p39_p10 }
  0x5e   : > { %s229_s13 = sshll.u32 %s221_s12, 4  ;;  %s3805_s16 = scalar_lea.sflag [#allocation3], %s217_s30  ;;  %s3803_s13 = int_to_ptr.vmem [resolvable:$true] %s229_s13 }
  0x5f   : > { %s3493_s17 = scalar_lea.hbm %s3797_s11, 4096  ;;  %p3495_p9 = pneg %p3799_p11 }
  0x60   : > { %p3494_p7 = scmp.ne.s32.totalorder %s3797_s11, %s3493_s17  ;;  %s3498_s8 = scalar_lea.hbm %s4546_s0, 8192 }
  0x61   : > { %p3499_p2 = scmp.lt.u32.totalorder %s3797_s11, %s4546_s0  ;;  %p3500_p1 = scmp.lt.u32.totalorder %s3498_s8, %s3493_s17 }
  0x62   : > { %p3496_p12 = pnand %p3495_p9, %p3494_p7  ;;  %p3502_p8 = scmp.lt.u32.totalorder %s3493_s17, %s3797_s11 }
  0x63   : > { %p3501_p4 = por %p3500_p1, %p3499_p2 }
  0x64   : > { %p3497_p0 = pneg %p3496_p12 }
  0x65   : > { %p3503_p13 = por %p3502_p8, %p3501_p4 }
  0x67   : > { %p3504_p6 = pnand %p3503_p13, %p3497_p0 }
  0x69   : > { %3507 = shalt.err (!%p3504_p6)
}
  0x6a   : > { %s3508_s30 = scalar_lea.vmem %s3803_s13, 4096  ;;  %s3606_s12 = smov [#allocation2]  }
  0x6b   : > { %p3509_p10 = scmp.ne.s32.totalorder %s3803_s13, %s3508_s30  ;;  %s3513_s23 = sshll.u32 %s3606_s12, 4  ;;  %s3514_s23 = int_to_ptr.vmem [resolvable:$false] %s3513_s23 }
  0x6c   : > { %s3515_s7 = scalar_lea.vmem %s3514_s23, 8192  ;;  %p3516_p12 = scmp.lt.s32.totalorder %s3803_s13, %s3514_s23 }
  0x6d   : > { %p3511_p3 = pnand %p3509_p10, %p3495_p9  ;;  %p3517_p2 = scmp.lt.s32.totalorder %s3515_s7, %s3508_s30 }
  0x6f   : > { %p3512_p7 = pneg %p3511_p3  ;;  %p3518_p1 = por %p3517_p2, %p3516_p12 }
  0x71   : > { %p3519_p4 = pnand %p3518_p1, %p3512_p7 }
  0x73   : > { %3522 = shalt.err (!%p3519_p4)
}
  0x74   : > { %3290 = dma.hbm_to_vmem [thread:$0]  (!%p3799_p11), %s3797_s11, 4096, %s3803_s13, %s3805_s16, %s3604_s6, %s3604_s6, %s3605_s14  }
  0x75   : > { %p4563_p9 = scmp.ne.s32.totalorder %s4557_s26, 0 }
  0x76   : > { %s3839_s17 = sand.u32 (!%p4563_p9), 1, %s3589_s19   ;;  %p4564_p0 = scmp.ne.s32.totalorder (!%p4563_p9), %s4555_s24, 0 }
  0x77   : > { %241 = sbr.rel (%p4563_p9) target bundleno = 1063 (0x427), region = 40  ;;  %s2606_s8 = sshll.u32 (!%p4563_p9), %s3839_s17, 8 }
  0x78   : > { %s244_s9 = scalar_lea.sflag (!%p4563_p9), [#allocation3], %s3839_s17  ;;  %s3845_s15 = scalar_lea.vmem (!%p4563_p9), [#allocation2], %s2606_s8 }
  0x7e   : > { %3568 = dma.done.wait (%p4564_p0), %s244_s9, 4096  }
  0x7f   : > { %3570 = vsyncadd (%p4564_p0), %s244_s9, 4294963200  ;;  %p4565_p11 = scmp.eq.s32.totalorder %s3661_s22, 0 }
  0x81   : > { %3572 = dma.done.wait (%p4565_p11), [#allocation6], 32896   ;;  %p4566_p8 = pmov %p4565_p11 }
  0x83   : > { %3574 = vsyncadd (%p4566_p8), [#allocation6], 4294934400  ;;  %p4567_p13 = pmov %p4566_p8 }
  0x84   : > { %p4568_p6 = pmov %p4566_p8 }
  0x85   : > { %3576 = dma.done.wait (%p4567_p13), [#allocation9], 32768  }
  0x86   : > { %3578 = vsyncadd (%p4568_p6), [#allocation9], 4294934528  ;;  %v321_v0 = vld [vmem:[#allocation5 + $0x8] sm:$0xff]  ;;  %v320_v2 = vld [vmem:[#allocation5] sm:$0xff]  ;;  %s4431_s6 = scalar_lea.vmem [#allocation10], %s2606_s8  ;;  %s2620_s14 = sshll.u32 %s3661_s22, 12 }
  0x87   : > { %v329_v1 = vld [vmem:[#allocation5 + $0x48] sm:$0xff]  ;;  %v328_v4 = vld [vmem:[#allocation5 + $0x40] sm:$0xff]  ;;  %s2493_s11 = sshll.u32 %s4431_s6, 4  ;;  %s4496_s10 = scalar_lea.hbm %s4551_s5, %s2620_s14  ;;  %s4498_s11 = int_to_ptr.vmem [resolvable:$true] %s2493_s11 }
  0x88   : > { %v2621_v3 = vpack.c.bf16 %v329_v1, %v321_v0  ;;  %v337_v5 = vld [vmem:[#allocation5 + $0x88] sm:$0xff]  ;;  %v2623_v7 = vpack.c.bf16 %v328_v4, %v320_v2  ;;  %v336_v9 = vld [vmem:[#allocation5 + $0x80] sm:$0xff]  ;;  %s2479_s22 = scalar_lea.sflag [#allocation4], %s3839_s17  ;;  %s3523_s30 = scalar_lea.vmem %s4498_s11, 4096 }
  0x89   : > { %v345_v6 = vld [vmem:[#allocation5 + $0xc8] sm:$0xff]  ;;  %v344_v10 = vld [vmem:[#allocation5 + $0xc0] sm:$0xff]  ;;  %p3524_p10 = scmp.ne.s32.totalorder %s4498_s11, %s3523_s30  ;;  %s3607_s12 = smov [#allocation10]  }
  0x8a   : > { %v2625_v8 = vpack.c.bf16 %v345_v6, %v337_v5  ;;  %v353_v11 = vld [vmem:[#allocation5 + $0x108] sm:$0xff]  ;;  %2622 = vmatprep.subr.bf16.mxu1 %v2621_v3  ;;  %v2627_v13 = vpack.c.bf16 %v344_v10, %v336_v9  ;;  %v352_v15 = vld [vmem:[#allocation5 + $0x100] sm:$0xff]  ;;  %s3527_s23 = sshll.u32 %s3607_s12, 4  ;;  %s3528_s23 = int_to_ptr.vmem [resolvable:$false] %s3527_s23 }
  0x8b   : > { %v361_v12 = vld [vmem:[#allocation5 + $0x148] sm:$0xff]  ;;  %2624 = vmatpush1.bf16.msra.mxu1 %v2623_v7  ;;  %v360_v16 = vld [vmem:[#allocation5 + $0x140] sm:$0xff]  ;;  %p3525_p3 = pnand %p3524_p10, %p3788_p5  ;;  %s3529_s7 = scalar_lea.vmem %s3528_s23, 8192 }
  0x8c   : > { %2626 = vmatprep.subr.bf16.mxu1 %v2625_v8  ;;  %v2629_v14 = vpack.c.bf16 %v361_v12, %v353_v11  ;;  %v369_v17 = vld [vmem:[#allocation5 + $0x188] sm:$0xff]  ;;  %v2631_v19 = vpack.c.bf16 %v360_v16, %v352_v15  ;;  %v368_v21 = vld [vmem:[#allocation5 + $0x180] sm:$0xff]  ;;  %p3530_p12 = scmp.lt.s32.totalorder %s4498_s11, %s3528_s23  ;;  %p3531_p2 = scmp.lt.s32.totalorder %s3529_s7, %s3523_s30 }
  0x8d   : > { %v377_v18 = vld [vmem:[#allocation5 + $0x1c8] sm:$0xff]  ;;  %v376_v22 = vld [vmem:[#allocation5 + $0x1c0] sm:$0xff]  ;;  %p3526_p7 = pneg %p3525_p3 }
  0x8e   : > { %v2633_v20 = vpack.c.bf16 %v377_v18, %v369_v17  ;;  %v385_v23 = vld [vmem:[#allocation5 + $0x208] sm:$0xff]  ;;  %v2635_v25 = vpack.c.bf16 %v376_v22, %v368_v21  ;;  %v384_v27 = vld [vmem:[#allocation5 + $0x200] sm:$0xff]  ;;  %p3532_p1 = por %p3531_p2, %p3530_p12 }
  0x8f   : > { %2628 = vmatpush1.bf16.msra.mxu1 %v2627_v13  ;;  %v393_v24 = vld [vmem:[#allocation5 + $0x248] sm:$0xff]  ;;  %v392_v28 = vld [vmem:[#allocation5 + $0x240] sm:$0xff] }
  0x90   : > { %2630 = vmatprep.subr.bf16.mxu1 %v2629_v14  ;;  %v2637_v26 = vpack.c.bf16 %v393_v24, %v385_v23  ;;  %v401_v29 = vld [vmem:[#allocation5 + $0x288] sm:$0xff]  ;;  %v2639_v31 = vpack.c.bf16 %v392_v28, %v384_v27  ;;  %v400_v33 = vld [vmem:[#allocation5 + $0x280] sm:$0xff]  ;;  %p3533_p4 = pnand %p3532_p1, %p3526_p7 }
  0x91   : > { %v409_v30 = vld [vmem:[#allocation5 + $0x2c8] sm:$0xff]  ;;  %v408_v34 = vld [vmem:[#allocation5 + $0x2c0] sm:$0xff] }
  0x92   : > { %v2641_v32 = vpack.c.bf16 %v409_v30, %v401_v29  ;;  %v417_v35 = vld [vmem:[#allocation5 + $0x308] sm:$0xff]  ;;  %v2643_v37 = vpack.c.bf16 %v408_v34, %v400_v33  ;;  %v416_v39 = vld [vmem:[#allocation5 + $0x300] sm:$0xff]  ;;  %v331_v33 = vld [vmem:[#allocation5 + $0x58] sm:$0xff] }
  0x93   : > { %2632 = vmatpush1.bf16.msra.mxu1 %v2631_v19  ;;  %v425_v36 = vld [vmem:[#allocation5 + $0x348] sm:$0xff]  ;;  %v424_v40 = vld [vmem:[#allocation5 + $0x340] sm:$0xff] }
  0x94   : > { %2634 = vmatprep.subr.bf16.mxu1 %v2633_v20  ;;  %v2645_v38 = vpack.c.bf16 %v425_v36, %v417_v35  ;;  %v3860_v41 = vld [vmem:[%s3845_s15 + $0x8] sm:$0xff]  ;;  %v2647_v44 = vpack.c.bf16 %v424_v40, %v416_v39  ;;  %v432_v46 = vld [vmem:[#allocation5 + $0x380] sm:$0xff]  ;;  %v322_v36 = vld [vmem:[#allocation5 + $0x10] sm:$0xff] }
  0x95   : > { %v433_v42 = vld [vmem:[#allocation5 + $0x388] sm:$0xff]  ;;  %682 = vmatprep.mubr.f32.mxu1 %v3860_v41  ;;  %v440_v47 = vld [vmem:[#allocation5 + $0x3c0] sm:$0xff]  ;;  %v347_v39 = vld [vmem:[#allocation5 + $0xd8] sm:$0xff] }
  0x96   : > { %v441_v43 = vld [vmem:[#allocation5 + $0x3c8] sm:$0xff]  ;;  %v2651_v50 = vpack.c.bf16 %v440_v47, %v432_v46  ;;  %v448_v52 = vld [vmem:[#allocation5 + $0x400] sm:$0xff]  ;;  %v346_v46 = vld [vmem:[#allocation5 + $0xd0] sm:$0xff] }
  0x97   : > { %2636 = vmatpush1.bf16.msra.mxu1 %v2635_v25  ;;  %v2649_v45 = vpack.c.bf16 %v441_v43, %v433_v42  ;;  %v449_v48 = vld [vmem:[#allocation5 + $0x408] sm:$0xff]  ;;  %v456_v53 = vld [vmem:[#allocation5 + $0x440] sm:$0xff]  ;;  %v3867_v43 = vld [vmem:[%s3845_s15 + $0x18] sm:$0xff] }
  0x98   : > { %2638 = vmatprep.subr.bf16.mxu1 %v2637_v26  ;;  %v457_v49 = vld [vmem:[#allocation5 + $0x448] sm:$0xff]  ;;  %v2655_v56 = vpack.c.bf16 %v456_v53, %v448_v52  ;;  %v464_v58 = vld [vmem:[#allocation5 + $0x480] sm:$0xff]  ;;  %v355_v47 = vld [vmem:[#allocation5 + $0x118] sm:$0xff] }
  0x99   : > { %v2653_v51 = vpack.c.bf16 %v457_v49, %v449_v48  ;;  %v465_v54 = vld [vmem:[#allocation5 + $0x488] sm:$0xff]  ;;  %v472_v59 = vld [vmem:[#allocation5 + $0x4c0] sm:$0xff]  ;;  %v363_v48 = vld [vmem:[#allocation5 + $0x158] sm:$0xff] }
  0x9a   : > { %v473_v55 = vld [vmem:[#allocation5 + $0x4c8] sm:$0xff]  ;;  %v2659_v62 = vpack.c.bf16 %v472_v59, %v464_v58  ;;  %v480_v0 = vld [vmem:[#allocation5 + $0x500] sm:$0xff]  ;;  %v3872_v49 = vld [vmem:[%s3845_s15 + $0x10] sm:$0xff]  ;;  %v2693_v52 = vpack.c.bf16 %v363_v48, %v355_v47 }
  0x9b   : > { %2640 = vmatpush1.bf16.msra.mxu1 %v2639_v31  ;;  %v2657_v57 = vpack.c.bf16 %v473_v55, %v465_v54  ;;  %v481_v60 = vld [vmem:[#allocation5 + $0x508] sm:$0xff]  ;;  %v488_v1 = vld [vmem:[#allocation5 + $0x540] sm:$0xff]  ;;  %v354_v53 = vld [vmem:[#allocation5 + $0x110] sm:$0xff] }
  0x9c   : > { %2642 = vmatprep.subr.bf16.mxu1 %v2641_v32  ;;  %v489_v61 = vld [vmem:[#allocation5 + $0x548] sm:$0xff]  ;;  %v2663_v4 = vpack.c.bf16 %v488_v1, %v480_v0  ;;  %v496_v6 = vld [vmem:[#allocation5 + $0x580] sm:$0xff]  ;;  %v323_v32 = vld [vmem:[#allocation5 + $0x18] sm:$0xff] }
  0x9d   : > { %v2661_v63 = vpack.c.bf16 %v489_v61, %v481_v60  ;;  %v497_v2 = vld [vmem:[#allocation5 + $0x588] sm:$0xff]  ;;  %v504_v7 = vld [vmem:[#allocation5 + $0x5c0] sm:$0xff]  ;;  %v2685_v35 = vpack.c.bf16 %v331_v33, %v323_v32  ;;  %v362_v54 = vld [vmem:[#allocation5 + $0x150] sm:$0xff] }
  0x9e   : > { %v505_v3 = vld [vmem:[#allocation5 + $0x5c8] sm:$0xff]  ;;  %v2667_v10 = vpack.c.bf16 %v504_v7, %v496_v6  ;;  %v512_v12 = vld [vmem:[#allocation5 + $0x600] sm:$0xff]  ;;  %v371_v55 = vld [vmem:[#allocation5 + $0x198] sm:$0xff]  ;;  %v2695_v58 = vpack.c.bf16 %v362_v54, %v354_v53 }
  0x9f   : > { %2644 = vmatpush1.bf16.msra.mxu1 %v2643_v37  ;;  %v2665_v5 = vpack.c.bf16 %v505_v3, %v497_v2  ;;  %v513_v8 = vld [vmem:[#allocation5 + $0x608] sm:$0xff]  ;;  %v520_v13 = vld [vmem:[#allocation5 + $0x640] sm:$0xff]  ;;  %v330_v37 = vld [vmem:[#allocation5 + $0x50] sm:$0xff] }
  0xa0   : > { %2646 = vmatprep.subr.bf16.mxu1 %v2645_v38  ;;  %v521_v9 = vld [vmem:[#allocation5 + $0x648] sm:$0xff]  ;;  %v2671_v16 = vpack.c.bf16 %v520_v13, %v512_v12  ;;  %v528_v18 = vld [vmem:[#allocation5 + $0x680] sm:$0xff]  ;;  %v339_v38 = vld [vmem:[#allocation5 + $0x98] sm:$0xff]  ;;  %v2687_v42 = vpack.c.bf16 %v330_v37, %v322_v36 }
  0xa1   : > { %v2669_v11 = vpack.c.bf16 %v521_v9, %v513_v8  ;;  %v529_v14 = vld [vmem:[#allocation5 + $0x688] sm:$0xff]  ;;  %v536_v19 = vld [vmem:[#allocation5 + $0x6c0] sm:$0xff]  ;;  %v3883_v59 = vld [vmem:[%s3845_s15 + $0x38] sm:$0xff] }
  0xa2   : > { %v537_v15 = vld [vmem:[#allocation5 + $0x6c8] sm:$0xff]  ;;  %v2675_v22 = vpack.c.bf16 %v536_v19, %v528_v18  ;;  %v544_v24 = vld [vmem:[#allocation5 + $0x700] sm:$0xff]  ;;  %v370_v61 = vld [vmem:[#allocation5 + $0x190] sm:$0xff] }
  0xa3   : > { %2648 = vmatpush1.bf16.msra.mxu1 %v2647_v44  ;;  %v2673_v17 = vpack.c.bf16 %v537_v15, %v529_v14  ;;  %v545_v20 = vld [vmem:[#allocation5 + $0x708] sm:$0xff]  ;;  %v552_v25 = vld [vmem:[#allocation5 + $0x740] sm:$0xff]  ;;  %v2689_v44 = vpack.c.bf16 %v347_v39, %v339_v38  ;;  %v395_v0 = vld [vmem:[#allocation5 + $0x258] sm:$0xff] }
  0xa4   : > { %2650 = vmatprep.subr.bf16.mxu1 %v2649_v45  ;;  %v553_v21 = vld [vmem:[#allocation5 + $0x748] sm:$0xff]  ;;  %v2679_v28 = vpack.c.bf16 %v552_v25, %v544_v24  ;;  %v560_v30 = vld [vmem:[#allocation5 + $0x780] sm:$0xff]  ;;  %v338_v45 = vld [vmem:[#allocation5 + $0x90] sm:$0xff] }
  0xa5   : > { %v2677_v23 = vpack.c.bf16 %v553_v21, %v545_v20  ;;  %v561_v26 = vld [vmem:[#allocation5 + $0x788] sm:$0xff]  ;;  %v568_v31 = vld [vmem:[#allocation5 + $0x7c0] sm:$0xff]  ;;  %v3888_v1 = vld [vmem:[%s3845_s15 + $0x30] sm:$0xff] }
  0xa6   : > { %v569_v27 = vld [vmem:[#allocation5 + $0x7c8] sm:$0xff]  ;;  %v2683_v34 = vpack.c.bf16 %v568_v31, %v560_v30  ;;  %v3864_v40 = vld [vmem:[%s3845_s15] sm:$0xff]  ;;  %v394_v6 = vld [vmem:[#allocation5 + $0x250] sm:$0xff] }
  0xa7   : > { %2652 = vmatpush1.bf16.msra.mxu1 %v2651_v50  ;;  %v2681_v29 = vpack.c.bf16 %v569_v27, %v561_v26  ;;  %v2691_v50 = vpack.c.bf16 %v346_v46, %v338_v45  ;;  %v3891_v3 = vld [vmem:[%s3845_s15 + $0x48] sm:$0xff]  ;;  %v403_v7 = vld [vmem:[#allocation5 + $0x298] sm:$0xff]  ;;  %v3896_v9 = vld [vmem:[%s3845_s15 + $0x40] sm:$0xff] }
  0xa8   : > { %2654 = vmatprep.subr.bf16.mxu1 %v2653_v51  ;;  %v3875_v51 = vld [vmem:[%s3845_s15 + $0x28] sm:$0xff]  ;;  %v411_v8 = vld [vmem:[#allocation5 + $0x2d8] sm:$0xff]  ;;  %v402_v13 = vld [vmem:[#allocation5 + $0x290] sm:$0xff] }
  0xa9   : > { %v2705_v12 = vpack.c.bf16 %v411_v8, %v403_v7  ;;  %v410_v14 = vld [vmem:[#allocation5 + $0x2d0] sm:$0xff]  ;;  %v419_v15 = vld [vmem:[#allocation5 + $0x318] sm:$0xff]  ;;  %v3907_v19 = vld [vmem:[%s3845_s15 + $0x68] sm:$0xff] }
  0xaa   : > { %v2707_v18 = vpack.c.bf16 %v410_v14, %v402_v13  ;;  %v418_v21 = vld [vmem:[#allocation5 + $0x310] sm:$0xff]  ;;  %v443_v24 = vld [vmem:[#allocation5 + $0x3d8] sm:$0xff]  ;;  %v3912_v25 = vld [vmem:[%s3845_s15 + $0x60] sm:$0xff] }
  0xab   : > { %2656 = vmatpush1.bf16.msra.mxu1 %v2655_v56  ;;  %v379_v56 = vld [vmem:[#allocation5 + $0x1d8] sm:$0xff]  ;;  %v442_v30 = vld [vmem:[#allocation5 + $0x3d0] sm:$0xff]  ;;  %v1390_v36 = vld [vmem:[#allocation8] sm:$0xff] }
  0xac   : > { %2658 = vmatprep.subr.bf16.mxu1 %v2657_v57  ;;  %v3880_v57 = vld [vmem:[%s3845_s15 + $0x20] sm:$0xff]  ;;  %v2697_v60 = vpack.c.bf16 %v379_v56, %v371_v55  ;;  %v3915_v27 = vld [vmem:[%s3845_s15 + $0x78] sm:$0xff]  ;;  %v1391_v33 = vld [vmem:[#allocation8 + $0x8] sm:$0xff] }
  0xad   : > { %v451_v31 = vld [vmem:[#allocation5 + $0x418] sm:$0xff]  ;;  %v3920_v38 = vld [vmem:[%s3845_s15 + $0x70] sm:$0xff]  ;;  %v1397_v53 = vld [vmem:[#allocation8 + $0x38] sm:$0xff] }
  0xae   : > { %v459_v32 = vld [vmem:[#allocation5 + $0x458] sm:$0xff]  ;;  %v450_v46 = vld [vmem:[#allocation5 + $0x410] sm:$0xff]  ;;  %v1394_v55 = vld [vmem:[#allocation8 + $0x20] sm:$0xff] }
  0xaf   : > { %2660 = vmatpush1.bf16.msra.mxu1 %v2659_v62  ;;  %v378_v62 = vld [vmem:[#allocation5 + $0x1d0] sm:$0xff]  ;;  %v1392_v37 = vld [vmem:[#allocation8 + $0x10] sm:$0xff]  ;;  %v2717_v45 = vpack.c.bf16 %v459_v32, %v451_v31  ;;  %v1401_v7 = vld [vmem:[#allocation8 + $0x58] sm:$0xff] }
  0xb0   : > { %2662 = vmatprep.subr.bf16.mxu1 %v2661_v63  ;;  %v387_v63 = vld [vmem:[#allocation5 + $0x218] sm:$0xff]  ;;  %v2699_v2 = vpack.c.bf16 %v378_v62, %v370_v61  ;;  %v458_v47 = vld [vmem:[#allocation5 + $0x450] sm:$0xff]  ;;  %v3944_v31 = vld [vmem:[%s3845_s15 + $0xa0] sm:$0xff] }
  0xb1   : > { %v467_v48 = vld [vmem:[#allocation5 + $0x498] sm:$0xff]  ;;  %v3936_v13 = vld [vmem:[%s3845_s15 + $0x90] sm:$0xff] }
  0xb2   : > { %v1396_v56 = vld [vmem:[#allocation8 + $0x30] sm:$0xff] }
  0xb3   : > { %2664 = vmatpush1.bf16.msra.mxu1 %v2663_v4  ;;  %v2701_v4 = vpack.c.bf16 %v395_v0, %v387_v63  ;;  %v3931_v61 = vld [vmem:[%s3845_s15 + $0x98] sm:$0xff]  ;;  %v2883_v62 = vpack.c.bf16 %v1396_v56, %v1394_v55  ;;  %v466_v0 = vld [vmem:[#allocation5 + $0x490] sm:$0xff] }
  0xb4   : > { %2666 = vmatprep.subr.bf16.mxu1 %v2665_v5  ;;  %v386_v5 = vld [vmem:[#allocation5 + $0x210] sm:$0xff] }
  0xb7   : > { %2668 = vmatpush1.bf16.msra.mxu1 %v2667_v10  ;;  %v2703_v10 = vpack.c.bf16 %v394_v6, %v386_v5  ;;  %v491_v5 = vld [vmem:[#allocation5 + $0x558] sm:$0xff]  ;;  %v1399_v6 = vld [vmem:[#allocation8 + $0x48] sm:$0xff] }
  0xb8   : > { %2670 = vmatprep.subr.bf16.mxu1 %v2669_v11  ;;  %v3899_v11 = vld [vmem:[%s3845_s15 + $0x58] sm:$0xff]  ;;  %v2885_v8 = vpack.c.bf16 %v1401_v7, %v1399_v6  ;;  %v1410_v6 = vld [vmem:[#allocation8 + $0xa0] sm:$0xff] }
  0xb9   : > { %v1412_v7 = vld [vmem:[#allocation8 + $0xb0] sm:$0xff] }
  0xbb   : > { %2672 = vmatpush1.bf16.msra.mxu1 %v2671_v16  ;;  %v427_v16 = vld [vmem:[#allocation5 + $0x358] sm:$0xff] }
  0xbc   : > { %2674 = vmatprep.subr.bf16.mxu1 %v2673_v17  ;;  %v3904_v17 = vld [vmem:[%s3845_s15 + $0x50] sm:$0xff]  ;;  %v2709_v20 = vpack.c.bf16 %v427_v16, %v419_v15  ;;  %v3939_v15 = vld [vmem:[%s3845_s15 + $0xa8] sm:$0xff] }
  0xbf   : > { %2676 = vmatpush1.bf16.msra.mxu1 %v2675_v22  ;;  %v426_v22 = vld [vmem:[#allocation5 + $0x350] sm:$0xff] }
  0xc0   : > { %2678 = vmatprep.subr.bf16.mxu1 %v2677_v23  ;;  %v435_v23 = vld [vmem:[#allocation5 + $0x398] sm:$0xff]  ;;  %v2711_v26 = vpack.c.bf16 %v426_v22, %v418_v21  ;;  %v490_v21 = vld [vmem:[#allocation5 + $0x550] sm:$0xff] }
  0xc1   : > { %v499_v22 = vld [vmem:[#allocation5 + $0x598] sm:$0xff] }
  0xc3   : > { %2680 = vmatpush1.bf16.msra.mxu1 %v2679_v28  ;;  %v2713_v28 = vpack.c.bf16 %v443_v24, %v435_v23  ;;  %v507_v23 = vld [vmem:[#allocation5 + $0x5d8] sm:$0xff]  ;;  %v1403_v24 = vld [vmem:[#allocation8 + $0x68] sm:$0xff] }
  0xc4   : > { %2682 = vmatprep.subr.bf16.mxu1 %v2681_v29  ;;  %v434_v29 = vld [vmem:[#allocation5 + $0x390] sm:$0xff] }
  0xc5   : > { %v2715_v39 = vpack.c.bf16 %v442_v30, %v434_v29  ;;  %v1402_v29 = vld [vmem:[#allocation8 + $0x60] sm:$0xff]  ;;  %v1404_v30 = vld [vmem:[#allocation8 + $0x70] sm:$0xff] }
  0xc7   : > { %2684 = vmatpush1.bf16.msra.mxu1 %v2683_v34  ;;  %v1393_v34 = vld [vmem:[#allocation8 + $0x18] sm:$0xff] }
  0xc8   : > { %2686 = vmatprep.subr.bf16.mxu1 %v2685_v35  ;;  %v2877_v35 = vpack.c.bf16 %v1393_v34, %v1391_v33  ;;  %v3947_v33 = vld [vmem:[%s3845_s15 + $0xb8] sm:$0xff]  ;;  %v2891_v34 = vpack.c.bf16 %v1404_v30, %v1402_v29  ;;  %v3968_v30 = vld [vmem:[%s3845_s15 + $0xd0] sm:$0xff] }
  0xc9   : > { %v1416_v29 = vld [vmem:[#allocation8 + $0xd0] sm:$0xff] }
  0xca   : > { %683 = vmatmul.mubr.f32.vlgmr.msra.gmra.mrb[0].mxu1 %v3864_v40  ;;  %2878 = vmatprep.subr.bf16.mxu0 %v2877_v35  ;;  %v2729_v35 = vpack.c.bf16 %v507_v23, %v499_v22  ;;  %v555_v22 = vld [vmem:[#allocation5 + $0x758] sm:$0xff]  ;;  %v1415_v23 = vld [vmem:[#allocation8 + $0xc8] sm:$0xff] }
  0xcb   : > { %2688 = vmatpush1.bf16.msra.mxu1 %v2687_v42  ;;  %688 = vmatprep.mubr.f32.mxu1 %v3867_v43  ;;  %v3923_v42 = vld [vmem:[%s3845_s15 + $0x88] sm:$0xff] }
  0xcc   : > { %2690 = vmatprep.subr.bf16.mxu1 %v2689_v44  ;;  %v2879_v44 = vpack.c.bf16 %v1392_v37, %v1390_v36  ;;  %v498_v36 = vld [vmem:[#allocation5 + $0x590] sm:$0xff] }
  0xcd   : > { %v506_v37 = vld [vmem:[#allocation5 + $0x5d0] sm:$0xff] }
  0xce   : > { %689 = vmatmul.mubr.f32.gmra.mrb[2].mxu1 %v3872_v49  ;;  %2880 = vmatpush1.bf16.msra.mxu0 %v2879_v44  ;;  %v523_v44 = vld [vmem:[#allocation5 + $0x658] sm:$0xff] }
  0xcf   : > { %2692 = vmatpush1.bf16.msra.mxu1 %v2691_v50  ;;  %694 = vmatprep.mubr.f32.mxu1 %v3875_v51  ;;  %v475_v50 = vld [vmem:[#allocation5 + $0x4d8] sm:$0xff] }
  0xd0   : > { %2694 = vmatprep.subr.bf16.mxu1 %v2693_v52  ;;  %v1395_v52 = vld [vmem:[#allocation8 + $0x28] sm:$0xff]  ;;  %v2721_v63 = vpack.c.bf16 %v475_v50, %v467_v48  ;;  %v1406_v48 = vld [vmem:[#allocation8 + $0x80] sm:$0xff]  ;;  %v1408_v50 = vld [vmem:[#allocation8 + $0x90] sm:$0xff] }
  0xd1   : > { %v2881_v54 = vpack.c.bf16 %v1397_v53, %v1395_v52  ;;  %v3952_v52 = vld [vmem:[%s3845_s15 + $0xb0] sm:$0xff]  ;;  %v2731_v53 = vpack.c.bf16 %v506_v37, %v498_v36  ;;  %v2895_v55 = vpack.c.bf16 %v1408_v50, %v1406_v48  ;;  %v1418_v50 = vld [vmem:[#allocation8 + $0xe0] sm:$0xff] }
  0xd2   : > { %695 = vmatmul.mubr.f32.gmra.mrb[4].mxu1 %v3880_v57  ;;  %v546_v37 = vld [vmem:[#allocation5 + $0x710] sm:$0xff] }
  0xd3   : > { %2696 = vmatpush1.bf16.msra.mxu1 %v2695_v58  ;;  %700 = vmatprep.mubr.f32.mxu1 %v3883_v59  ;;  %v3928_v58 = vld [vmem:[%s3845_s15 + $0x80] sm:$0xff] }
  0xd4   : > { %2698 = vmatprep.subr.bf16.mxu1 %v2697_v60  ;;  %v2719_v60 = vpack.c.bf16 %v458_v47, %v450_v46  ;;  %2882 = vmatprep.subr.bf16.mxu0 %v2881_v54  ;;  %v1409_v46 = vld [vmem:[#allocation8 + $0x98] sm:$0xff]  ;;  %v3955_v54 = vld [vmem:[%s3845_s15 + $0xc8] sm:$0xff] }
  0xd5   : > { %2884 = vmatpush1.bf16.msra.mxu0 %v2883_v62  ;;  %v522_v62 = vld [vmem:[#allocation5 + $0x650] sm:$0xff] }
  0xd6   : > { %701 = vmatmul.mubr.f32.gmra.mrb[6].mxu1 %v3888_v1  ;;  %2886 = vmatprep.subr.bf16.mxu0 %v2885_v8  ;;  %v3960_v8 = vld [vmem:[%s3845_s15 + $0xc0] sm:$0xff] }
  0xd7   : > { %2700 = vmatpush1.bf16.msra.mxu1 %v2699_v2  ;;  %706 = vmatprep.mubr.f32.mxu1 %v3891_v3  ;;  %v474_v2 = vld [vmem:[#allocation5 + $0x4d0] sm:$0xff] }
  0xd8   : > { %2702 = vmatprep.subr.bf16.mxu1 %v2701_v4  ;;  %v483_v4 = vld [vmem:[#allocation5 + $0x518] sm:$0xff]  ;;  %v2723_v14 = vpack.c.bf16 %v474_v2, %v466_v0  ;;  %v1411_v2 = vld [vmem:[#allocation8 + $0xa8] sm:$0xff] }
  0xd9   : > { %v539_v0 = vld [vmem:[#allocation5 + $0x6d8] sm:$0xff] }
  0xda   : > { %707 = vmatmul.mubr.f32.gmra.mrb[8].mxu1 %v3896_v9 }
  0xdb   : > { %2704 = vmatpush1.bf16.msra.mxu1 %v2703_v10  ;;  %712 = vmatprep.mubr.f32.mxu1 %v3899_v11  ;;  %v1398_v10 = vld [vmem:[#allocation8 + $0x40] sm:$0xff] }
  0xdc   : > { %2706 = vmatprep.subr.bf16.mxu1 %v2705_v12  ;;  %v1400_v12 = vld [vmem:[#allocation8 + $0x50] sm:$0xff] }
  0xdd   : > { %v2887_v16 = vpack.c.bf16 %v1400_v12, %v1398_v10  ;;  %v3963_v12 = vld [vmem:[%s3845_s15 + $0xd8] sm:$0xff] }
  0xde   : > { %713 = vmatmul.mubr.f32.gmra.mrb[10].mxu1 %v3904_v17 }
  0xdf   : > { %2708 = vmatpush1.bf16.msra.mxu1 %v2707_v18  ;;  %718 = vmatprep.mubr.f32.mxu1 %v3907_v19  ;;  %v2725_v18 = vpack.c.bf16 %v491_v5, %v483_v4  ;;  %v1413_v4 = vld [vmem:[#allocation8 + $0xb8] sm:$0xff] }
  0xe0   : > { %2710 = vmatprep.subr.bf16.mxu1 %v2709_v20  ;;  %v482_v20 = vld [vmem:[#allocation5 + $0x510] sm:$0xff]  ;;  %2888 = vmatpush1.bf16.msra.mxu0 %v2887_v16  ;;  %v2897_v5 = vpack.c.bf16 %v1413_v4, %v1411_v2  ;;  %v325_v4 = vld [vmem:[#allocation5 + $0x28] sm:$0xff] }
  0xe1   : > { %v2727_v32 = vpack.c.bf16 %v490_v21, %v482_v20  ;;  %v538_v20 = vld [vmem:[#allocation5 + $0x6d0] sm:$0xff]  ;;  %v547_v21 = vld [vmem:[#allocation5 + $0x718] sm:$0xff] }
  0xe2   : > { %719 = vmatmul.mubr.f32.gmra.mrb[12].mxu1 %v3912_v25  ;;  %v2741_v36 = vpack.c.bf16 %v555_v22, %v547_v21  ;;  %v570_v2 = vld [vmem:[#allocation5 + $0x7d0] sm:$0xff] }
  0xe3   : > { %2712 = vmatpush1.bf16.msra.mxu1 %v2711_v26  ;;  %724 = vmatprep.mubr.f32.mxu1 %v3915_v27  ;;  %v1405_v26 = vld [vmem:[#allocation8 + $0x78] sm:$0xff] }
  0xe4   : > { %2714 = vmatprep.subr.bf16.mxu1 %v2713_v28  ;;  %v2889_v28 = vpack.c.bf16 %v1405_v26, %v1403_v24  ;;  %v1417_v24 = vld [vmem:[#allocation8 + $0xd8] sm:$0xff] }
  0xe5   : > { %v2901_v26 = vpack.c.bf16 %v1417_v24, %v1415_v23  ;;  %v324_v23 = vld [vmem:[#allocation5 + $0x20] sm:$0xff] }
  0xe6   : > { %725 = vmatmul.mubr.f32.gmra.mrb[14].mxu1 %v3920_v38  ;;  %2890 = vmatprep.subr.bf16.mxu0 %v2889_v28  ;;  %v1414_v28 = vld [vmem:[#allocation8 + $0xc0] sm:$0xff]  ;;  %v332_v24 = vld [vmem:[#allocation5 + $0x60] sm:$0xff] }
  0xe7   : > { %2716 = vmatpush1.bf16.msra.mxu1 %v2715_v39  ;;  %730 = vmatprep.mubr.f32.mxu1 %v3923_v42  ;;  %v515_v39 = vld [vmem:[#allocation5 + $0x618] sm:$0xff] }
  0xe8   : > { %2718 = vmatprep.subr.bf16.mxu1 %v2717_v45  ;;  %2892 = vmatpush1.bf16.msra.mxu0 %v2891_v34  ;;  %v1407_v45 = vld [vmem:[#allocation8 + $0x88] sm:$0xff]  ;;  %v2733_v56 = vpack.c.bf16 %v523_v44, %v515_v39  ;;  %v3971_v34 = vld [vmem:[%s3845_s15 + $0xe8] sm:$0xff]  ;;  %v563_v44 = vld [vmem:[#allocation5 + $0x798] sm:$0xff] }
  0xe9   : > { %v2893_v47 = vpack.c.bf16 %v1409_v46, %v1407_v45  ;;  %v554_v39 = vld [vmem:[#allocation5 + $0x750] sm:$0xff]  ;;  %v571_v45 = vld [vmem:[#allocation5 + $0x7d8] sm:$0xff] }
  0xea   : > { %731 = vmatmul.mubr.f32.gmra.mrb[16].mxu1 %v3928_v58  ;;  %v1419_v46 = vld [vmem:[#allocation8 + $0xe8] sm:$0xff] }
  0xeb   : > { %2720 = vmatpush1.bf16.msra.mxu1 %v2719_v60  ;;  %736 = vmatprep.mubr.f32.mxu1 %v3931_v61  ;;  %v514_v60 = vld [vmem:[#allocation5 + $0x610] sm:$0xff] }
  0xec   : > { %2722 = vmatprep.subr.bf16.mxu1 %v2721_v63  ;;  %v531_v63 = vld [vmem:[#allocation5 + $0x698] sm:$0xff]  ;;  %2894 = vmatprep.subr.bf16.mxu0 %v2893_v47  ;;  %v2735_v10 = vpack.c.bf16 %v522_v62, %v514_v60  ;;  %v1421_v47 = vld [vmem:[#allocation8 + $0xf8] sm:$0xff] }
  0xed   : > { %2896 = vmatpush1.bf16.msra.mxu0 %v2895_v55  ;;  %v2737_v16 = vpack.c.bf16 %v539_v0, %v531_v63  ;;  %v2905_v48 = vpack.c.bf16 %v1421_v47, %v1419_v46  ;;  %v3976_v55 = vld [vmem:[%s3845_s15 + $0xe0] sm:$0xff]  ;;  %v3979_v60 = vld [vmem:[%s3845_s15 + $0xf8] sm:$0xff]  ;;  %v2745_v63 = vpack.c.bf16 %v571_v45, %v563_v44  ;;  %v562_v0 = vld [vmem:[#allocation5 + $0x790] sm:$0xff] }
  0xee   : > { %737 = vmatmul.mubr.f32.gmra.mrb[18].mxu1 %v3936_v13  ;;  %2898 = vmatprep.subr.bf16.mxu0 %v2897_v5  ;;  %v333_v5 = vld [vmem:[#allocation5 + $0x68] sm:$0xff]  ;;  %v340_v46 = vld [vmem:[#allocation5 + $0xa0] sm:$0xff] }
  0xef   : > { %2724 = vmatpush1.bf16.msra.mxu1 %v2723_v14  ;;  %742 = vmatprep.mubr.f32.mxu1 %v3939_v15  ;;  %v2899_v14 = vpack.c.bf16 %v1412_v7, %v1410_v6  ;;  %v1423_v6 = vld [vmem:[#allocation8 + $0x108] sm:$0xff]  ;;  %v1425_v7 = vld [vmem:[#allocation8 + $0x118] sm:$0xff]  ;;  %v2749_v22 = vpack.c.bf16 %v333_v5, %v325_v4 }
  0xf0   : > { %2726 = vmatprep.subr.bf16.mxu1 %v2725_v18  ;;  %v530_v18 = vld [vmem:[#allocation5 + $0x690] sm:$0xff]  ;;  %v348_v47 = vld [vmem:[#allocation5 + $0xe0] sm:$0xff] }
  0xf1   : > { %2900 = vmatpush1.bf16.msra.mxu0 %v2899_v14  ;;  %v1422_v14 = vld [vmem:[#allocation8 + $0x100] sm:$0xff]  ;;  %v356_v5 = vld [vmem:[#allocation5 + $0x120] sm:$0xff] }
  0xf2   : > { %743 = vmatmul.mubr.f32.gmra.mrb[20].mxu1 %v3944_v31  ;;  %2902 = vmatprep.subr.bf16.mxu0 %v2901_v26  ;;  %v341_v26 = vld [vmem:[#allocation5 + $0xa8] sm:$0xff] }
  0xf3   : > { %2728 = vmatpush1.bf16.msra.mxu1 %v2727_v32  ;;  %748 = vmatprep.mubr.f32.mxu1 %v3947_v33  ;;  %v2739_v32 = vpack.c.bf16 %v538_v20, %v530_v18  ;;  %v3984_v18 = vld [vmem:[%s3845_s15 + $0xf0] sm:$0xff]  ;;  %v2747_v20 = vpack.c.bf16 %v570_v2, %v562_v0  ;;  %v1432_v0 = vld [vmem:[#allocation8 + $0x150] sm:$0xff] }
  0xf4   : > { %2730 = vmatprep.subr.bf16.mxu1 %v2729_v35  ;;  %v2903_v35 = vpack.c.bf16 %v1416_v29, %v1414_v28  ;;  %v349_v28 = vld [vmem:[#allocation5 + $0xe8] sm:$0xff]  ;;  %v1427_v29 = vld [vmem:[#allocation8 + $0x128] sm:$0xff] }
  0xf5   : > { %v2753_v45 = vpack.c.bf16 %v349_v28, %v341_v26  ;;  %v372_v28 = vld [vmem:[#allocation5 + $0x1a0] sm:$0xff] }
  0xf6   : > { %749 = vmatmul.mubr.f32.gmra.mrb[22].mxu1 %v3952_v52  ;;  %2904 = vmatpush1.bf16.msra.mxu0 %v2903_v35 }
  0xf7   : > { %2732 = vmatpush1.bf16.msra.mxu1 %v2731_v53  ;;  %754 = vmatprep.mubr.f32.mxu1 %v3955_v54  ;;  %v1420_v53 = vld [vmem:[#allocation8 + $0xf0] sm:$0xff] }
  0xf8   : > { %2734 = vmatprep.subr.bf16.mxu1 %v2733_v56  ;;  %v2743_v56 = vpack.c.bf16 %v554_v39, %v546_v37  ;;  %v2907_v62 = vpack.c.bf16 %v1420_v53, %v1418_v50  ;;  %2906 = vmatprep.subr.bf16.mxu0 %v2905_v48  ;;  %v1428_v37 = vld [vmem:[#allocation8 + $0x130] sm:$0xff]  ;;  %v2751_v39 = vpack.c.bf16 %v332_v24, %v324_v23  ;;  %v357_v48 = vld [vmem:[#allocation5 + $0x128] sm:$0xff]  ;;  %v1431_v53 = vld [vmem:[#allocation8 + $0x148] sm:$0xff] }
  0xf9   : > { %v365_v50 = vld [vmem:[#allocation5 + $0x168] sm:$0xff] }
  0xfa   : > { %755 = vmatmul.mubr.f32.gmra.mrb[24].mxu1 %v3960_v8  ;;  %2908 = vmatpush1.bf16.msra.mxu0 %v2907_v62  ;;  %v2757_v4 = vpack.c.bf16 %v365_v50, %v357_v48  ;;  %v388_v50 = vld [vmem:[#allocation5 + $0x220] sm:$0xff] }
  0xfb   : > { %2736 = vmatpush1.bf16.msra.mxu1 %v2735_v10  ;;  %760 = vmatprep.mubr.f32.mxu1 %v3963_v12  ;;  %v2909_v10 = vpack.c.bf16 %v1425_v7, %v1423_v6  ;;  %v364_v6 = vld [vmem:[#allocation5 + $0x160] sm:$0xff]  ;;  %v373_v7 = vld [vmem:[#allocation5 + $0x1a8] sm:$0xff] }
  0xfc   : > { %2738 = vmatprep.subr.bf16.mxu1 %v2737_v16  ;;  %v1424_v16 = vld [vmem:[#allocation8 + $0x110] sm:$0xff]  ;;  %v2759_v23 = vpack.c.bf16 %v364_v6, %v356_v5 }
  0xfd   : > { %v2911_v21 = vpack.c.bf16 %v1424_v16, %v1422_v14  ;;  %2910 = vmatprep.subr.bf16.mxu0 %v2909_v10  ;;  %v381_v10 = vld [vmem:[#allocation5 + $0x1e8] sm:$0xff]  ;;  %v1435_v14 = vld [vmem:[#allocation8 + $0x168] sm:$0xff]  ;;  %v1437_v16 = vld [vmem:[#allocation8 + $0x178] sm:$0xff] }
  0xfe   : > { %761 = vmatmul.mubr.f32.gmra.mrb[26].mxu1 %v3968_v30  ;;  %v2761_v26 = vpack.c.bf16 %v381_v10, %v373_v7  ;;  %v404_v10 = vld [vmem:[#allocation5 + $0x2a0] sm:$0xff] }
  0xff   : > { %2740 = vmatpush1.bf16.msra.mxu1 %v2739_v32  ;;  %766 = vmatprep.mubr.f32.mxu1 %v3971_v34  ;;  %v1429_v32 = vld [vmem:[#allocation8 + $0x138] sm:$0xff] }
 0x100   : > { %2742 = vmatprep.subr.bf16.mxu1 %v2741_v36  ;;  %2912 = vmatpush1.bf16.msra.mxu0 %v2911_v21  ;;  %v2913_v35 = vpack.c.bf16 %v1429_v32, %v1427_v29  ;;  %v1426_v36 = vld [vmem:[#allocation8 + $0x120] sm:$0xff]  ;;  %v380_v29 = vld [vmem:[#allocation5 + $0x1e0] sm:$0xff] }
 0x101   : > { %v2915_v44 = vpack.c.bf16 %v1428_v37, %v1426_v36  ;;  %v1434_v21 = vld [vmem:[#allocation8 + $0x160] sm:$0xff]  ;;  %v1439_v36 = vld [vmem:[#allocation8 + $0x188] sm:$0xff]  ;;  %v1441_v37 = vld [vmem:[#allocation8 + $0x198] sm:$0xff] }
 0x102   : > { %767 = vmatmul.mubr.f32.gmra.mrb[28].mxu1 %v3976_v55  ;;  %2914 = vmatprep.subr.bf16.mxu0 %v2913_v35  ;;  %v389_v32 = vld [vmem:[#allocation5 + $0x228] sm:$0xff] }
 0x103   : > { %2744 = vmatpush1.bf16.msra.mxu1 %v2743_v56  ;;  %772 = vmatprep.mubr.f32.mxu1 %v3979_v60  ;;  %v1433_v56 = vld [vmem:[#allocation8 + $0x158] sm:$0xff]  ;;  %v397_v35 = vld [vmem:[#allocation5 + $0x268] sm:$0xff] }
 0x104   : > { %2746 = vmatprep.subr.bf16.mxu1 %v2745_v63  ;;  %2916 = vmatpush1.bf16.msra.mxu0 %v2915_v44  ;;  %v2917_v62 = vpack.c.bf16 %v1433_v56, %v1431_v53  ;;  %v1430_v63 = vld [vmem:[#allocation8 + $0x140] sm:$0xff]  ;;  %v2765_v48 = vpack.c.bf16 %v397_v35, %v389_v32  ;;  %v396_v53 = vld [vmem:[#allocation5 + $0x260] sm:$0xff] }
 0x105   : > { %v2919_v2 = vpack.c.bf16 %v1432_v0, %v1430_v63  ;;  %v1438_v44 = vld [vmem:[#allocation8 + $0x180] sm:$0xff]  ;;  %v1443_v63 = vld [vmem:[#allocation8 + $0x1a8] sm:$0xff]  ;;  %v1445_v0 = vld [vmem:[#allocation8 + $0x1b8] sm:$0xff]  ;;  %v2767_v5 = vpack.c.bf16 %v396_v53, %v388_v50 }
 0x106   : > { %773 = vmatmul.mubr.f32.gmra.mrb[30].mxu1 %v3984_v18  ;;  %2918 = vmatprep.subr.bf16.mxu0 %v2917_v62  ;;  %v405_v56 = vld [vmem:[#allocation5 + $0x2a8] sm:$0xff]  ;;  %v420_v35 = vld [vmem:[#allocation5 + $0x320] sm:$0xff] }
 0x107   : > { %2748 = vmatpush1.bf16.msra.mxu1 %v2747_v20  ;;  %843 = vmatprep.mubr.f32.mxu1 %v3860_v41  ;;  %v2755_v41 = vpack.c.bf16 %v348_v47, %v340_v46  ;;  %v2921_v20 = vpack.c.bf16 %v1437_v16, %v1435_v14  ;;  %v2763_v46 = vpack.c.bf16 %v380_v29, %v372_v28  ;;  %v413_v62 = vld [vmem:[#allocation5 + $0x2e8] sm:$0xff]  ;;  %v412_v14 = vld [vmem:[#allocation5 + $0x2e0] sm:$0xff] }
 0x108   : > { %2750 = vmatprep.subr.bf16.mxu1 %v2749_v22  ;;  %2920 = vmatpush1.bf16.msra.mxu0 %v2919_v2  ;;  %v1436_v22 = vld [vmem:[#allocation8 + $0x170] sm:$0xff]  ;;  %v1442_v2 = vld [vmem:[#allocation8 + $0x1a0] sm:$0xff]  ;;  %v2769_v7 = vpack.c.bf16 %v413_v62, %v405_v56  ;;  %v2771_v28 = vpack.c.bf16 %v412_v14, %v404_v10  ;;  %v436_v62 = vld [vmem:[#allocation5 + $0x3a0] sm:$0xff] }
 0x109   : > { %v2923_v24 = vpack.c.bf16 %v1436_v22, %v1434_v21  ;;  %2922 = vmatprep.subr.bf16.mxu0 %v2921_v20  ;;  %v421_v16 = vld [vmem:[#allocation5 + $0x328] sm:$0xff]  ;;  %v1447_v21 = vld [vmem:[#allocation8 + $0x1c8] sm:$0xff]  ;;  %v1449_v22 = vld [vmem:[#allocation8 + $0x1d8] sm:$0xff] }
 0x10a   : > { %844 = vmatmul.mubr.f32.vlgmr.msra.gmra.mrb[32].mxu1 %v3864_v40  ;;  %v429_v20 = vld [vmem:[#allocation5 + $0x368] sm:$0xff]  ;;  %v452_v10 = vld [vmem:[#allocation5 + $0x420] sm:$0xff] }
 0x10b   : > { %2752 = vmatpush1.bf16.msra.mxu1 %v2751_v39  ;;  %849 = vmatprep.mubr.f32.mxu1 %v3867_v43  ;;  %v2925_v39 = vpack.c.bf16 %v1441_v37, %v1439_v36  ;;  %v2773_v32 = vpack.c.bf16 %v429_v20, %v421_v16  ;;  %v428_v36 = vld [vmem:[#allocation5 + $0x360] sm:$0xff]  ;;  %v437_v37 = vld [vmem:[#allocation5 + $0x3a8] sm:$0xff] }
 0x10c   : > { %2754 = vmatprep.subr.bf16.mxu1 %v2753_v45  ;;  %2924 = vmatpush1.bf16.msra.mxu0 %v2923_v24  ;;  %v1440_v45 = vld [vmem:[#allocation8 + $0x190] sm:$0xff]  ;;  %v1446_v24 = vld [vmem:[#allocation8 + $0x1c0] sm:$0xff]  ;;  %v2775_v50 = vpack.c.bf16 %v428_v36, %v420_v35  ;;  %v460_v14 = vld [vmem:[#allocation5 + $0x460] sm:$0xff] }
 0x10d   : > { %v2927_v47 = vpack.c.bf16 %v1440_v45, %v1438_v44  ;;  %2926 = vmatprep.subr.bf16.mxu0 %v2925_v39  ;;  %v445_v39 = vld [vmem:[#allocation5 + $0x3e8] sm:$0xff]  ;;  %v1451_v44 = vld [vmem:[#allocation8 + $0x1e8] sm:$0xff]  ;;  %v1453_v45 = vld [vmem:[#allocation8 + $0x1f8] sm:$0xff] }
 0x10e   : > { %850 = vmatmul.mubr.f32.gmra.mrb[34].mxu1 %v3872_v49  ;;  %v2777_v56 = vpack.c.bf16 %v445_v39, %v437_v37  ;;  %v469_v16 = vld [vmem:[#allocation5 + $0x4a8] sm:$0xff]  ;;  %v484_v35 = vld [vmem:[#allocation5 + $0x520] sm:$0xff] }
 0x10f   : > { %2756 = vmatpush1.bf16.msra.mxu1 %v2755_v41  ;;  %855 = vmatprep.mubr.f32.mxu1 %v3875_v51  ;;  %v2929_v41 = vpack.c.bf16 %v1445_v0, %v1443_v63  ;;  %v444_v63 = vld [vmem:[#allocation5 + $0x3e0] sm:$0xff]  ;;  %v453_v0 = vld [vmem:[#allocation5 + $0x428] sm:$0xff] }
 0x110   : > { %2758 = vmatprep.subr.bf16.mxu1 %v2757_v4  ;;  %2928 = vmatpush1.bf16.msra.mxu0 %v2927_v47  ;;  %v1444_v4 = vld [vmem:[#allocation8 + $0x1b0] sm:$0xff]  ;;  %v1450_v47 = vld [vmem:[#allocation8 + $0x1e0] sm:$0xff]  ;;  %v492_v36 = vld [vmem:[#allocation5 + $0x560] sm:$0xff] }
 0x111   : > { %v2931_v6 = vpack.c.bf16 %v1444_v4, %v1442_v2  ;;  %2930 = vmatprep.subr.bf16.mxu0 %v2929_v41  ;;  %v461_v41 = vld [vmem:[#allocation5 + $0x468] sm:$0xff]  ;;  %v1455_v2 = vld [vmem:[#allocation8 + $0x208] sm:$0xff]  ;;  %v1457_v4 = vld [vmem:[#allocation8 + $0x218] sm:$0xff] }
 0x112   : > { %856 = vmatmul.mubr.f32.gmra.mrb[36].mxu1 %v3880_v57  ;;  %v477_v20 = vld [vmem:[#allocation5 + $0x4e8] sm:$0xff] }
 0x113   : > { %2760 = vmatpush1.bf16.msra.mxu1 %v2759_v23  ;;  %861 = vmatprep.mubr.f32.mxu1 %v3883_v59  ;;  %v2933_v23 = vpack.c.bf16 %v1449_v22, %v1447_v21  ;;  %v2783_v21 = vpack.c.bf16 %v460_v14, %v452_v10  ;;  %v2785_v22 = vpack.c.bf16 %v477_v20, %v469_v16  ;;  %v501_v37 = vld [vmem:[#allocation5 + $0x5a8] sm:$0xff]  ;;  %v548_v20 = vld [vmem:[#allocation5 + $0x720] sm:$0xff] }
 0x114   : > { %2762 = vmatprep.subr.bf16.mxu1 %v2761_v26  ;;  %2932 = vmatpush1.bf16.msra.mxu0 %v2931_v6  ;;  %v1448_v26 = vld [vmem:[#allocation8 + $0x1d0] sm:$0xff]  ;;  %v2779_v6 = vpack.c.bf16 %v444_v63, %v436_v62  ;;  %v509_v39 = vld [vmem:[#allocation5 + $0x5e8] sm:$0xff]  ;;  %v516_v62 = vld [vmem:[#allocation5 + $0x620] sm:$0xff] }
 0x115   : > { %v2935_v29 = vpack.c.bf16 %v1448_v26, %v1446_v24  ;;  %2934 = vmatprep.subr.bf16.mxu0 %v2933_v23  ;;  %v468_v23 = vld [vmem:[#allocation5 + $0x4a0] sm:$0xff]  ;;  %v485_v26 = vld [vmem:[#allocation5 + $0x528] sm:$0xff] }
 0x116   : > { %862 = vmatmul.mubr.f32.gmra.mrb[38].mxu1 %v3888_v1  ;;  %v476_v24 = vld [vmem:[#allocation5 + $0x4e0] sm:$0xff]  ;;  %v557_v10 = vld [vmem:[#allocation5 + $0x768] sm:$0xff] }
 0x117   : > { %2764 = vmatpush1.bf16.msra.mxu1 %v2763_v46  ;;  %867 = vmatprep.mubr.f32.mxu1 %v3891_v3  ;;  %v2937_v46 = vpack.c.bf16 %v1453_v45, %v1451_v44  ;;  %v2791_v44 = vpack.c.bf16 %v492_v36, %v484_v35  ;;  %v2793_v45 = vpack.c.bf16 %v509_v39, %v501_v37  ;;  %v524_v63 = vld [vmem:[#allocation5 + $0x660] sm:$0xff]  ;;  %v335_v35 = vld [vmem:[#allocation5 + $0x78] sm:$0xff]  ;;  %v326_v39 = vld [vmem:[#allocation5 + $0x30] sm:$0xff] }
 0x118   : > { %2766 = vmatprep.subr.bf16.mxu1 %v2765_v48  ;;  %2936 = vmatpush1.bf16.msra.mxu0 %v2935_v29  ;;  %v1452_v48 = vld [vmem:[#allocation8 + $0x1f0] sm:$0xff]  ;;  %v2787_v29 = vpack.c.bf16 %v476_v24, %v468_v23  ;;  %v573_v23 = vld [vmem:[#allocation5 + $0x7e8] sm:$0xff] }
 0x119   : > { %v2939_v53 = vpack.c.bf16 %v1452_v48, %v1450_v47  ;;  %2938 = vmatprep.subr.bf16.mxu0 %v2937_v46  ;;  %v500_v46 = vld [vmem:[#allocation5 + $0x5a0] sm:$0xff]  ;;  %v517_v48 = vld [vmem:[#allocation5 + $0x628] sm:$0xff] }
 0x11a   : > { %868 = vmatmul.mubr.f32.gmra.mrb[40].mxu1 %v3896_v9  ;;  %v508_v47 = vld [vmem:[#allocation5 + $0x5e0] sm:$0xff] }
 0x11b   : > { %2768 = vmatpush1.bf16.msra.mxu1 %v2767_v5  ;;  %873 = vmatprep.mubr.f32.mxu1 %v3899_v11  ;;  %v2941_v5 = vpack.c.bf16 %v1457_v4, %v1455_v2  ;;  %v2799_v2 = vpack.c.bf16 %v524_v63, %v516_v62  ;;  %v359_v62 = vld [vmem:[#allocation5 + $0x138] sm:$0xff] }
 0x11c   : > { %2770 = vmatprep.subr.bf16.mxu1 %v2769_v7  ;;  %2940 = vmatpush1.bf16.msra.mxu0 %v2939_v53  ;;  %v2781_v7 = vpack.c.bf16 %v461_v41, %v453_v0  ;;  %v2795_v53 = vpack.c.bf16 %v508_v47, %v500_v46  ;;  %v533_v0 = vld [vmem:[#allocation5 + $0x6a8] sm:$0xff]  ;;  %v351_v46 = vld [vmem:[#allocation5 + $0xf8] sm:$0xff] }
 0x11d   : > { %2942 = vmatprep.subr.bf16.mxu0 %v2941_v5  ;;  %v541_v41 = vld [vmem:[#allocation5 + $0x6e8] sm:$0xff]  ;;  %v532_v5 = vld [vmem:[#allocation5 + $0x6a0] sm:$0xff]  ;;  %v367_v63 = vld [vmem:[#allocation5 + $0x178] sm:$0xff] }
 0x11e   : > { %874 = vmatmul.mubr.f32.gmra.mrb[42].mxu1 %v3904_v17  ;;  %v2801_v4 = vpack.c.bf16 %v541_v41, %v533_v0  ;;  %v4020_v47 = vld [vmem:[%s3845_s15 + $0x8] sm:$0xff]  ;;  %v2821_v41 = vpack.c.bf16 %v367_v63, %v359_v62  ;;  %v479_v62 = vld [vmem:[#allocation5 + $0x4f8] sm:$0xff] }
 0x11f   : > { %2772 = vmatpush1.bf16.msra.mxu1 %v2771_v28  ;;  %879 = vmatprep.mubr.f32.mxu1 %v3907_v19  ;;  %v493_v28 = vld [vmem:[#allocation5 + $0x568] sm:$0xff] }
 0x120   : > { %2774 = vmatprep.subr.bf16.mxu1 %v2773_v32  ;;  %v2789_v32 = vpack.c.bf16 %v493_v28, %v485_v26  ;;  %v564_v28 = vld [vmem:[#allocation5 + $0x7a0] sm:$0xff] }
 0x122   : > { %880 = vmatmul.mubr.f32.gmra.mrb[44].mxu1 %v3912_v25 }
 0x123   : > { %2776 = vmatpush1.bf16.msra.mxu1 %v2775_v50  ;;  %885 = vmatprep.mubr.f32.mxu1 %v3915_v27  ;;  %v525_v50 = vld [vmem:[#allocation5 + $0x668] sm:$0xff] }
 0x124   : > { %2778 = vmatprep.subr.bf16.mxu1 %v2777_v56  ;;  %v2797_v56 = vpack.c.bf16 %v525_v50, %v517_v48 }
 0x126   : > { %886 = vmatmul.mubr.f32.gmra.mrb[46].mxu1 %v3920_v38 }
 0x127   : > { %2780 = vmatpush1.bf16.msra.mxu1 %v2779_v6  ;;  %891 = vmatprep.mubr.f32.mxu1 %v3923_v42  ;;  %v540_v6 = vld [vmem:[#allocation5 + $0x6e0] sm:$0xff] }
 0x128   : > { %2782 = vmatprep.subr.bf16.mxu1 %v2781_v7  ;;  %v549_v7 = vld [vmem:[#allocation5 + $0x728] sm:$0xff]  ;;  %v2803_v14 = vpack.c.bf16 %v540_v6, %v532_v5  ;;  %v375_v5 = vld [vmem:[#allocation5 + $0x1b8] sm:$0xff] }
 0x129   : > { %v2805_v16 = vpack.c.bf16 %v557_v10, %v549_v7  ;;  %v383_v6 = vld [vmem:[#allocation5 + $0x1f8] sm:$0xff] }
 0x12a   : > { %892 = vmatmul.mubr.f32.gmra.mrb[48].mxu1 %v3928_v58  ;;  %v2825_v10 = vpack.c.bf16 %v383_v6, %v375_v5  ;;  %v486_v5 = vld [vmem:[#allocation5 + $0x530] sm:$0xff]  ;;  %v503_v6 = vld [vmem:[#allocation5 + $0x5b8] sm:$0xff] }
 0x12b   : > { %2784 = vmatpush1.bf16.msra.mxu1 %v2783_v21  ;;  %897 = vmatprep.mubr.f32.mxu1 %v3931_v61  ;;  %v556_v21 = vld [vmem:[#allocation5 + $0x760] sm:$0xff] }
 0x12c   : > { %2786 = vmatprep.subr.bf16.mxu1 %v2785_v22  ;;  %v565_v22 = vld [vmem:[#allocation5 + $0x7a8] sm:$0xff]  ;;  %v2807_v24 = vpack.c.bf16 %v556_v21, %v548_v20  ;;  %v399_v20 = vld [vmem:[#allocation5 + $0x278] sm:$0xff] }
 0x12d   : > { %v2809_v26 = vpack.c.bf16 %v573_v23, %v565_v22  ;;  %v390_v22 = vld [vmem:[#allocation5 + $0x230] sm:$0xff]  ;;  %v407_v23 = vld [vmem:[#allocation5 + $0x2b8] sm:$0xff] }
 0x12e   : > { %898 = vmatmul.mubr.f32.gmra.mrb[50].mxu1 %v3936_v13 }
 0x12f   : > { %2788 = vmatpush1.bf16.msra.mxu1 %v2787_v29  ;;  %903 = vmatprep.mubr.f32.mxu1 %v3939_v15  ;;  %v572_v29 = vld [vmem:[#allocation5 + $0x7e0] sm:$0xff] }
 0x130   : > { %2790 = vmatprep.subr.bf16.mxu1 %v2789_v32  ;;  %v327_v32 = vld [vmem:[#allocation5 + $0x38] sm:$0xff]  ;;  %v2811_v36 = vpack.c.bf16 %v572_v29, %v564_v28  ;;  %v406_v28 = vld [vmem:[#allocation5 + $0x2b0] sm:$0xff] }
 0x131   : > { %v2813_v37 = vpack.c.bf16 %v335_v35, %v327_v32  ;;  %v423_v29 = vld [vmem:[#allocation5 + $0x338] sm:$0xff] }
 0x132   : > { %904 = vmatmul.mubr.f32.gmra.mrb[52].mxu1 %v3944_v31  ;;  %v431_v32 = vld [vmem:[#allocation5 + $0x378] sm:$0xff] }
 0x133   : > { %2792 = vmatpush1.bf16.msra.mxu1 %v2791_v44  ;;  %909 = vmatprep.mubr.f32.mxu1 %v3947_v33  ;;  %v334_v44 = vld [vmem:[#allocation5 + $0x70] sm:$0xff]  ;;  %v2837_v35 = vpack.c.bf16 %v431_v32, %v423_v29  ;;  %v575_v29 = vld [vmem:[#allocation5 + $0x7f8] sm:$0xff] }
 0x134   : > { %2794 = vmatprep.subr.bf16.mxu1 %v2793_v45  ;;  %v343_v45 = vld [vmem:[#allocation5 + $0xb8] sm:$0xff]  ;;  %v2815_v48 = vpack.c.bf16 %v334_v44, %v326_v39  ;;  %v566_v32 = vld [vmem:[#allocation5 + $0x7b0] sm:$0xff] }
 0x135   : > { %v2817_v50 = vpack.c.bf16 %v351_v46, %v343_v45  ;;  %v447_v39 = vld [vmem:[#allocation5 + $0x3f8] sm:$0xff]  ;;  %v438_v45 = vld [vmem:[#allocation5 + $0x3b0] sm:$0xff] }
 0x136   : > { %910 = vmatmul.mubr.f32.gmra.mrb[54].mxu1 %v3952_v52  ;;  %v455_v46 = vld [vmem:[#allocation5 + $0x438] sm:$0xff] }
 0x137   : > { %2796 = vmatpush1.bf16.msra.mxu1 %v2795_v53  ;;  %915 = vmatprep.mubr.f32.mxu1 %v3955_v54  ;;  %v342_v53 = vld [vmem:[#allocation5 + $0xb0] sm:$0xff] }
 0x138   : > { %2798 = vmatprep.subr.bf16.mxu1 %v2797_v56  ;;  %v350_v56 = vld [vmem:[#allocation5 + $0xf0] sm:$0xff] }
 0x139   : > { %v2819_v0 = vpack.c.bf16 %v350_v56, %v342_v53  ;;  %v454_v53 = vld [vmem:[#allocation5 + $0x430] sm:$0xff]  ;;  %v471_v56 = vld [vmem:[#allocation5 + $0x4b8] sm:$0xff] }
 0x13a   : > { %916 = vmatmul.mubr.f32.gmra.mrb[56].mxu1 %v3960_v8  ;;  %v2849_v63 = vpack.c.bf16 %v479_v62, %v471_v56  ;;  %v1454_v56 = vld [vmem:[#allocation8 + $0x200] sm:$0xff]  ;;  %v1456_v62 = vld [vmem:[#allocation8 + $0x210] sm:$0xff] }
 0x13b   : > { %2800 = vmatpush1.bf16.msra.mxu1 %v2799_v2  ;;  %921 = vmatprep.mubr.f32.mxu1 %v3963_v12  ;;  %v358_v2 = vld [vmem:[#allocation5 + $0x130] sm:$0xff] }
 0x13c   : > { %2802 = vmatprep.subr.bf16.mxu1 %v2801_v4  ;;  %v366_v4 = vld [vmem:[#allocation5 + $0x170] sm:$0xff] }
 0x13d   : > { %v2823_v7 = vpack.c.bf16 %v366_v4, %v358_v2  ;;  %v495_v2 = vld [vmem:[#allocation5 + $0x578] sm:$0xff] }
 0x13e   : > { %922 = vmatmul.mubr.f32.gmra.mrb[58].mxu1 %v3968_v30 }
 0x13f   : > { %2804 = vmatpush1.bf16.msra.mxu1 %v2803_v14  ;;  %927 = vmatprep.mubr.f32.mxu1 %v3971_v34  ;;  %v374_v14 = vld [vmem:[#allocation5 + $0x1b0] sm:$0xff] }
 0x140   : > { %2806 = vmatprep.subr.bf16.mxu1 %v2805_v16  ;;  %v391_v16 = vld [vmem:[#allocation5 + $0x238] sm:$0xff] }
 0x141   : > { %v2829_v21 = vpack.c.bf16 %v399_v20, %v391_v16  ;;  %v527_v16 = vld [vmem:[#allocation5 + $0x678] sm:$0xff] }
 0x142   : > { %928 = vmatmul.mubr.f32.gmra.mrb[60].mxu1 %v3976_v55 }
 0x143   : > { %2808 = vmatpush1.bf16.msra.mxu1 %v2807_v24  ;;  %933 = vmatprep.mubr.f32.mxu1 %v3979_v60  ;;  %v415_v24 = vld [vmem:[#allocation5 + $0x2f8] sm:$0xff] }
 0x144   : > { %2810 = vmatprep.subr.bf16.mxu1 %v2809_v26  ;;  %v2833_v26 = vpack.c.bf16 %v415_v24, %v407_v23  ;;  %v534_v23 = vld [vmem:[#allocation5 + $0x6b0] sm:$0xff]  ;;  %v551_v24 = vld [vmem:[#allocation5 + $0x738] sm:$0xff] }
 0x146   : > { %934 = vmatmul.mubr.f32.gmra.mrb[62].mxu1 %v3984_v18 }
 0x147   : > { %2812 = vmatpush1.bf16.msra.mxu1 %v2811_v36  ;;  %1004 = vmatprep.mubr.f32.mxu1 %v4020_v47  ;;  %v422_v36 = vld [vmem:[#allocation5 + $0x330] sm:$0xff] }
 0x148   : > { %2814 = vmatprep.subr.bf16.mxu1 %v2813_v37  ;;  %v439_v37 = vld [vmem:[#allocation5 + $0x3b8] sm:$0xff] }
 0x149   : > { %v2841_v44 = vpack.c.bf16 %v447_v39, %v439_v37  ;;  %v3383_v37 = vld [vmem:[%s3845_s15 + $0x30] sm:$0xff]  ;;  %v3384_v39 = vld [vmem:[%s3845_s15 + $0x48] sm:$0xff] }
 0x14a   : > { %1005 = vmatmul.mubr.f32.vlgmr.msra.gmra.mrb[64].mxu1 %v3864_v40  ;;  %v382_v40 = vld [vmem:[#allocation5 + $0x1f0] sm:$0xff] }
 0x14b   : > { %2816 = vmatpush1.bf16.msra.mxu1 %v2815_v48  ;;  %1010 = vmatprep.mubr.f32.mxu1 %v3867_v43  ;;  %v2827_v43 = vpack.c.bf16 %v382_v40, %v374_v14  ;;  %v463_v48 = vld [vmem:[#allocation5 + $0x478] sm:$0xff]  ;;  %v502_v14 = vld [vmem:[#allocation5 + $0x5b0] sm:$0xff] }
 0x14c   : > { %2818 = vmatprep.subr.bf16.mxu1 %v2817_v50  ;;  %v2845_v50 = vpack.c.bf16 %v463_v48, %v455_v46  ;;  %v519_v40 = vld [vmem:[#allocation5 + $0x638] sm:$0xff] }
 0x14d   : > { %v2861_v20 = vpack.c.bf16 %v527_v16, %v519_v40  ;;  %v3386_v46 = vld [vmem:[%s3845_s15 + $0x58] sm:$0xff]  ;;  %v1463_v40 = vld [vmem:[#allocation8 + $0x248] sm:$0xff]  ;;  %v1465_v16 = vld [vmem:[#allocation8 + $0x258] sm:$0xff] }
 0x14e   : > { %1011 = vmatmul.mubr.f32.gmra.mrb[66].mxu1 %v3872_v49  ;;  %v398_v49 = vld [vmem:[#allocation5 + $0x270] sm:$0xff] }
 0x14f   : > { %2820 = vmatpush1.bf16.msra.mxu1 %v2819_v0  ;;  %1016 = vmatprep.mubr.f32.mxu1 %v3875_v51  ;;  %v2831_v51 = vpack.c.bf16 %v398_v49, %v390_v22  ;;  %v470_v0 = vld [vmem:[#allocation5 + $0x4b0] sm:$0xff]  ;;  %v543_v22 = vld [vmem:[#allocation5 + $0x6f8] sm:$0xff] }
 0x150   : > { %2822 = vmatprep.subr.bf16.mxu1 %v2821_v41  ;;  %v487_v41 = vld [vmem:[#allocation5 + $0x538] sm:$0xff] }
 0x151   : > { %v2853_v4 = vpack.c.bf16 %v495_v2, %v487_v41 }
 0x152   : > { %1017 = vmatmul.mubr.f32.gmra.mrb[68].mxu1 %v3880_v57  ;;  %v414_v57 = vld [vmem:[#allocation5 + $0x2f0] sm:$0xff] }
 0x153   : > { %2824 = vmatpush1.bf16.msra.mxu1 %v2823_v7  ;;  %1022 = vmatprep.mubr.f32.mxu1 %v3883_v59  ;;  %v2835_v59 = vpack.c.bf16 %v414_v57, %v406_v28  ;;  %v511_v7 = vld [vmem:[#allocation5 + $0x5f8] sm:$0xff]  ;;  %v550_v28 = vld [vmem:[#allocation5 + $0x730] sm:$0xff] }
 0x154   : > { %2826 = vmatprep.subr.bf16.mxu1 %v2825_v10  ;;  %v2857_v10 = vpack.c.bf16 %v511_v7, %v503_v6  ;;  %v567_v57 = vld [vmem:[#allocation5 + $0x7b8] sm:$0xff]  ;;  %v3389_v6 = vld [vmem:[%s3845_s15 + $0x60] sm:$0xff] }
 0x156   : > { %1023 = vmatmul.mubr.f32.gmra.mrb[70].mxu1 %v3888_v1  ;;  %v430_v1 = vld [vmem:[#allocation5 + $0x370] sm:$0xff] }
 0x157   : > { %2828 = vmatpush1.bf16.msra.mxu1 %v2827_v43  ;;  %1028 = vmatprep.mubr.f32.mxu1 %v3891_v3  ;;  %v2839_v3 = vpack.c.bf16 %v430_v1, %v422_v36  ;;  %v518_v43 = vld [vmem:[#allocation5 + $0x630] sm:$0xff]  ;;  %v3380_v36 = vld [vmem:[%s3845_s15 + $0x28] sm:$0xff] }
 0x158   : > { %2830 = vmatprep.subr.bf16.mxu1 %v2829_v21  ;;  %v535_v21 = vld [vmem:[#allocation5 + $0x6b8] sm:$0xff] }
 0x159   : > { %v2865_v49 = vpack.c.bf16 %v543_v22, %v535_v21 }
 0x15a   : > { %1029 = vmatmul.mubr.f32.gmra.mrb[72].mxu1 %v3896_v9  ;;  %v446_v9 = vld [vmem:[#allocation5 + $0x3f0] sm:$0xff] }
 0x15b   : > { %2832 = vmatpush1.bf16.msra.mxu1 %v2831_v51  ;;  %1034 = vmatprep.mubr.f32.mxu1 %v3899_v11  ;;  %v2843_v11 = vpack.c.bf16 %v446_v9, %v438_v45  ;;  %v559_v51 = vld [vmem:[#allocation5 + $0x778] sm:$0xff]  ;;  %v3385_v45 = vld [vmem:[%s3845_s15 + $0x40] sm:$0xff] }
 0x15c   : > { %2834 = vmatprep.subr.bf16.mxu1 %v2833_v26  ;;  %v2869_v26 = vpack.c.bf16 %v559_v51, %v551_v24  ;;  %v3392_v51 = vld [vmem:[%s3845_s15 + $0x88] sm:$0xff] }
 0x15e   : > { %1035 = vmatmul.mubr.f32.gmra.mrb[74].mxu1 %v3904_v17  ;;  %v462_v17 = vld [vmem:[#allocation5 + $0x470] sm:$0xff] }
 0x15f   : > { %2836 = vmatpush1.bf16.msra.mxu1 %v2835_v59  ;;  %1040 = vmatprep.mubr.f32.mxu1 %v3907_v19  ;;  %v2847_v19 = vpack.c.bf16 %v462_v17, %v454_v53  ;;  %v3387_v17 = vld [vmem:[%s3845_s15 + $0x50] sm:$0xff] }
 0x160   : > { %2838 = vmatprep.subr.bf16.mxu1 %v2837_v35  ;;  %v3379_v35 = vld [vmem:[%s3845_s15 + $0x10] sm:$0xff] }
 0x162   : > { %1041 = vmatmul.mubr.f32.gmra.mrb[76].mxu1 %v3912_v25  ;;  %v478_v25 = vld [vmem:[#allocation5 + $0x4f0] sm:$0xff] }
 0x163   : > { %2840 = vmatpush1.bf16.msra.mxu1 %v2839_v3  ;;  %1046 = vmatprep.mubr.f32.mxu1 %v3915_v27  ;;  %v2851_v27 = vpack.c.bf16 %v478_v25, %v470_v0  ;;  %v4066_v3 = vld [vmem:[#allocation7] sm:$0xff]  ;;  %v1459_v0 = vld [vmem:[#allocation8 + $0x228] sm:$0xff] }
 0x164   : > { %2842 = vmatprep.subr.bf16.mxu1 %v2841_v44  ;;  %v1461_v25 = vld [vmem:[#allocation8 + $0x238] sm:$0xff] }
 0x165   : > { %v2945_v7 = vpack.c.bf16 %v1461_v25, %v1459_v0 }
 0x166   : > { %1047 = vmatmul.mubr.f32.gmra.mrb[78].mxu1 %v3920_v38  ;;  %v494_v38 = vld [vmem:[#allocation5 + $0x570] sm:$0xff] }
 0x167   : > { %2844 = vmatpush1.bf16.msra.mxu1 %v2843_v11  ;;  %1052 = vmatprep.mubr.f32.mxu1 %v3923_v42  ;;  %v2855_v42 = vpack.c.bf16 %v494_v38, %v486_v5 }
 0x168   : > { %2846 = vmatprep.subr.bf16.mxu1 %v2845_v50 }
 0x16a   : > { %1053 = vmatmul.mubr.f32.gmra.mrb[80].mxu1 %v3928_v58  ;;  %v510_v58 = vld [vmem:[#allocation5 + $0x5f0] sm:$0xff] }
 0x16b   : > { %2848 = vmatpush1.bf16.msra.mxu1 %v2847_v19  ;;  %1058 = vmatprep.mubr.f32.mxu1 %v3931_v61  ;;  %v2859_v61 = vpack.c.bf16 %v510_v58, %v502_v14  ;;  %v3388_v19 = vld [vmem:[%s3845_s15 + $0x68] sm:$0xff]  ;;  %v3390_v58 = vld [vmem:[%s3845_s15 + $0x78] sm:$0xff] }
 0x16c   : > { %2850 = vmatprep.subr.bf16.mxu1 %v2849_v63 }
 0x16e   : > { %1059 = vmatmul.mubr.f32.gmra.mrb[82].mxu1 %v3936_v13  ;;  %v526_v13 = vld [vmem:[#allocation5 + $0x670] sm:$0xff] }
 0x16f   : > { %2852 = vmatpush1.bf16.msra.mxu1 %v2851_v27  ;;  %1064 = vmatprep.mubr.f32.mxu1 %v3939_v15  ;;  %v2863_v15 = vpack.c.bf16 %v526_v13, %v518_v43  ;;  %v2943_v27 = vpack.c.bf16 %v1456_v62, %v1454_v56  ;;  %v3396_v62 = vld [vmem:[%s3845_s15 + $0xa8] sm:$0xff] }
 0x170   : > { %2854 = vmatprep.subr.bf16.mxu1 %v2853_v4 }
 0x172   : > { %1065 = vmatmul.mubr.f32.gmra.mrb[84].mxu1 %v3944_v31  ;;  %v542_v31 = vld [vmem:[#allocation5 + $0x6f0] sm:$0xff] }
 0x173   : > { %2856 = vmatpush1.bf16.msra.mxu1 %v2855_v42  ;;  %1070 = vmatprep.mubr.f32.mxu1 %v3947_v33  ;;  %v2867_v33 = vpack.c.bf16 %v542_v31, %v534_v23  ;;  %v1458_v42 = vld [vmem:[#allocation8 + $0x220] sm:$0xff]  ;;  %v1464_v31 = vld [vmem:[#allocation8 + $0x250] sm:$0xff] }
 0x174   : > { %2858 = vmatprep.subr.bf16.mxu1 %v2857_v10  ;;  %v1460_v10 = vld [vmem:[#allocation8 + $0x230] sm:$0xff]  ;;  %v1462_v23 = vld [vmem:[#allocation8 + $0x240] sm:$0xff] }
 0x175   : > { %v2947_v43 = vpack.c.bf16 %v1460_v10, %v1458_v42  ;;  %v3398_v10 = vld [vmem:[%s3845_s15 + $0xb8] sm:$0xff] }
 0x176   : > { %1071 = vmatmul.mubr.f32.gmra.mrb[86].mxu1 %v3952_v52  ;;  %v558_v52 = vld [vmem:[#allocation5 + $0x770] sm:$0xff] }
 0x177   : > { %2860 = vmatpush1.bf16.msra.mxu1 %v2859_v61  ;;  %1076 = vmatprep.mubr.f32.mxu1 %v3955_v54  ;;  %v2871_v54 = vpack.c.bf16 %v558_v52, %v550_v28 }
 0x178   : > { %2862 = vmatprep.subr.bf16.mxu1 %v2861_v20 }
 0x17a   : > { %1077 = vmatmul.mubr.f32.gmra.mrb[88].mxu1 %v3960_v8  ;;  %v2873_v8 = vpack.c.bf16 %v575_v29, %v567_v57  ;;  %v2951_v57 = vpack.c.bf16 %v1464_v31, %v1462_v23  ;;  %v3400_v31 = vld [vmem:[%s3845_s15 + $0xc8] sm:$0xff] }
 0x17b   : > { %2864 = vmatpush1.bf16.msra.mxu1 %v2863_v15  ;;  %1082 = vmatprep.mubr.f32.mxu1 %v3963_v12  ;;  %v574_v12 = vld [vmem:[#allocation5 + $0x7f0] sm:$0xff] }
 0x17c   : > { %2866 = vmatprep.subr.bf16.mxu1 %v2865_v49  ;;  %v2875_v59 = vpack.c.bf16 %v574_v12, %v566_v32  ;;  %v3391_v15 = vld [vmem:[%s3845_s15 + $0x70] sm:$0xff]  ;;  %v2949_v49 = vpack.c.bf16 %v1465_v16, %v1463_v40  ;;  %v3393_v32 = vld [vmem:[%s3845_s15 + $0x80] sm:$0xff] }
 0x17e   : > { %1083 = vmatmul.mubr.f32.gmra.mrb[90].mxu1 %v3968_v30  ;;  %v3377_v30 = vld [vmem:[%s3845_s15] sm:$0xff] }
 0x17f   : > { %2868 = vmatpush1.bf16.msra.mxu1 %v2867_v33  ;;  %1088 = vmatprep.mubr.f32.mxu1 %v3971_v34  ;;  %v3378_v34 = vld [vmem:[%s3845_s15 + $0x18] sm:$0xff]  ;;  %v1467_v33 = vld [vmem:[#allocation8 + $0x268] sm:$0xff] }
 0x180   : > { %2870 = vmatprep.subr.bf16.mxu1 %v2869_v26  ;;  %v1469_v26 = vld [vmem:[#allocation8 + $0x278] sm:$0xff] }
 0x181   : > { %v2953_v12 = vpack.c.bf16 %v1469_v26, %v1467_v33 }
 0x182   : > { %1089 = vmatmul.mubr.f32.gmra.mrb[92].mxu1 %v3976_v55  ;;  %v578_v55 = vlaneseq }
 0x183   : > { %2872 = vmatpush1.bf16.msra.mxu1 %v2871_v54  ;;  %1094 = vmatprep.mubr.f32.mxu1 %v3979_v60  ;;  %v3381_v60 = vld [vmem:[%s3845_s15 + $0x20] sm:$0xff] }
 0x184   : > { %2874 = vmatprep.subr.bf16.mxu1 %v2873_v8  ;;  %v4060_v1 = vshrl.u32 %v578_v55, 7  ;;  %v1471_v55 = vld [vmem:[#allocation8 + $0x288] sm:$0xff] }
 0x186   : > { %1095 = vmatmul.mubr.f32.gmra.mrb[94].mxu1 %v3984_v18  ;;  %v3382_v18 = vld [vmem:[%s3845_s15 + $0x38] sm:$0xff]  ;;  %v584_v44 = vsub.s32 1, %v4060_v1 }
 0x187   : > { %2876 = vmatpush1.bf16.msra.mxu1 %v2875_v59  ;;  %1165 = vmatprep.mubr.f32.mxu1 %v4020_v47  ;;  %v580_v47 = vsub.s32 0, %v4060_v1  ;;  %v1466_v59 = vld [vmem:[#allocation8 + $0x260] sm:$0xff] }
 0x188   : > { %v4079_v48 = vrot.slane %v4066_v3, %v584_v44 }
 0x189   : > { %v4073_v9 = vrot.slane %v4066_v3, %v580_v47 }
 0x18a   : > { %1166 = vmatmul.mubr.f32.vlgmr.msra.gmra.mrb[96].mxu1 %v3377_v30  ;;  %v1468_v30 = vld [vmem:[#allocation8 + $0x270] sm:$0xff] }
 0x18b   : > { %1171 = vmatprep.mubr.f32.mxu1 %v3378_v34 }
 0x18e   : > { %1172 = vmatmul.mubr.f32.gmra.mrb[98].mxu1 %v3379_v35  ;;  %v3394_v35 = vld [vmem:[%s3845_s15 + $0x98] sm:$0xff] }
 0x18f   : > { %1177 = vmatprep.mubr.f32.mxu1 %v3380_v36  ;;  %v1473_v36 = vld [vmem:[#allocation8 + $0x298] sm:$0xff] }
 0x192   : > { %1178 = vmatmul.mubr.f32.gmra.mrb[100].mxu1 %v3381_v60 }
 0x193   : > { %1183 = vmatprep.mubr.f32.mxu1 %v3382_v18 }
 0x196   : > { %1184 = vmatmul.mubr.f32.gmra.mrb[102].mxu1 %v3383_v37  ;;  %v2955_v37 = vpack.c.bf16 %v1468_v30, %v1466_v59  ;;  %v3402_v30 = vld [vmem:[%s3845_s15 + $0xd8] sm:$0xff] }
 0x197   : > { %1189 = vmatprep.mubr.f32.mxu1 %v3384_v39 }
 0x19a   : > { %1190 = vmatmul.mubr.f32.gmra.mrb[104].mxu1 %v3385_v45 }
 0x19b   : > { %1195 = vmatprep.mubr.f32.mxu1 %v3386_v46 }
 0x19d   : > { %v684_v11 = vpop.f32.mrb[0].mxu1 }
 0x19e   : > { %v685_v50 = vadd.f32 %v684_v11, %v4073_v9  ;;  %v686_v53 = vpop.f32.mrb[1].mxu1  ;;  %1196 = vmatmul.mubr.f32.gmra.mrb[106].mxu1 %v3387_v17  ;;  %v3395_v11 = vld [vmem:[%s3845_s15 + $0x90] sm:$0xff]  ;;  %v1472_v17 = vld [vmem:[#allocation8 + $0x290] sm:$0xff] }
 0x19f   : > { %1201 = vmatprep.mubr.f32.mxu1 %v3388_v19  ;;  %v687_v63 = vadd.f32 %v686_v53, %v4079_v48  ;;  %v1470_v53 = vld [vmem:[#allocation8 + $0x280] sm:$0xff]  ;;  %v1475_v19 = vld [vmem:[#allocation8 + $0x2a8] sm:$0xff] }
 0x1a0   : > { %v1262_v4 = vmax.f32 %v685_v50, 0.0  ;;  %v2957_v50 = vpack.c.bf16 %v1473_v36, %v1471_v55 }
 0x1a1   : > { %v690_v41 = vpop.f32.mrb[2].mxu1  ;;  %v1263_v2 = vmax.f32 %v687_v63, 0.0  ;;  %v1477_v63 = vld [vmem:[#allocation8 + $0x2b8] sm:$0xff] }
 0x1a2   : > { %v691_v5 = vadd.f32 %v690_v41, %v4073_v9  ;;  %v692_v38 = vpop.f32.mrb[3].mxu1  ;;  %1202 = vmatmul.mubr.f32.gmra.mrb[108].mxu1 %v3389_v6  ;;  %v2959_v41 = vpack.c.bf16 %v1472_v17, %v1470_v53  ;;  %v1474_v6 = vld [vmem:[#allocation8 + $0x2a0] sm:$0xff] }
 0x1a3   : > { %v693_v14 = vadd.f32 %v692_v38, %v4079_v48  ;;  %1722 = vmatprep.mubr.f32.mxu0 %v1263_v2  ;;  %1207 = vmatprep.mubr.f32.mxu1 %v3390_v58  ;;  %v2961_v38 = vpack.c.bf16 %v1477_v63, %v1475_v19  ;;  %v1481_v58 = vld [vmem:[#allocation8 + $0x2d8] sm:$0xff]  ;;  %v3404_v17 = vld [vmem:[%s3845_s15 + $0xe8] sm:$0xff] }
 0x1a4   : > { %1723 = vmatmul.mubr.f32.vlgmr.msra.gmra.mrb[0].mxu0 %v1262_v4  ;;  %v1270_v13 = vmax.f32 %v691_v5, 0.0  ;;  %v3397_v5 = vld [vmem:[%s3845_s15 + $0xa0] sm:$0xff] }
 0x1a5   : > { %v1271_v61 = vmax.f32 %v693_v14, 0.0  ;;  %v696_v20 = vpop.f32.mrb[4].mxu1  ;;  %2944 = vmatpush1.bf16.msra.mxu0 %v2943_v27  ;;  %v1479_v14 = vld [vmem:[#allocation8 + $0x2c8] sm:$0xff] }
 0x1a6   : > { %v697_v21 = vadd.f32 %v696_v20, %v4073_v9  ;;  %v698_v22 = vpop.f32.mrb[5].mxu1  ;;  %1208 = vmatmul.mubr.f32.gmra.mrb[110].mxu1 %v3391_v15  ;;  %2946 = vmatprep.subr.bf16.mxu0 %v2945_v7  ;;  %v1476_v7 = vld [vmem:[#allocation8 + $0x2b0] sm:$0xff]  ;;  %v1478_v15 = vld [vmem:[#allocation8 + $0x2c0] sm:$0xff] }
 0x1a7   : > { %v699_v24 = vadd.f32 %v698_v22, %v4079_v48  ;;  %1728 = vmatprep.mubr.f32.mxu0 %v1271_v61  ;;  %1213 = vmatprep.mubr.f32.mxu1 %v3392_v51  ;;  %v2963_v61 = vpack.c.bf16 %v1476_v7, %v1474_v6  ;;  %v2965_v22 = vpack.c.bf16 %v1481_v58, %v1479_v14  ;;  %v1485_v51 = vld [vmem:[#allocation8 + $0x2f8] sm:$0xff]  ;;  %v3406_v7 = vld [vmem:[%s3845_s15 + $0xf8] sm:$0xff] }
 0x1a8   : > { %1729 = vmatmul.mubr.f32.gmra.mrb[2].mxu0 %v1270_v13  ;;  %v1278_v29 = vmax.f32 %v697_v21, 0.0  ;;  %v3399_v21 = vld [vmem:[%s3845_s15 + $0xb0] sm:$0xff] }
 0x1a9   : > { %v1279_v28 = vmax.f32 %v699_v24, 0.0  ;;  %v702_v52 = vpop.f32.mrb[6].mxu1  ;;  %2948 = vmatpush1.bf16.msra.mxu0 %v2947_v43  ;;  %v1483_v24 = vld [vmem:[#allocation8 + $0x2e8] sm:$0xff] }
 0x1aa   : > { %v703_v54 = vadd.f32 %v702_v52, %v4073_v9  ;;  %v704_v8 = vpop.f32.mrb[7].mxu1  ;;  %1214 = vmatmul.mubr.f32.gmra.mrb[112].mxu1 %v3393_v32  ;;  %2950 = vmatprep.subr.bf16.mxu0 %v2949_v49  ;;  %v1480_v49 = vld [vmem:[#allocation8 + $0x2d0] sm:$0xff]  ;;  %v1482_v32 = vld [vmem:[#allocation8 + $0x2e0] sm:$0xff] }
 0x1ab   : > { %v705_v34 = vadd.f32 %v704_v8, %v4079_v48  ;;  %1734 = vmatprep.mubr.f32.mxu0 %v1279_v28  ;;  %1219 = vmatprep.mubr.f32.mxu1 %v3394_v35  ;;  %v2967_v28 = vpack.c.bf16 %v1480_v49, %v1478_v15  ;;  %v2969_v8 = vpack.c.bf16 %v1485_v51, %v1483_v24  ;;  %v1489_v35 = vld [vmem:[#allocation8 + $0x318] sm:$0xff]  ;;  %v1499_v49 = vld [vmem:[#allocation8 + $0x368] sm:$0xff] }
 0x1ac   : > { %1735 = vmatmul.mubr.f32.gmra.mrb[4].mxu0 %v1278_v29  ;;  %v1286_v39 = vmax.f32 %v703_v54, 0.0  ;;  %v3401_v54 = vld [vmem:[%s3845_s15 + $0xc0] sm:$0xff] }
 0x1ad   : > { %v1287_v60 = vmax.f32 %v705_v34, 0.0  ;;  %v708_v18 = vpop.f32.mrb[8].mxu1  ;;  %2952 = vmatpush1.bf16.msra.mxu0 %v2951_v57  ;;  %v1487_v34 = vld [vmem:[#allocation8 + $0x308] sm:$0xff] }
 0x1ae   : > { %v709_v45 = vadd.f32 %v708_v18, %v4073_v9  ;;  %v710_v46 = vpop.f32.mrb[9].mxu1  ;;  %1220 = vmatmul.mubr.f32.gmra.mrb[114].mxu1 %v3395_v11  ;;  %2954 = vmatprep.subr.bf16.mxu0 %v2953_v12  ;;  %v1484_v12 = vld [vmem:[#allocation8 + $0x2f0] sm:$0xff]  ;;  %v1486_v11 = vld [vmem:[#allocation8 + $0x300] sm:$0xff] }
 0x1af   : > { %v711_v56 = vadd.f32 %v710_v46, %v4079_v48  ;;  %1740 = vmatprep.mubr.f32.mxu0 %v1287_v60  ;;  %1225 = vmatprep.mubr.f32.mxu1 %v3396_v62  ;;  %v2971_v60 = vpack.c.bf16 %v1484_v12, %v1482_v32  ;;  %v2973_v46 = vpack.c.bf16 %v1489_v35, %v1487_v34  ;;  %v1493_v62 = vld [vmem:[#allocation8 + $0x338] sm:$0xff] }
 0x1b0   : > { %1741 = vmatmul.mubr.f32.gmra.mrb[6].mxu0 %v1286_v39  ;;  %v1294_v2 = vmax.f32 %v709_v45, 0.0  ;;  %v3403_v45 = vld [vmem:[%s3845_s15 + $0xd0] sm:$0xff]  ;;  %v1505_v32 = vld [vmem:[#allocation8 + $0x398] sm:$0xff] }
 0x1b1   : > { %v1295_v0 = vmax.f32 %v711_v56, 0.0  ;;  %v714_v25 = vpop.f32.mrb[10].mxu1  ;;  %2956 = vmatpush1.bf16.msra.mxu0 %v2955_v37  ;;  %v1491_v56 = vld [vmem:[#allocation8 + $0x328] sm:$0xff] }
 0x1b2   : > { %v715_v27 = vadd.f32 %v714_v25, %v4073_v9  ;;  %v716_v4 = vpop.f32.mrb[11].mxu1  ;;  %1226 = vmatmul.mubr.f32.gmra.mrb[116].mxu1 %v3397_v5  ;;  %2958 = vmatprep.subr.bf16.mxu0 %v2957_v50  ;;  %v1488_v50 = vld [vmem:[#allocation8 + $0x310] sm:$0xff]  ;;  %v1490_v5 = vld [vmem:[#allocation8 + $0x320] sm:$0xff] }
 0x1b3   : > { %v717_v42 = vadd.f32 %v716_v4, %v4079_v48  ;;  %1746 = vmatprep.mubr.f32.mxu0 %v1295_v0  ;;  %1231 = vmatprep.mubr.f32.mxu1 %v3398_v10  ;;  %v2975_v0 = vpack.c.bf16 %v1488_v50, %v1486_v11  ;;  %v2977_v4 = vpack.c.bf16 %v1493_v62, %v1491_v56  ;;  %v1497_v10 = vld [vmem:[#allocation8 + $0x358] sm:$0xff] }
 0x1b4   : > { %1747 = vmatmul.mubr.f32.gmra.mrb[8].mxu0 %v1294_v2  ;;  %v1302_v20 = vmax.f32 %v715_v27, 0.0  ;;  %v3405_v27 = vld [vmem:[%s3845_s15 + $0xe0] sm:$0xff] }
 0x1b5   : > { %v1303_v40 = vmax.f32 %v717_v42, 0.0  ;;  %v720_v16 = vpop.f32.mrb[12].mxu1  ;;  %2960 = vmatpush1.bf16.msra.mxu0 %v2959_v41  ;;  %v1495_v42 = vld [vmem:[#allocation8 + $0x348] sm:$0xff] }
 0x1b6   : > { %v721_v43 = vadd.f32 %v720_v16, %v4073_v9  ;;  %v722_v13 = vpop.f32.mrb[13].mxu1  ;;  %1232 = vmatmul.mubr.f32.gmra.mrb[118].mxu1 %v3399_v21  ;;  %2962 = vmatprep.subr.bf16.mxu0 %v2961_v38  ;;  %v1492_v38 = vld [vmem:[#allocation8 + $0x330] sm:$0xff]  ;;  %v1494_v21 = vld [vmem:[#allocation8 + $0x340] sm:$0xff] }
 0x1b7   : > { %v723_v23 = vadd.f32 %v722_v13, %v4079_v48  ;;  %1752 = vmatprep.mubr.f32.mxu0 %v1303_v40  ;;  %1237 = vmatprep.mubr.f32.mxu1 %v3400_v31  ;;  %v2979_v40 = vpack.c.bf16 %v1492_v38, %v1490_v5  ;;  %v2981_v13 = vpack.c.bf16 %v1497_v10, %v1495_v42  ;;  %v588_v42 = vsub.s32 2, %v4060_v1  ;;  %v1510_v10 = vld [vmem:[#allocation8 + $0x3c0] sm:$0xff] }
 0x1b8   : > { %1753 = vmatmul.mubr.f32.gmra.mrb[10].mxu0 %v1302_v20  ;;  %v1310_v52 = vmax.f32 %v721_v43, 0.0  ;;  %v3407_v43 = vld [vmem:[%s3845_s15 + $0xf0] sm:$0xff] }
 0x1b9   : > { %v1311_v33 = vmax.f32 %v723_v23, 0.0  ;;  %v726_v26 = vpop.f32.mrb[14].mxu1  ;;  %2964 = vmatpush1.bf16.msra.mxu0 %v2963_v61  ;;  %v1501_v23 = vld [vmem:[#allocation8 + $0x378] sm:$0xff] }
 0x1ba   : > { %v727_v57 = vadd.f32 %v726_v26, %v4073_v9  ;;  %v728_v29 = vpop.f32.mrb[15].mxu1  ;;  %1238 = vmatmul.mubr.f32.gmra.mrb[120].mxu1 %v3401_v54  ;;  %2966 = vmatprep.subr.bf16.mxu0 %v2965_v22  ;;  %v1496_v22 = vld [vmem:[#allocation8 + $0x350] sm:$0xff] }
 0x1bb   : > { %v729_v59 = vadd.f32 %v728_v29, %v4079_v48  ;;  %1758 = vmatprep.mubr.f32.mxu0 %v1311_v33  ;;  %1243 = vmatprep.mubr.f32.mxu1 %v3402_v30  ;;  %v2983_v51 = vpack.c.bf16 %v1496_v22, %v1494_v21  ;;  %v1500_v29 = vld [vmem:[#allocation8 + $0x370] sm:$0xff] }
 0x1bc   : > { %1759 = vmatmul.mubr.f32.gmra.mrb[12].mxu0 %v1310_v52  ;;  %v1318_v18 = vmax.f32 %v727_v57, 0.0  ;;  %v2985_v52 = vpack.c.bf16 %v1501_v23, %v1499_v49  ;;  %v1498_v57 = vld [vmem:[#allocation8 + $0x360] sm:$0xff]  ;;  %v4136_v49 = vrot.slane %v4066_v3, %v588_v42 }
 0x1bd   : > { %v1319_v55 = vmax.f32 %v729_v59, 0.0  ;;  %v732_v36 = vpop.f32.mrb[16].mxu1  ;;  %2968 = vmatpush1.bf16.msra.mxu0 %v2967_v28  ;;  %v2987_v30 = vpack.c.bf16 %v1500_v29, %v1498_v57 }
 0x1be   : > { %v733_v37 = vadd.f32 %v732_v36, %v4073_v9  ;;  %v734_v39 = vpop.f32.mrb[17].mxu1  ;;  %1244 = vmatmul.mubr.f32.gmra.mrb[122].mxu1 %v3403_v45  ;;  %2970 = vmatprep.subr.bf16.mxu0 %v2969_v8  ;;  %v1503_v8 = vld [vmem:[#allocation8 + $0x388] sm:$0xff]  ;;  %v1509_v45 = vld [vmem:[#allocation8 + $0x3b8] sm:$0xff] }
 0x1bf   : > { %v735_v53 = vadd.f32 %v734_v39, %v4079_v48  ;;  %1764 = vmatprep.mubr.f32.mxu0 %v1319_v55  ;;  %1249 = vmatprep.mubr.f32.mxu1 %v3404_v17  ;;  %v2989_v36 = vpack.c.bf16 %v1505_v32, %v1503_v8  ;;  %v1507_v39 = vld [vmem:[#allocation8 + $0x3a8] sm:$0xff] }
 0x1c0   : > { %1765 = vmatmul.mubr.f32.gmra.mrb[14].mxu0 %v1318_v18  ;;  %v1326_v25 = vmax.f32 %v733_v37, 0.0  ;;  %v1504_v18 = vld [vmem:[#allocation8 + $0x390] sm:$0xff]  ;;  %v2993_v62 = vpack.c.bf16 %v1509_v45, %v1507_v39  ;;  %v1522_v39 = vld [vmem:[#allocation8 + $0x420] sm:$0xff] }
 0x1c1   : > { %v1327_v19 = vmax.f32 %v735_v53, 0.0  ;;  %v738_v63 = vpop.f32.mrb[18].mxu1  ;;  %2972 = vmatpush1.bf16.msra.mxu0 %v2971_v60  ;;  %v1502_v60 = vld [vmem:[#allocation8 + $0x380] sm:$0xff]  ;;  %v1524_v45 = vld [vmem:[#allocation8 + $0x430] sm:$0xff] }
 0x1c2   : > { %v739_v41 = vadd.f32 %v738_v63, %v4073_v9  ;;  %v740_v2 = vpop.f32.mrb[19].mxu1  ;;  %1250 = vmatmul.mubr.f32.gmra.mrb[124].mxu1 %v3405_v27  ;;  %2974 = vmatprep.subr.bf16.mxu0 %v2973_v46  ;;  %v2991_v50 = vpack.c.bf16 %v1504_v18, %v1502_v60  ;;  %v1508_v63 = vld [vmem:[#allocation8 + $0x3b0] sm:$0xff] }
 0x1c3   : > { %v741_v6 = vadd.f32 %v740_v2, %v4079_v48  ;;  %1770 = vmatprep.mubr.f32.mxu0 %v1327_v19  ;;  %1255 = vmatprep.mubr.f32.mxu1 %v3406_v7  ;;  %v1506_v19 = vld [vmem:[#allocation8 + $0x3a0] sm:$0xff] }
 0x1c4   : > { %1771 = vmatmul.mubr.f32.gmra.mrb[16].mxu0 %v1326_v25  ;;  %v1334_v16 = vmax.f32 %v739_v41, 0.0  ;;  %v1511_v25 = vld [vmem:[#allocation8 + $0x3c8] sm:$0xff]  ;;  %v1513_v41 = vld [vmem:[#allocation8 + $0x3d8] sm:$0xff] }
 0x1c5   : > { %v1335_v14 = vmax.f32 %v741_v6, 0.0  ;;  %v744_v58 = vpop.f32.mrb[20].mxu1  ;;  %2976 = vmatpush1.bf16.msra.mxu0 %v2975_v0  ;;  %v2997_v7 = vpack.c.bf16 %v1513_v41, %v1511_v25  ;;  %v1526_v25 = vld [vmem:[#allocation8 + $0x440] sm:$0xff]  ;;  %v1528_v41 = vld [vmem:[#allocation8 + $0x450] sm:$0xff] }
 0x1c6   : > { %v745_v61 = vadd.f32 %v744_v58, %v4073_v9  ;;  %v746_v20 = vpop.f32.mrb[21].mxu1  ;;  %1256 = vmatmul.mubr.f32.gmra.mrb[126].mxu1 %v3407_v43  ;;  %2978 = vmatprep.subr.bf16.mxu0 %v2977_v4  ;;  %v2995_v4 = vpack.c.bf16 %v1508_v63, %v1506_v19 }
 0x1c7   : > { %v747_v15 = vadd.f32 %v746_v20, %v4079_v48  ;;  %1776 = vmatprep.mubr.f32.mxu0 %v1335_v14  ;;  %v1512_v14 = vld [vmem:[#allocation8 + $0x3d0] sm:$0xff] }
 0x1c8   : > { %1777 = vmatmul.mubr.f32.gmra.mrb[18].mxu0 %v1334_v16  ;;  %v1342_v33 = vmax.f32 %v745_v61, 0.0  ;;  %v1515_v16 = vld [vmem:[#allocation8 + $0x3e8] sm:$0xff]  ;;  %v1517_v61 = vld [vmem:[#allocation8 + $0x3f8] sm:$0xff] }
 0x1c9   : > { %v1343_v31 = vmax.f32 %v747_v15, 0.0  ;;  %v750_v24 = vpop.f32.mrb[22].mxu1  ;;  %2980 = vmatpush1.bf16.msra.mxu0 %v2979_v40  ;;  %v592_v40 = vsub.s32 3, %v4060_v1  ;;  %v3001_v23 = vpack.c.bf16 %v1517_v61, %v1515_v16  ;;  %v1535_v61 = vld [vmem:[#allocation8 + $0x488] sm:$0xff] }
 0x1ca   : > { %v751_v26 = vadd.f32 %v750_v24, %v4073_v9  ;;  %v752_v28 = vpop.f32.mrb[23].mxu1  ;;  %2982 = vmatprep.subr.bf16.mxu0 %v2981_v13  ;;  %v2999_v13 = vpack.c.bf16 %v1512_v14, %v1510_v10  ;;  %v1516_v24 = vld [vmem:[#allocation8 + $0x3f0] sm:$0xff] }
 0x1cb   : > { %v753_v54 = vadd.f32 %v752_v28, %v4079_v48  ;;  %1782 = vmatprep.mubr.f32.mxu0 %v1343_v31  ;;  %v1514_v31 = vld [vmem:[#allocation8 + $0x3e0] sm:$0xff]  ;;  %v1521_v28 = vld [vmem:[#allocation8 + $0x418] sm:$0xff] }
 0x1cc   : > { %1783 = vmatmul.mubr.f32.gmra.mrb[20].mxu0 %v1342_v33  ;;  %v1350_v34 = vmax.f32 %v751_v26, 0.0  ;;  %v4140_v33 = vrot.slane %v4066_v3, %v592_v40  ;;  %v1519_v26 = vld [vmem:[#allocation8 + $0x408] sm:$0xff]  ;;  %v1532_v40 = vld [vmem:[#allocation8 + $0x470] sm:$0xff] }
 0x1cd   : > { %v1351_v12 = vmax.f32 %v753_v54, 0.0  ;;  %v756_v59 = vpop.f32.mrb[24].mxu1  ;;  %2984 = vmatpush1.bf16.msra.mxu0 %v2983_v51  ;;  %v3005_v32 = vpack.c.bf16 %v1521_v28, %v1519_v26  ;;  %v1523_v3 = vld [vmem:[#allocation8 + $0x428] sm:$0xff] }
 0x1ce   : > { %v757_v35 = vadd.f32 %v756_v59, %v4073_v9  ;;  %v758_v55 = vpop.f32.mrb[25].mxu1  ;;  %2986 = vmatprep.subr.bf16.mxu0 %v2985_v52  ;;  %v1520_v59 = vld [vmem:[#allocation8 + $0x410] sm:$0xff]  ;;  %v1539_v28 = vld [vmem:[#allocation8 + $0x4a8] sm:$0xff] }
 0x1cf   : > { %v759_v37 = vadd.f32 %v758_v55, %v4079_v48  ;;  %1788 = vmatprep.mubr.f32.mxu0 %v1351_v12  ;;  %v1518_v12 = vld [vmem:[#allocation8 + $0x400] sm:$0xff] }
 0x1d0   : > { %1789 = vmatmul.mubr.f32.gmra.mrb[22].mxu0 %v1350_v34  ;;  %v1358_v53 = vmax.f32 %v757_v35, 0.0  ;;  %v3007_v55 = vpack.c.bf16 %v1520_v59, %v1518_v12  ;;  %v1538_v59 = vld [vmem:[#allocation8 + $0x4a0] sm:$0xff] }
 0x1d1   : > { %v1359_v46 = vmax.f32 %v759_v37, 0.0  ;;  %v762_v11 = vpop.f32.mrb[26].mxu1  ;;  %2988 = vmatpush1.bf16.msra.mxu0 %v2987_v30  ;;  %v1525_v30 = vld [vmem:[#allocation8 + $0x438] sm:$0xff] }
 0x1d2   : > { %v763_v17 = vadd.f32 %v762_v11, %v4073_v9  ;;  %v764_v56 = vpop.f32.mrb[27].mxu1  ;;  %2990 = vmatprep.subr.bf16.mxu0 %v2989_v36  ;;  %v3009_v37 = vpack.c.bf16 %v1525_v30, %v1523_v3  ;;  %v1527_v11 = vld [vmem:[#allocation8 + $0x448] sm:$0xff] }
 0x1d3   : > { %v765_v0 = vadd.f32 %v764_v56, %v4079_v48  ;;  %1794 = vmatprep.mubr.f32.mxu0 %v1359_v46  ;;  %v3011_v56 = vpack.c.bf16 %v1524_v45, %v1522_v39  ;;  %v1543_v30 = vld [vmem:[#allocation8 + $0x4c8] sm:$0xff]  ;;  %v1542_v45 = vld [vmem:[#allocation8 + $0x4c0] sm:$0xff] }
 0x1d4   : > { %1795 = vmatmul.mubr.f32.gmra.mrb[24].mxu0 %v1358_v53  ;;  %v1366_v5 = vmax.f32 %v763_v17, 0.0 }
 0x1d5   : > { %v1367_v2 = vmax.f32 %v765_v0, 0.0  ;;  %v768_v27 = vpop.f32.mrb[28].mxu1  ;;  %2992 = vmatpush1.bf16.msra.mxu0 %v2991_v50  ;;  %v1529_v50 = vld [vmem:[#allocation8 + $0x458] sm:$0xff] }
 0x1d6   : > { %v769_v38 = vadd.f32 %v768_v27, %v4073_v9  ;;  %v770_v6 = vpop.f32.mrb[29].mxu1  ;;  %2994 = vmatprep.subr.bf16.mxu0 %v2993_v62  ;;  %v3013_v0 = vpack.c.bf16 %v1529_v50, %v1527_v11  ;;  %v1531_v27 = vld [vmem:[#allocation8 + $0x468] sm:$0xff] }
 0x1d7   : > { %v771_v58 = vadd.f32 %v770_v6, %v4079_v48  ;;  %1800 = vmatprep.mubr.f32.mxu0 %v1367_v2  ;;  %v3015_v6 = vpack.c.bf16 %v1528_v41, %v1526_v25  ;;  %v1547_v50 = vld [vmem:[#allocation8 + $0x4e8] sm:$0xff]  ;;  %v1546_v41 = vld [vmem:[#allocation8 + $0x4e0] sm:$0xff] }
 0x1d8   : > { %1801 = vmatmul.mubr.f32.gmra.mrb[26].mxu0 %v1366_v5  ;;  %v1374_v21 = vmax.f32 %v769_v38, 0.0 }
 0x1d9   : > { %v1375_v20 = vmax.f32 %v771_v58, 0.0  ;;  %v774_v43 = vpop.f32.mrb[30].mxu1  ;;  %2996 = vmatpush1.bf16.msra.mxu0 %v2995_v4  ;;  %v1533_v4 = vld [vmem:[#allocation8 + $0x478] sm:$0xff]  ;;  %v1530_v58 = vld [vmem:[#allocation8 + $0x460] sm:$0xff] }
 0x1da   : > { %v775_v22 = vadd.f32 %v774_v43, %v4073_v9  ;;  %v776_v15 = vpop.f32.mrb[31].mxu1  ;;  %2998 = vmatprep.subr.bf16.mxu0 %v2997_v7  ;;  %v3003_v9 = vpack.c.bf16 %v1516_v24, %v1514_v31  ;;  %v3017_v14 = vpack.c.bf16 %v1533_v4, %v1531_v27  ;;  %v1534_v24 = vld [vmem:[#allocation8 + $0x480] sm:$0xff]  ;;  %v1551_v4 = vld [vmem:[#allocation8 + $0x508] sm:$0xff] }
 0x1db   : > { %v777_v51 = vadd.f32 %v776_v15, %v4079_v48  ;;  %1806 = vmatprep.mubr.f32.mxu0 %v1375_v20  ;;  %v1537_v20 = vld [vmem:[#allocation8 + $0x498] sm:$0xff] }
 0x1dc   : > { %1807 = vmatmul.mubr.f32.gmra.mrb[28].mxu0 %v1374_v21  ;;  %v1382_v29 = vmax.f32 %v775_v22, 0.0  ;;  %v3019_v21 = vpack.c.bf16 %v1532_v40, %v1530_v58  ;;  %v3021_v31 = vpack.c.bf16 %v1537_v20, %v1535_v61  ;;  %v1550_v40 = vld [vmem:[#allocation8 + $0x500] sm:$0xff]  ;;  %v1555_v20 = vld [vmem:[#allocation8 + $0x528] sm:$0xff] }
 0x1dd   : > { %v1383_v52 = vmax.f32 %v777_v51, 0.0  ;;  %v845_v57 = vpop.f32.mrb[32].mxu1  ;;  %3000 = vmatpush1.bf16.msra.mxu0 %v2999_v13  ;;  %v1536_v51 = vld [vmem:[#allocation8 + $0x490] sm:$0xff] }
 0x1de   : > { %v846_v54 = vadd.f32 %v845_v57, %v4136_v49  ;;  %v847_v8 = vpop.f32.mrb[33].mxu1  ;;  %3002 = vmatprep.subr.bf16.mxu0 %v3001_v23 }
 0x1df   : > { %v848_v48 = vadd.f32 %v847_v8, %v4140_v33  ;;  %1812 = vmatprep.mubr.f32.mxu0 %v1383_v52  ;;  %v1541_v52 = vld [vmem:[#allocation8 + $0x4b8] sm:$0xff] }
 0x1e0   : > { %1813 = vmatmul.mubr.f32.gmra.mrb[30].mxu0 %v1382_v29  ;;  %v1264_v36 = vmax.f32 %v846_v54, 0.0  ;;  %v3023_v29 = vpack.c.bf16 %v1536_v51, %v1534_v24  ;;  %v3025_v12 = vpack.c.bf16 %v1541_v52, %v1539_v28  ;;  %v1554_v51 = vld [vmem:[#allocation8 + $0x520] sm:$0xff]  ;;  %v1559_v52 = vld [vmem:[#allocation8 + $0x548] sm:$0xff] }
 0x1e1   : > { %v1265_v34 = vmax.f32 %v848_v48, 0.0  ;;  %v851_v35 = vpop.f32.mrb[34].mxu1  ;;  %3004 = vmatpush1.bf16.msra.mxu0 %v3003_v9  ;;  %v1540_v48 = vld [vmem:[#allocation8 + $0x4b0] sm:$0xff] }
 0x1e2   : > { %v852_v60 = vadd.f32 %v851_v35, %v4136_v49  ;;  %v853_v18 = vpop.f32.mrb[35].mxu1  ;;  %3006 = vmatprep.subr.bf16.mxu0 %v3005_v32 }
 0x1e3   : > { %v854_v46 = vadd.f32 %v853_v18, %v4140_v33  ;;  %1883 = vmatprep.mubr.f32.mxu0 %v1265_v34  ;;  %v1545_v34 = vld [vmem:[#allocation8 + $0x4d8] sm:$0xff] }
 0x1e4   : > { %1884 = vmatmul.mubr.f32.vlgmr.msra.gmra.mrb[0].mxu0 %v1264_v36  ;;  %v1272_v62 = vmax.f32 %v852_v60, 0.0  ;;  %v3027_v36 = vpack.c.bf16 %v1540_v48, %v1538_v59  ;;  %v3029_v39 = vpack.c.bf16 %v1545_v34, %v1543_v30  ;;  %v1558_v48 = vld [vmem:[#allocation8 + $0x540] sm:$0xff]  ;;  %v1563_v34 = vld [vmem:[#allocation8 + $0x568] sm:$0xff] }
 0x1e5   : > { %v1273_v53 = vmax.f32 %v854_v46, 0.0  ;;  %v857_v17 = vpop.f32.mrb[36].mxu1  ;;  %3008 = vmatpush1.bf16.msra.mxu0 %v3007_v55  ;;  %v1544_v46 = vld [vmem:[#allocation8 + $0x4d0] sm:$0xff] }
 0x1e6   : > { %v858_v19 = vadd.f32 %v857_v17, %v4136_v49  ;;  %v859_v63 = vpop.f32.mrb[37].mxu1  ;;  %3010 = vmatprep.subr.bf16.mxu0 %v3009_v37 }
 0x1e7   : > { %v860_v2 = vadd.f32 %v859_v63, %v4140_v33  ;;  %1889 = vmatprep.mubr.f32.mxu0 %v1273_v53  ;;  %v1549_v53 = vld [vmem:[#allocation8 + $0x4f8] sm:$0xff] }
 0x1e8   : > { %1890 = vmatmul.mubr.f32.gmra.mrb[2].mxu0 %v1272_v62  ;;  %v1280_v7 = vmax.f32 %v858_v19, 0.0  ;;  %v3031_v62 = vpack.c.bf16 %v1544_v46, %v1542_v45  ;;  %v3033_v25 = vpack.c.bf16 %v1549_v53, %v1547_v50  ;;  %v1562_v46 = vld [vmem:[#allocation8 + $0x560] sm:$0xff]  ;;  %v1567_v53 = vld [vmem:[#allocation8 + $0x588] sm:$0xff] }
 0x1e9   : > { %v1281_v5 = vmax.f32 %v860_v2, 0.0  ;;  %v863_v38 = vpop.f32.mrb[38].mxu1  ;;  %3012 = vmatpush1.bf16.msra.mxu0 %v3011_v56  ;;  %v1548_v2 = vld [vmem:[#allocation8 + $0x4f0] sm:$0xff] }
 0x1ea   : > { %v864_v42 = vadd.f32 %v863_v38, %v4136_v49  ;;  %v865_v10 = vpop.f32.mrb[39].mxu1  ;;  %3014 = vmatprep.subr.bf16.mxu0 %v3013_v0 }
 0x1eb   : > { %v866_v16 = vadd.f32 %v865_v10, %v4140_v33  ;;  %1895 = vmatprep.mubr.f32.mxu0 %v1281_v5  ;;  %v1553_v5 = vld [vmem:[#allocation8 + $0x518] sm:$0xff] }
 0x1ec   : > { %1896 = vmatmul.mubr.f32.gmra.mrb[4].mxu0 %v1280_v7  ;;  %v1288_v22 = vmax.f32 %v864_v42, 0.0  ;;  %v3035_v7 = vpack.c.bf16 %v1548_v2, %v1546_v41  ;;  %v3037_v58 = vpack.c.bf16 %v1553_v5, %v1551_v4  ;;  %v1566_v2 = vld [vmem:[#allocation8 + $0x580] sm:$0xff]  ;;  %v1571_v5 = vld [vmem:[#allocation8 + $0x5a8] sm:$0xff] }
 0x1ed   : > { %v1289_v43 = vmax.f32 %v866_v16, 0.0  ;;  %v869_v13 = vpop.f32.mrb[40].mxu1  ;;  %3016 = vmatpush1.bf16.msra.mxu0 %v3015_v6  ;;  %v1552_v16 = vld [vmem:[#allocation8 + $0x510] sm:$0xff] }
 0x1ee   : > { %v870_v15 = vadd.f32 %v869_v13, %v4136_v49  ;;  %v871_v23 = vpop.f32.mrb[41].mxu1  ;;  %3018 = vmatprep.subr.bf16.mxu0 %v3017_v14 }
 0x1ef   : > { %v872_v26 = vadd.f32 %v871_v23, %v4140_v33  ;;  %1901 = vmatprep.mubr.f32.mxu0 %v1289_v43  ;;  %v1557_v43 = vld [vmem:[#allocation8 + $0x538] sm:$0xff] }
 0x1f0   : > { %1902 = vmatmul.mubr.f32.gmra.mrb[6].mxu0 %v1288_v22  ;;  %v1296_v54 = vmax.f32 %v870_v15, 0.0  ;;  %v3039_v22 = vpack.c.bf16 %v1552_v16, %v1550_v40  ;;  %v3041_v24 = vpack.c.bf16 %v1557_v43, %v1555_v20  ;;  %v1570_v16 = vld [vmem:[#allocation8 + $0x5a0] sm:$0xff]  ;;  %v1575_v43 = vld [vmem:[#allocation8 + $0x5c8] sm:$0xff] }
 0x1f1   : > { %v1297_v57 = vmax.f32 %v872_v26, 0.0  ;;  %v875_v9 = vpop.f32.mrb[42].mxu1  ;;  %3020 = vmatpush1.bf16.msra.mxu0 %v3019_v21  ;;  %v1556_v26 = vld [vmem:[#allocation8 + $0x530] sm:$0xff] }
 0x1f2   : > { %v876_v8 = vadd.f32 %v875_v9, %v4136_v49  ;;  %v877_v32 = vpop.f32.mrb[43].mxu1  ;;  %3022 = vmatprep.subr.bf16.mxu0 %v3021_v31 }
 0x1f3   : > { %v878_v3 = vadd.f32 %v877_v32, %v4140_v33  ;;  %1907 = vmatprep.mubr.f32.mxu0 %v1297_v57  ;;  %v1561_v57 = vld [vmem:[#allocation8 + $0x558] sm:$0xff] }
 0x1f4   : > { %1908 = vmatmul.mubr.f32.gmra.mrb[8].mxu0 %v1296_v54  ;;  %v1304_v60 = vmax.f32 %v876_v8, 0.0  ;;  %v3043_v54 = vpack.c.bf16 %v1556_v26, %v1554_v51  ;;  %v3045_v59 = vpack.c.bf16 %v1561_v57, %v1559_v52  ;;  %v596_v26 = vsub.s32 4, %v4060_v1  ;;  %v1576_v52 = vld [vmem:[#allocation8 + $0x5d0] sm:$0xff] }
 0x1f5   : > { %v1305_v35 = vmax.f32 %v878_v3, 0.0  ;;  %v881_v55 = vpop.f32.mrb[44].mxu1  ;;  %3024 = vmatpush1.bf16.msra.mxu0 %v3023_v29  ;;  %v1560_v3 = vld [vmem:[#allocation8 + $0x550] sm:$0xff] }
 0x1f6   : > { %v882_v18 = vadd.f32 %v881_v55, %v4136_v49  ;;  %v883_v37 = vpop.f32.mrb[45].mxu1  ;;  %3026 = vmatprep.subr.bf16.mxu0 %v3025_v12 }
 0x1f7   : > { %v884_v11 = vadd.f32 %v883_v37, %v4140_v33  ;;  %1913 = vmatprep.mubr.f32.mxu0 %v1305_v35  ;;  %v1565_v35 = vld [vmem:[#allocation8 + $0x578] sm:$0xff] }
 0x1f8   : > { %1914 = vmatmul.mubr.f32.gmra.mrb[10].mxu0 %v1304_v60  ;;  %v1312_v19 = vmax.f32 %v882_v18, 0.0  ;;  %v3047_v60 = vpack.c.bf16 %v1560_v3, %v1558_v48  ;;  %v3049_v45 = vpack.c.bf16 %v1565_v35, %v1563_v34 }
 0x1f9   : > { %v1313_v17 = vmax.f32 %v884_v11, 0.0  ;;  %v887_v56 = vpop.f32.mrb[46].mxu1  ;;  %3028 = vmatpush1.bf16.msra.mxu0 %v3027_v36  ;;  %v1564_v11 = vld [vmem:[#allocation8 + $0x570] sm:$0xff] }
 0x1fa   : > { %v888_v63 = vadd.f32 %v887_v56, %v4136_v49  ;;  %v889_v0 = vpop.f32.mrb[47].mxu1  ;;  %3030 = vmatprep.subr.bf16.mxu0 %v3029_v39 }
 0x1fb   : > { %v890_v27 = vadd.f32 %v889_v0, %v4140_v33  ;;  %1919 = vmatprep.mubr.f32.mxu0 %v1313_v17  ;;  %v1569_v17 = vld [vmem:[#allocation8 + $0x598] sm:$0xff] }
 0x1fc   : > { %1920 = vmatmul.mubr.f32.gmra.mrb[12].mxu0 %v1312_v19  ;;  %v1320_v42 = vmax.f32 %v888_v63, 0.0  ;;  %v3051_v19 = vpack.c.bf16 %v1564_v11, %v1562_v46  ;;  %v3053_v41 = vpack.c.bf16 %v1569_v17, %v1567_v53 }
 0x1fd   : > { %v1321_v38 = vmax.f32 %v890_v27, 0.0  ;;  %v893_v6 = vpop.f32.mrb[48].mxu1  ;;  %3032 = vmatpush1.bf16.msra.mxu0 %v3031_v62  ;;  %v1568_v27 = vld [vmem:[#allocation8 + $0x590] sm:$0xff] }
 0x1fe   : > { %v894_v10 = vadd.f32 %v893_v6, %v4136_v49  ;;  %v895_v14 = vpop.f32.mrb[49].mxu1  ;;  %3034 = vmatprep.subr.bf16.mxu0 %v3033_v25 }
 0x1ff   : > { %v896_v61 = vadd.f32 %v895_v14, %v4140_v33  ;;  %1925 = vmatprep.mubr.f32.mxu0 %v1321_v38  ;;  %v1573_v38 = vld [vmem:[#allocation8 + $0x5b8] sm:$0xff] }
 0x200   : > { %1926 = vmatmul.mubr.f32.gmra.mrb[14].mxu0 %v1320_v42  ;;  %v1328_v15 = vmax.f32 %v894_v10, 0.0  ;;  %v3055_v42 = vpack.c.bf16 %v1568_v27, %v1566_v2  ;;  %v3057_v40 = vpack.c.bf16 %v1573_v38, %v1571_v5  ;;  %v1586_v38 = vld [vmem:[#allocation8 + $0x620] sm:$0xff] }
 0x201   : > { %v1329_v13 = vmax.f32 %v896_v61, 0.0  ;;  %v899_v21 = vpop.f32.mrb[50].mxu1  ;;  %3036 = vmatpush1.bf16.msra.mxu0 %v3035_v7  ;;  %v1572_v61 = vld [vmem:[#allocation8 + $0x5b0] sm:$0xff] }
 0x202   : > { %v900_v23 = vadd.f32 %v899_v21, %v4136_v49  ;;  %v901_v31 = vpop.f32.mrb[51].mxu1  ;;  %3038 = vmatprep.subr.bf16.mxu0 %v3037_v58 }
 0x203   : > { %v902_v28 = vadd.f32 %v901_v31, %v4140_v33  ;;  %1931 = vmatprep.mubr.f32.mxu0 %v1329_v13  ;;  %v1577_v13 = vld [vmem:[#allocation8 + $0x5d8] sm:$0xff] }
 0x204   : > { %1932 = vmatmul.mubr.f32.gmra.mrb[16].mxu0 %v1328_v15  ;;  %v1336_v8 = vmax.f32 %v900_v23, 0.0  ;;  %v3059_v15 = vpack.c.bf16 %v1572_v61, %v1570_v16  ;;  %v3061_v51 = vpack.c.bf16 %v1577_v13, %v1575_v43  ;;  %v1590_v13 = vld [vmem:[#allocation8 + $0x640] sm:$0xff] }
 0x205   : > { %v1337_v9 = vmax.f32 %v902_v28, 0.0  ;;  %v905_v29 = vpop.f32.mrb[52].mxu1  ;;  %3040 = vmatpush1.bf16.msra.mxu0 %v3039_v22  ;;  %v1574_v28 = vld [vmem:[#allocation8 + $0x5c0] sm:$0xff] }
 0x206   : > { %v906_v32 = vadd.f32 %v905_v29, %v4136_v49  ;;  %v907_v12 = vpop.f32.mrb[53].mxu1  ;;  %3042 = vmatprep.subr.bf16.mxu0 %v3041_v24  ;;  %v1579_v29 = vld [vmem:[#allocation8 + $0x5e8] sm:$0xff] }
 0x207   : > { %v908_v30 = vadd.f32 %v907_v12, %v4140_v33  ;;  %1937 = vmatprep.mubr.f32.mxu0 %v1337_v9  ;;  %v600_v9 = vsub.s32 5, %v4060_v1  ;;  %v3063_v12 = vpack.c.bf16 %v1576_v52, %v1574_v28 }
 0x208   : > { %1938 = vmatmul.mubr.f32.gmra.mrb[18].mxu0 %v1336_v8  ;;  %v1344_v18 = vmax.f32 %v906_v32, 0.0 }
 0x209   : > { %v1345_v55 = vmax.f32 %v908_v30, 0.0  ;;  %v911_v36 = vpop.f32.mrb[54].mxu1  ;;  %3044 = vmatpush1.bf16.msra.mxu0 %v3043_v54  ;;  %v1581_v54 = vld [vmem:[#allocation8 + $0x5f8] sm:$0xff] }
 0x20a   : > { %v912_v37 = vadd.f32 %v911_v36, %v4136_v49  ;;  %v913_v39 = vpop.f32.mrb[55].mxu1  ;;  %3046 = vmatprep.subr.bf16.mxu0 %v3045_v59  ;;  %v4175_v30 = vld [vmem:[#allocation7] sm:$0xff]  ;;  %v3065_v35 = vpack.c.bf16 %v1581_v54, %v1579_v29  ;;  %v1580_v36 = vld [vmem:[#allocation8 + $0x5f0] sm:$0xff] }
 0x20b   : > { %v914_v50 = vadd.f32 %v913_v39, %v4140_v33  ;;  %1943 = vmatprep.mubr.f32.mxu0 %v1345_v55  ;;  %v4178_v34 = vrot.slane %v4175_v30, %v596_v26  ;;  %v1578_v55 = vld [vmem:[#allocation8 + $0x5e0] sm:$0xff]  ;;  %v1585_v39 = vld [vmem:[#allocation8 + $0x618] sm:$0xff]  ;;  %v1596_v29 = vld [vmem:[#allocation8 + $0x670] sm:$0xff] }
 0x20c   : > { %1944 = vmatmul.mubr.f32.gmra.mrb[20].mxu0 %v1344_v18  ;;  %v1352_v63 = vmax.f32 %v912_v37, 0.0  ;;  %v4182_v18 = vrot.slane %v4175_v30, %v600_v9  ;;  %v1583_v37 = vld [vmem:[#allocation8 + $0x608] sm:$0xff]  ;;  %v3067_v46 = vpack.c.bf16 %v1580_v36, %v1578_v55  ;;  %v1594_v9 = vld [vmem:[#allocation8 + $0x660] sm:$0xff] }
 0x20d   : > { %v1353_v56 = vmax.f32 %v914_v50, 0.0  ;;  %v917_v62 = vpop.f32.mrb[56].mxu1  ;;  %3048 = vmatpush1.bf16.msra.mxu0 %v3047_v60  ;;  %v3069_v17 = vpack.c.bf16 %v1585_v39, %v1583_v37  ;;  %v1600_v37 = vld [vmem:[#allocation8 + $0x690] sm:$0xff] }
 0x20e   : > { %v918_v0 = vadd.f32 %v917_v62, %v4136_v49  ;;  %v919_v25 = vpop.f32.mrb[57].mxu1  ;;  %3050 = vmatprep.subr.bf16.mxu0 %v3049_v45  ;;  %v1584_v62 = vld [vmem:[#allocation8 + $0x610] sm:$0xff] }
 0x20f   : > { %v920_v4 = vadd.f32 %v919_v25, %v4140_v33  ;;  %1949 = vmatprep.mubr.f32.mxu0 %v1353_v56  ;;  %v1582_v56 = vld [vmem:[#allocation8 + $0x600] sm:$0xff] }
 0x210   : > { %1950 = vmatmul.mubr.f32.gmra.mrb[22].mxu0 %v1352_v63  ;;  %v1360_v10 = vmax.f32 %v918_v0, 0.0  ;;  %v1589_v63 = vld [vmem:[#allocation8 + $0x638] sm:$0xff] }
 0x211   : > { %v1361_v6 = vmax.f32 %v920_v4, 0.0  ;;  %v923_v7 = vpop.f32.mrb[58].mxu1  ;;  %3052 = vmatpush1.bf16.msra.mxu0 %v3051_v19  ;;  %v1587_v19 = vld [vmem:[#allocation8 + $0x628] sm:$0xff] }
 0x212   : > { %v924_v14 = vadd.f32 %v923_v7, %v4136_v49  ;;  %v925_v58 = vpop.f32.mrb[59].mxu1  ;;  %3054 = vmatprep.subr.bf16.mxu0 %v3053_v41  ;;  %v3071_v41 = vpack.c.bf16 %v1584_v62, %v1582_v56  ;;  %v3073_v5 = vpack.c.bf16 %v1589_v63, %v1587_v19  ;;  %v1604_v19 = vld [vmem:[#allocation8 + $0x6b0] sm:$0xff] }
 0x213   : > { %v926_v20 = vadd.f32 %v925_v58, %v4140_v33  ;;  %1955 = vmatprep.mubr.f32.mxu0 %v1361_v6  ;;  %v1588_v6 = vld [vmem:[#allocation8 + $0x630] sm:$0xff] }
 0x214   : > { %1956 = vmatmul.mubr.f32.gmra.mrb[24].mxu0 %v1360_v10  ;;  %v1368_v23 = vmax.f32 %v924_v14, 0.0  ;;  %v1593_v10 = vld [vmem:[#allocation8 + $0x658] sm:$0xff] }
 0x215   : > { %v1369_v21 = vmax.f32 %v926_v20, 0.0  ;;  %v929_v22 = vpop.f32.mrb[60].mxu1  ;;  %3056 = vmatpush1.bf16.msra.mxu0 %v3055_v42  ;;  %v1591_v42 = vld [vmem:[#allocation8 + $0x648] sm:$0xff] }
 0x216   : > { %v930_v31 = vadd.f32 %v929_v22, %v4136_v49  ;;  %v931_v24 = vpop.f32.mrb[61].mxu1  ;;  %3058 = vmatprep.subr.bf16.mxu0 %v3057_v40  ;;  %v3075_v40 = vpack.c.bf16 %v1588_v6, %v1586_v38  ;;  %v3077_v43 = vpack.c.bf16 %v1593_v10, %v1591_v42  ;;  %v1608_v42 = vld [vmem:[#allocation8 + $0x6d0] sm:$0xff] }
 0x217   : > { %v932_v57 = vadd.f32 %v931_v24, %v4140_v33  ;;  %1961 = vmatprep.mubr.f32.mxu0 %v1369_v21  ;;  %v1592_v21 = vld [vmem:[#allocation8 + $0x650] sm:$0xff] }
 0x218   : > { %1962 = vmatmul.mubr.f32.gmra.mrb[26].mxu0 %v1368_v23  ;;  %v1376_v59 = vmax.f32 %v930_v31, 0.0  ;;  %v1597_v23 = vld [vmem:[#allocation8 + $0x678] sm:$0xff] }
 0x219   : > { %v1377_v8 = vmax.f32 %v932_v57, 0.0  ;;  %v935_v32 = vpop.f32.mrb[62].mxu1  ;;  %3060 = vmatpush1.bf16.msra.mxu0 %v3059_v15  ;;  %v1595_v15 = vld [vmem:[#allocation8 + $0x668] sm:$0xff] }
 0x21a   : > { %v936_v48 = vadd.f32 %v935_v32, %v4136_v49  ;;  %v937_v3 = vpop.f32.mrb[63].mxu1  ;;  %3062 = vmatprep.subr.bf16.mxu0 %v3061_v51  ;;  %v3079_v51 = vpack.c.bf16 %v1592_v21, %v1590_v13  ;;  %v3081_v57 = vpack.c.bf16 %v1597_v23, %v1595_v15  ;;  %v1601_v32 = vld [vmem:[#allocation8 + $0x698] sm:$0xff]  ;;  %v1612_v15 = vld [vmem:[#allocation8 + $0x6f0] sm:$0xff] }
 0x21b   : > { %v938_v60 = vadd.f32 %v937_v3, %v4140_v33  ;;  %1967 = vmatprep.mubr.f32.mxu0 %v1377_v8  ;;  %v1599_v8 = vld [vmem:[#allocation8 + $0x688] sm:$0xff] }
 0x21c   : > { %1968 = vmatmul.mubr.f32.gmra.mrb[28].mxu0 %v1376_v59  ;;  %v1384_v11 = vmax.f32 %v936_v48, 0.0  ;;  %v3083_v48 = vpack.c.bf16 %v1596_v29, %v1594_v9  ;;  %v3085_v36 = vpack.c.bf16 %v1601_v32, %v1599_v8  ;;  %v1616_v8 = vld [vmem:[#allocation8 + $0x710] sm:$0xff] }
 0x21d   : > { %v1385_v49 = vmax.f32 %v938_v60, 0.0  ;;  %v1006_v45 = vpop.f32.mrb[64].mxu1  ;;  %3064 = vmatpush1.bf16.msra.mxu0 %v3063_v12  ;;  %v1598_v60 = vld [vmem:[#allocation8 + $0x680] sm:$0xff] }
 0x21e   : > { %v1007_v50 = vadd.f32 %v1006_v45, %v4178_v34  ;;  %v1008_v53 = vpop.f32.mrb[65].mxu1  ;;  %3066 = vmatprep.subr.bf16.mxu0 %v3065_v35  ;;  %v1605_v45 = vld [vmem:[#allocation8 + $0x6b8] sm:$0xff] }
 0x21f   : > { %v1009_v33 = vadd.f32 %v1008_v53, %v4182_v18  ;;  %1973 = vmatprep.mubr.f32.mxu0 %v1385_v49  ;;  %v1603_v49 = vld [vmem:[#allocation8 + $0x6a8] sm:$0xff] }
 0x220   : > { %1974 = vmatmul.mubr.f32.gmra.mrb[30].mxu0 %v1384_v11  ;;  %v1266_v2 = vmax.f32 %v1007_v50, 0.0  ;;  %v3087_v50 = vpack.c.bf16 %v1600_v37, %v1598_v60  ;;  %v3089_v62 = vpack.c.bf16 %v1605_v45, %v1603_v49  ;;  %v1620_v49 = vld [vmem:[#allocation8 + $0x730] sm:$0xff] }
 0x221   : > { %v1267_v0 = vmax.f32 %v1009_v33, 0.0  ;;  %v1012_v25 = vpop.f32.mrb[66].mxu1  ;;  %3068 = vmatpush1.bf16.msra.mxu0 %v3067_v46  ;;  %v1602_v33 = vld [vmem:[#allocation8 + $0x6a0] sm:$0xff] }
 0x222   : > { %v1013_v27 = vadd.f32 %v1012_v25, %v4178_v34  ;;  %v1014_v4 = vpop.f32.mrb[67].mxu1  ;;  %3070 = vmatprep.subr.bf16.mxu0 %v3069_v17  ;;  %v1609_v25 = vld [vmem:[#allocation8 + $0x6d8] sm:$0xff] }
 0x223   : > { %v1015_v7 = vadd.f32 %v1014_v4, %v4182_v18  ;;  %2044 = vmatprep.mubr.f32.mxu0 %v1267_v0  ;;  %v1607_v0 = vld [vmem:[#allocation8 + $0x6c8] sm:$0xff] }
 0x224   : > { %2045 = vmatmul.mubr.f32.vlgmr.msra.gmra.mrb[0].mxu0 %v1266_v2  ;;  %v1274_v16 = vmax.f32 %v1013_v27, 0.0  ;;  %v3091_v27 = vpack.c.bf16 %v1604_v19, %v1602_v33  ;;  %v3093_v6 = vpack.c.bf16 %v1609_v25, %v1607_v0  ;;  %v1624_v0 = vld [vmem:[#allocation8 + $0x750] sm:$0xff] }
 0x225   : > { %v1275_v14 = vmax.f32 %v1015_v7, 0.0  ;;  %v1018_v58 = vpop.f32.mrb[68].mxu1  ;;  %3072 = vmatpush1.bf16.msra.mxu0 %v3071_v41  ;;  %v1606_v7 = vld [vmem:[#allocation8 + $0x6c0] sm:$0xff] }
 0x226   : > { %v1019_v61 = vadd.f32 %v1018_v58, %v4178_v34  ;;  %v1020_v20 = vpop.f32.mrb[69].mxu1  ;;  %3074 = vmatprep.subr.bf16.mxu0 %v3073_v5  ;;  %v1613_v58 = vld [vmem:[#allocation8 + $0x6f8] sm:$0xff] }
 0x227   : > { %v1021_v22 = vadd.f32 %v1020_v20, %v4182_v18  ;;  %2050 = vmatprep.mubr.f32.mxu0 %v1275_v14  ;;  %v1611_v14 = vld [vmem:[#allocation8 + $0x6e8] sm:$0xff] }
 0x228   : > { %2051 = vmatmul.mubr.f32.gmra.mrb[2].mxu0 %v1274_v16  ;;  %v1282_v26 = vmax.f32 %v1019_v61, 0.0  ;;  %v3095_v61 = vpack.c.bf16 %v1608_v42, %v1606_v7  ;;  %v3097_v21 = vpack.c.bf16 %v1613_v58, %v1611_v14  ;;  %v1628_v14 = vld [vmem:[#allocation8 + $0x770] sm:$0xff] }
 0x229   : > { %v1283_v31 = vmax.f32 %v1021_v22, 0.0  ;;  %v1024_v24 = vpop.f32.mrb[70].mxu1  ;;  %3076 = vmatpush1.bf16.msra.mxu0 %v3075_v40  ;;  %v1610_v22 = vld [vmem:[#allocation8 + $0x6e0] sm:$0xff] }
 0x22a   : > { %v1025_v28 = vadd.f32 %v1024_v24, %v4178_v34  ;;  %v1026_v52 = vpop.f32.mrb[71].mxu1  ;;  %3078 = vmatprep.subr.bf16.mxu0 %v3077_v43  ;;  %v1617_v24 = vld [vmem:[#allocation8 + $0x718] sm:$0xff] }
 0x22b   : > { %v1027_v54 = vadd.f32 %v1026_v52, %v4182_v18  ;;  %2056 = vmatprep.mubr.f32.mxu0 %v1283_v31  ;;  %v1615_v31 = vld [vmem:[#allocation8 + $0x708] sm:$0xff] }
 0x22c   : > { %2057 = vmatmul.mubr.f32.gmra.mrb[4].mxu0 %v1282_v26  ;;  %v1290_v3 = vmax.f32 %v1025_v28, 0.0  ;;  %v3099_v28 = vpack.c.bf16 %v1612_v15, %v1610_v22  ;;  %v3101_v29 = vpack.c.bf16 %v1617_v24, %v1615_v31  ;;  %v1632_v31 = vld [vmem:[#allocation8 + $0x790] sm:$0xff] }
 0x22d   : > { %v1291_v12 = vmax.f32 %v1027_v54, 0.0  ;;  %v1030_v59 = vpop.f32.mrb[72].mxu1  ;;  %3080 = vmatpush1.bf16.msra.mxu0 %v3079_v51  ;;  %v1614_v54 = vld [vmem:[#allocation8 + $0x700] sm:$0xff] }
 0x22e   : > { %v1031_v35 = vadd.f32 %v1030_v59, %v4178_v34  ;;  %v1032_v55 = vpop.f32.mrb[73].mxu1  ;;  %3082 = vmatprep.subr.bf16.mxu0 %v3081_v57  ;;  %v1621_v59 = vld [vmem:[#allocation8 + $0x738] sm:$0xff] }
 0x22f   : > { %v1033_v39 = vadd.f32 %v1032_v55, %v4182_v18  ;;  %2062 = vmatprep.mubr.f32.mxu0 %v1291_v12  ;;  %v1619_v12 = vld [vmem:[#allocation8 + $0x728] sm:$0xff] }
 0x230   : > { %2063 = vmatmul.mubr.f32.gmra.mrb[6].mxu0 %v1290_v3  ;;  %v1298_v53 = vmax.f32 %v1031_v35, 0.0  ;;  %v3103_v35 = vpack.c.bf16 %v1616_v8, %v1614_v54  ;;  %v3105_v37 = vpack.c.bf16 %v1621_v59, %v1619_v12  ;;  %v1636_v12 = vld [vmem:[#allocation8 + $0x7b0] sm:$0xff] }
 0x231   : > { %v1299_v46 = vmax.f32 %v1033_v39, 0.0  ;;  %v1036_v11 = vpop.f32.mrb[74].mxu1  ;;  %3084 = vmatpush1.bf16.msra.mxu0 %v3083_v48  ;;  %v1618_v39 = vld [vmem:[#allocation8 + $0x720] sm:$0xff] }
 0x232   : > { %v1037_v17 = vadd.f32 %v1036_v11, %v4178_v34  ;;  %v1038_v56 = vpop.f32.mrb[75].mxu1  ;;  %3086 = vmatprep.subr.bf16.mxu0 %v3085_v36  ;;  %v1625_v11 = vld [vmem:[#allocation8 + $0x758] sm:$0xff] }
 0x233   : > { %v1039_v63 = vadd.f32 %v1038_v56, %v4182_v18  ;;  %2068 = vmatprep.mubr.f32.mxu0 %v1299_v46  ;;  %v1623_v46 = vld [vmem:[#allocation8 + $0x748] sm:$0xff] }
 0x234   : > { %2069 = vmatmul.mubr.f32.gmra.mrb[8].mxu0 %v1298_v53  ;;  %v1306_v4 = vmax.f32 %v1037_v17, 0.0  ;;  %v3107_v17 = vpack.c.bf16 %v1620_v49, %v1618_v39  ;;  %v3109_v19 = vpack.c.bf16 %v1625_v11, %v1623_v46  ;;  %v1638_v46 = vld [vmem:[#allocation8 + $0x7c0] sm:$0xff]  ;;  %v1640_v11 = vld [vmem:[#allocation8 + $0x7d0] sm:$0xff] }
 0x235   : > { %v1307_v41 = vmax.f32 %v1039_v63, 0.0  ;;  %v1042_v2 = vpop.f32.mrb[76].mxu1  ;;  %3088 = vmatpush1.bf16.msra.mxu0 %v3087_v50  ;;  %v1622_v63 = vld [vmem:[#allocation8 + $0x740] sm:$0xff] }
 0x236   : > { %v1043_v5 = vadd.f32 %v1042_v2, %v4178_v34  ;;  %v1044_v38 = vpop.f32.mrb[77].mxu1  ;;  %3090 = vmatprep.subr.bf16.mxu0 %v3089_v62  ;;  %v1629_v2 = vld [vmem:[#allocation8 + $0x778] sm:$0xff] }
 0x237   : > { %v1045_v10 = vadd.f32 %v1044_v38, %v4182_v18  ;;  %2074 = vmatprep.mubr.f32.mxu0 %v1307_v41  ;;  %v1627_v41 = vld [vmem:[#allocation8 + $0x768] sm:$0xff] }
 0x238   : > { %2075 = vmatmul.mubr.f32.gmra.mrb[10].mxu0 %v1306_v4  ;;  %v1314_v20 = vmax.f32 %v1043_v5, 0.0  ;;  %v3111_v5 = vpack.c.bf16 %v1624_v0, %v1622_v63  ;;  %v3113_v42 = vpack.c.bf16 %v1629_v2, %v1627_v41 }
 0x239   : > { %v1315_v40 = vmax.f32 %v1045_v10, 0.0  ;;  %v1048_v16 = vpop.f32.mrb[78].mxu1  ;;  %3092 = vmatpush1.bf16.msra.mxu0 %v3091_v27  ;;  %v1626_v10 = vld [vmem:[#allocation8 + $0x760] sm:$0xff] }
 0x23a   : > { %v1049_v43 = vadd.f32 %v1048_v16, %v4178_v34  ;;  %v1050_v13 = vpop.f32.mrb[79].mxu1  ;;  %3094 = vmatprep.subr.bf16.mxu0 %v3093_v6  ;;  %v1633_v16 = vld [vmem:[#allocation8 + $0x798] sm:$0xff] }
 0x23b   : > { %v1051_v23 = vadd.f32 %v1050_v13, %v4182_v18  ;;  %2080 = vmatprep.mubr.f32.mxu0 %v1315_v40  ;;  %v1631_v40 = vld [vmem:[#allocation8 + $0x788] sm:$0xff] }
 0x23c   : > { %2081 = vmatmul.mubr.f32.gmra.mrb[12].mxu0 %v1314_v20  ;;  %v1322_v52 = vmax.f32 %v1049_v43, 0.0  ;;  %v3115_v43 = vpack.c.bf16 %v1628_v14, %v1626_v10  ;;  %v3117_v15 = vpack.c.bf16 %v1633_v16, %v1631_v40 }
 0x23d   : > { %v1323_v51 = vmax.f32 %v1051_v23, 0.0  ;;  %v1054_v26 = vpop.f32.mrb[80].mxu1  ;;  %3096 = vmatpush1.bf16.msra.mxu0 %v3095_v61  ;;  %v1630_v23 = vld [vmem:[#allocation8 + $0x780] sm:$0xff] }
 0x23e   : > { %v1055_v57 = vadd.f32 %v1054_v26, %v4178_v34  ;;  %v1056_v9 = vpop.f32.mrb[81].mxu1  ;;  %3098 = vmatprep.subr.bf16.mxu0 %v3097_v21  ;;  %v1637_v26 = vld [vmem:[#allocation8 + $0x7b8] sm:$0xff] }
 0x23f   : > { %v1057_v32 = vadd.f32 %v1056_v9, %v4182_v18  ;;  %2086 = vmatprep.mubr.f32.mxu0 %v1323_v51  ;;  %v1635_v51 = vld [vmem:[#allocation8 + $0x7a8] sm:$0xff] }
 0x240   : > { %2087 = vmatmul.mubr.f32.gmra.mrb[14].mxu0 %v1322_v52  ;;  %v1330_v55 = vmax.f32 %v1055_v57, 0.0  ;;  %v3119_v57 = vpack.c.bf16 %v1632_v31, %v1630_v23  ;;  %v3121_v8 = vpack.c.bf16 %v1637_v26, %v1635_v51 }
 0x241   : > { %v1331_v48 = vmax.f32 %v1057_v32, 0.0  ;;  %v1060_v3 = vpop.f32.mrb[82].mxu1  ;;  %3100 = vmatpush1.bf16.msra.mxu0 %v3099_v28  ;;  %v1634_v32 = vld [vmem:[#allocation8 + $0x7a0] sm:$0xff] }
 0x242   : > { %v1061_v36 = vadd.f32 %v1060_v3, %v4178_v34  ;;  %v1062_v60 = vpop.f32.mrb[83].mxu1  ;;  %3102 = vmatprep.subr.bf16.mxu0 %v3101_v29  ;;  %v1641_v3 = vld [vmem:[#allocation8 + $0x7d8] sm:$0xff] }
 0x243   : > { %v1063_v45 = vadd.f32 %v1062_v60, %v4182_v18  ;;  %2092 = vmatprep.mubr.f32.mxu0 %v1331_v48  ;;  %v1639_v48 = vld [vmem:[#allocation8 + $0x7c8] sm:$0xff] }
 0x244   : > { %2093 = vmatmul.mubr.f32.gmra.mrb[16].mxu0 %v1330_v55  ;;  %v1338_v56 = vmax.f32 %v1061_v36, 0.0  ;;  %v3123_v36 = vpack.c.bf16 %v1636_v12, %v1634_v32  ;;  %v3125_v49 = vpack.c.bf16 %v1641_v3, %v1639_v48 }
 0x245   : > { %v1339_v50 = vmax.f32 %v1063_v45, 0.0  ;;  %v1066_v53 = vpop.f32.mrb[84].mxu1  ;;  %3104 = vmatpush1.bf16.msra.mxu0 %v3103_v35  ;;  %v604_v45 = vsub.s32 6, %v4060_v1 }
 0x246   : > { %v1067_v62 = vadd.f32 %v1066_v53, %v4178_v34  ;;  %v1068_v33 = vpop.f32.mrb[85].mxu1  ;;  %3106 = vmatprep.subr.bf16.mxu0 %v3105_v37  ;;  %v608_v53 = vsub.s32 7, %v4060_v1 }
 0x247   : > { %v1069_v25 = vadd.f32 %v1068_v33, %v4182_v18  ;;  %2098 = vmatprep.mubr.f32.mxu0 %v1339_v50  ;;  %v4218_v41 = vrot.slane %v4175_v30, %v604_v45 }
 0x248   : > { %2099 = vmatmul.mubr.f32.gmra.mrb[18].mxu0 %v1338_v56  ;;  %v1346_v38 = vmax.f32 %v1067_v62, 0.0  ;;  %v1645_v56 = vld [vmem:[#allocation8 + $0x7f8] sm:$0xff] }
 0x249   : > { %v1347_v27 = vmax.f32 %v1069_v25, 0.0  ;;  %v1072_v4 = vpop.f32.mrb[86].mxu1  ;;  %3108 = vmatpush1.bf16.msra.mxu0 %v3107_v17  ;;  %v1643_v17 = vld [vmem:[#allocation8 + $0x7e8] sm:$0xff] }
 0x24a   : > { %v1073_v6 = vadd.f32 %v1072_v4, %v4178_v34  ;;  %v1074_v7 = vpop.f32.mrb[87].mxu1  ;;  %3110 = vmatprep.subr.bf16.mxu0 %v3109_v19  ;;  %v3127_v19 = vpack.c.bf16 %v1640_v11, %v1638_v46  ;;  %v3129_v2 = vpack.c.bf16 %v1645_v56, %v1643_v17  ;;  %v1644_v4 = vld [vmem:[#allocation8 + $0x7f0] sm:$0xff] }
 0x24b   : > { %v1075_v58 = vadd.f32 %v1074_v7, %v4182_v18  ;;  %2104 = vmatprep.mubr.f32.mxu0 %v1347_v27  ;;  %v1642_v27 = vld [vmem:[#allocation8 + $0x7e0] sm:$0xff] }
 0x24c   : > { %2105 = vmatmul.mubr.f32.gmra.mrb[20].mxu0 %v1346_v38  ;;  %v1354_v13 = vmax.f32 %v1073_v6, 0.0  ;;  %v4222_v38 = vrot.slane %v4175_v30, %v608_v53 }
 0x24d   : > { %v1355_v61 = vmax.f32 %v1075_v58, 0.0  ;;  %v1078_v20 = vpop.f32.mrb[88].mxu1  ;;  %3112 = vmatpush1.bf16.msra.mxu0 %v3111_v5 }
 0x24e   : > { %v1079_v21 = vadd.f32 %v1078_v20, %v4178_v34  ;;  %v1080_v22 = vpop.f32.mrb[89].mxu1  ;;  %3114 = vmatprep.subr.bf16.mxu0 %v3113_v42  ;;  %v3131_v42 = vpack.c.bf16 %v1644_v4, %v1642_v27 }
 0x24f   : > { %v1081_v24 = vadd.f32 %v1080_v22, %v4182_v18  ;;  %2110 = vmatprep.mubr.f32.mxu0 %v1355_v61 }
 0x250   : > { %2111 = vmatmul.mubr.f32.gmra.mrb[22].mxu0 %v1354_v13  ;;  %v1362_v9 = vmax.f32 %v1079_v21, 0.0 }
 0x251   : > { %v1363_v28 = vmax.f32 %v1081_v24, 0.0  ;;  %v1084_v52 = vpop.f32.mrb[90].mxu1  ;;  %3116 = vmatpush1.bf16.msra.mxu0 %v3115_v43 }
 0x252   : > { %v1085_v29 = vadd.f32 %v1084_v52, %v4178_v34  ;;  %v1086_v54 = vpop.f32.mrb[91].mxu1  ;;  %3118 = vmatprep.subr.bf16.mxu0 %v3117_v15 }
 0x253   : > { %v1087_v59 = vadd.f32 %v1086_v54, %v4182_v18  ;;  %2116 = vmatprep.mubr.f32.mxu0 %v1363_v28 }
 0x254   : > { %2117 = vmatmul.mubr.f32.gmra.mrb[24].mxu0 %v1362_v9  ;;  %v1370_v60 = vmax.f32 %v1085_v29, 0.0 }
 0x255   : > { %v1371_v35 = vmax.f32 %v1087_v59, 0.0  ;;  %v1090_v55 = vpop.f32.mrb[92].mxu1  ;;  %3120 = vmatpush1.bf16.msra.mxu0 %v3119_v57 }
 0x256   : > { %v1091_v37 = vadd.f32 %v1090_v55, %v4178_v34  ;;  %v1092_v39 = vpop.f32.mrb[93].mxu1  ;;  %3122 = vmatprep.subr.bf16.mxu0 %v3121_v8 }
 0x257   : > { %v1093_v50 = vadd.f32 %v1092_v39, %v4182_v18  ;;  %2122 = vmatprep.mubr.f32.mxu0 %v1371_v35 }
 0x258   : > { %2123 = vmatmul.mubr.f32.gmra.mrb[26].mxu0 %v1370_v60  ;;  %v1378_v63 = vmax.f32 %v1091_v37, 0.0 }
 0x259   : > { %v1379_v62 = vmax.f32 %v1093_v50, 0.0  ;;  %v1096_v33 = vpop.f32.mrb[94].mxu1  ;;  %3124 = vmatpush1.bf16.msra.mxu0 %v3123_v36 }
 0x25a   : > { %v1097_v0 = vadd.f32 %v1096_v33, %v4178_v34  ;;  %v1098_v25 = vpop.f32.mrb[95].mxu1  ;;  %3126 = vmatprep.subr.bf16.mxu0 %v3125_v49 }
 0x25b   : > { %v1099_v5 = vadd.f32 %v1098_v25, %v4182_v18  ;;  %2128 = vmatprep.mubr.f32.mxu0 %v1379_v62 }
 0x25c   : > { %2129 = vmatmul.mubr.f32.gmra.mrb[28].mxu0 %v1378_v63  ;;  %v1386_v34 = vmax.f32 %v1097_v0, 0.0 }
 0x25d   : > { %v1387_v6 = vmax.f32 %v1099_v5, 0.0  ;;  %v1167_v7 = vpop.f32.mrb[96].mxu1  ;;  %3128 = vmatpush1.bf16.msra.mxu0 %v3127_v19 }
 0x25e   : > { %v1168_v10 = vadd.f32 %v1167_v7, %v4218_v41  ;;  %v1169_v14 = vpop.f32.mrb[97].mxu1  ;;  %3130 = vmatprep.subr.bf16.mxu0 %v3129_v2 }
 0x25f   : > { %v1170_v58 = vadd.f32 %v1169_v14, %v4222_v38  ;;  %2134 = vmatprep.mubr.f32.mxu0 %v1387_v6 }
 0x260   : > { %2135 = vmatmul.mubr.f32.gmra.mrb[30].mxu0 %v1386_v34  ;;  %v1268_v16 = vmax.f32 %v1168_v10, 0.0 }
 0x261   : > { %v1269_v40 = vmax.f32 %v1170_v58, 0.0  ;;  %v1173_v18 = vpop.f32.mrb[98].mxu1  ;;  %3132 = vmatpush1.bf16.msra.mxu0 %v3131_v42 }
 0x262   : > { %v1174_v30 = vadd.f32 %v1173_v18, %v4218_v41  ;;  %v1175_v61 = vpop.f32.mrb[99].mxu1 }
 0x263   : > { %v1176_v20 = vadd.f32 %v1175_v61, %v4222_v38  ;;  %2205 = vmatprep.mubr.f32.mxu0 %v1269_v40 }
 0x264   : > { %2206 = vmatmul.mubr.f32.vlgmr.msra.gmra.mrb[0].mxu0 %v1268_v16  ;;  %v1276_v21 = vmax.f32 %v1174_v30, 0.0 }
 0x265   : > { %v1277_v43 = vmax.f32 %v1176_v20, 0.0  ;;  %v1179_v13 = vpop.f32.mrb[100].mxu1 }
 0x266   : > { %v1180_v22 = vadd.f32 %v1179_v13, %v4218_v41  ;;  %v1181_v15 = vpop.f32.mrb[101].mxu1 }
 0x267   : > { %v1182_v23 = vadd.f32 %v1181_v15, %v4222_v38  ;;  %2211 = vmatprep.mubr.f32.mxu0 %v1277_v43 }
 0x268   : > { %2212 = vmatmul.mubr.f32.gmra.mrb[2].mxu0 %v1276_v21  ;;  %v1284_v51 = vmax.f32 %v1180_v22, 0.0 }
 0x269   : > { %v1285_v31 = vmax.f32 %v1182_v23, 0.0  ;;  %v1185_v24 = vpop.f32.mrb[102].mxu1 }
 0x26a   : > { %v1186_v26 = vadd.f32 %v1185_v24, %v4218_v41  ;;  %v1187_v28 = vpop.f32.mrb[103].mxu1 }
 0x26b   : > { %v1188_v52 = vadd.f32 %v1187_v28, %v4222_v38  ;;  %2217 = vmatprep.mubr.f32.mxu0 %v1285_v31 }
 0x26c   : > { %2218 = vmatmul.mubr.f32.gmra.mrb[4].mxu0 %v1284_v51  ;;  %v1292_v29 = vmax.f32 %v1186_v26, 0.0 }
 0x26d   : > { %v1293_v57 = vmax.f32 %v1188_v52, 0.0  ;;  %v1191_v9 = vpop.f32.mrb[104].mxu1 }
 0x26e   : > { %v1192_v54 = vadd.f32 %v1191_v9, %v4218_v41  ;;  %v1193_v8 = vpop.f32.mrb[105].mxu1 }
 0x26f   : > { %v1194_v32 = vadd.f32 %v1193_v8, %v4222_v38  ;;  %2223 = vmatprep.mubr.f32.mxu0 %v1293_v57 }
 0x270   : > { %2224 = vmatmul.mubr.f32.gmra.mrb[6].mxu0 %v1292_v29  ;;  %v1300_v48 = vmax.f32 %v1192_v54, 0.0 }
 0x271   : > { %v1301_v12 = vmax.f32 %v1194_v32, 0.0  ;;  %v1197_v59 = vpop.f32.mrb[106].mxu1 }
 0x272   : > { %v1198_v3 = vadd.f32 %v1197_v59, %v4218_v41  ;;  %v1199_v35 = vpop.f32.mrb[107].mxu1 }
 0x273   : > { %v1200_v55 = vadd.f32 %v1199_v35, %v4222_v38  ;;  %2229 = vmatprep.mubr.f32.mxu0 %v1301_v12 }
 0x274   : > { %2230 = vmatmul.mubr.f32.gmra.mrb[8].mxu0 %v1300_v48  ;;  %v1308_v37 = vmax.f32 %v1198_v3, 0.0 }
 0x275   : > { %v1309_v36 = vmax.f32 %v1200_v55, 0.0  ;;  %v1203_v60 = vpop.f32.mrb[108].mxu1 }
 0x276   : > { %v1204_v39 = vadd.f32 %v1203_v60, %v4218_v41  ;;  %v1205_v49 = vpop.f32.mrb[109].mxu1 }
 0x277   : > { %v1206_v45 = vadd.f32 %v1205_v49, %v4222_v38  ;;  %2235 = vmatprep.mubr.f32.mxu0 %v1309_v36 }
 0x278   : > { %2236 = vmatmul.mubr.f32.gmra.mrb[10].mxu0 %v1308_v37  ;;  %v1316_v50 = vmax.f32 %v1204_v39, 0.0  ;;  %v1646_v39 = vld [vmem:[%s4550_s4] sm:$0x3] }
 0x279   : > { %v1317_v46 = vmax.f32 %v1206_v45, 0.0  ;;  %v1209_v11 = vpop.f32.mrb[110].mxu1  ;;  %v4261_v49 = vrot.slane %v1646_v39, %v580_v47 }
 0x27a   : > { %v1210_v53 = vadd.f32 %v1209_v11, %v4218_v41  ;;  %v1211_v17 = vpop.f32.mrb[111].mxu1 }
 0x27b   : > { %v1212_v56 = vadd.f32 %v1211_v17, %v4222_v38  ;;  %2241 = vmatprep.mubr.f32.mxu0 %v1317_v46 }
 0x27c   : > { %2242 = vmatmul.mubr.f32.gmra.mrb[12].mxu0 %v1316_v50  ;;  %v1324_v19 = vmax.f32 %v1210_v53, 0.0 }
 0x27d   : > { %v1325_v62 = vmax.f32 %v1212_v56, 0.0  ;;  %v1215_v33 = vpop.f32.mrb[112].mxu1 }
 0x27e   : > { %v1216_v63 = vadd.f32 %v1215_v33, %v4218_v41  ;;  %v1217_v0 = vpop.f32.mrb[113].mxu1 }
 0x27f   : > { %v1218_v25 = vadd.f32 %v1217_v0, %v4222_v38  ;;  %2247 = vmatprep.mubr.f32.mxu0 %v1325_v62 }
 0x280   : > { %2248 = vmatmul.mubr.f32.gmra.mrb[14].mxu0 %v1324_v19  ;;  %v1332_v4 = vmax.f32 %v1216_v63, 0.0 }
 0x281   : > { %v1333_v2 = vmax.f32 %v1218_v25, 0.0  ;;  %v1221_v27 = vpop.f32.mrb[114].mxu1 }
 0x282   : > { %v1222_v5 = vadd.f32 %v1221_v27, %v4218_v41  ;;  %v1223_v6 = vpop.f32.mrb[115].mxu1 }
 0x283   : > { %v1224_v7 = vadd.f32 %v1223_v6, %v4222_v38  ;;  %2253 = vmatprep.mubr.f32.mxu0 %v1333_v2 }
 0x284   : > { %2254 = vmatmul.mubr.f32.gmra.mrb[16].mxu0 %v1332_v4  ;;  %v1340_v10 = vmax.f32 %v1222_v5, 0.0 }
 0x285   : > { %v1341_v42 = vmax.f32 %v1224_v7, 0.0  ;;  %v1227_v34 = vpop.f32.mrb[116].mxu1 }
 0x286   : > { %v1228_v14 = vadd.f32 %v1227_v34, %v4218_v41  ;;  %v1229_v58 = vpop.f32.mrb[117].mxu1 }
 0x287   : > { %v1230_v40 = vadd.f32 %v1229_v58, %v4222_v38  ;;  %2259 = vmatprep.mubr.f32.mxu0 %v1341_v42 }
 0x288   : > { %2260 = vmatmul.mubr.f32.gmra.mrb[18].mxu0 %v1340_v10  ;;  %v1348_v30 = vmax.f32 %v1228_v14, 0.0 }
 0x289   : > { %v1349_v18 = vmax.f32 %v1230_v40, 0.0  ;;  %v1233_v16 = vpop.f32.mrb[118].mxu1 }
 0x28a   : > { %v1234_v61 = vadd.f32 %v1233_v16, %v4218_v41  ;;  %v1235_v20 = vpop.f32.mrb[119].mxu1 }
 0x28b   : > { %v1236_v43 = vadd.f32 %v1235_v20, %v4222_v38  ;;  %2265 = vmatprep.mubr.f32.mxu0 %v1349_v18 }
 0x28c   : > { %2266 = vmatmul.mubr.f32.gmra.mrb[20].mxu0 %v1348_v30  ;;  %v1356_v22 = vmax.f32 %v1234_v61, 0.0 }
 0x28d   : > { %v1357_v13 = vmax.f32 %v1236_v43, 0.0  ;;  %v1239_v21 = vpop.f32.mrb[120].mxu1 }
 0x28e   : > { %v1240_v15 = vadd.f32 %v1239_v21, %v4218_v41  ;;  %v1241_v23 = vpop.f32.mrb[121].mxu1 }
 0x28f   : > { %v1242_v31 = vadd.f32 %v1241_v23, %v4222_v38  ;;  %2271 = vmatprep.mubr.f32.mxu0 %v1357_v13 }
 0x290   : > { %2272 = vmatmul.mubr.f32.gmra.mrb[22].mxu0 %v1356_v22  ;;  %v1364_v26 = vmax.f32 %v1240_v15, 0.0 }
 0x291   : > { %v1365_v24 = vmax.f32 %v1242_v31, 0.0  ;;  %v1245_v51 = vpop.f32.mrb[122].mxu1 }
 0x292   : > { %v1246_v28 = vadd.f32 %v1245_v51, %v4218_v41  ;;  %v1247_v52 = vpop.f32.mrb[123].mxu1 }
 0x293   : > { %v1248_v57 = vadd.f32 %v1247_v52, %v4222_v38  ;;  %2277 = vmatprep.mubr.f32.mxu0 %v1365_v24 }
 0x294   : > { %2278 = vmatmul.mubr.f32.gmra.mrb[24].mxu0 %v1364_v26  ;;  %v1372_v54 = vmax.f32 %v1246_v28, 0.0 }
 0x295   : > { %v1373_v9 = vmax.f32 %v1248_v57, 0.0  ;;  %v1251_v29 = vpop.f32.mrb[124].mxu1 }
 0x296   : > { %v1252_v8 = vadd.f32 %v1251_v29, %v4218_v41  ;;  %v1253_v32 = vpop.f32.mrb[125].mxu1 }
 0x297   : > { %v1254_v12 = vadd.f32 %v1253_v32, %v4222_v38  ;;  %2283 = vmatprep.mubr.f32.mxu0 %v1373_v9 }
 0x298   : > { %2284 = vmatmul.mubr.f32.gmra.mrb[26].mxu0 %v1372_v54  ;;  %v1380_v3 = vmax.f32 %v1252_v8, 0.0 }
 0x299   : > { %v1381_v59 = vmax.f32 %v1254_v12, 0.0  ;;  %v1257_v48 = vpop.f32.mrb[126].mxu1 }
 0x29a   : > { %v1258_v35 = vadd.f32 %v1257_v48, %v4218_v41  ;;  %v1259_v55 = vpop.f32.mrb[127].mxu1  ;;  %v4265_v41 = vrot.slane %v1646_v39, %v584_v44 }
 0x29b   : > { %v1260_v36 = vadd.f32 %v1259_v55, %v4222_v38  ;;  %2289 = vmatprep.mubr.f32.mxu0 %v1381_v59 }
 0x29c   : > { %2290 = vmatmul.mubr.f32.gmra.mrb[28].mxu0 %v1380_v3  ;;  %v1388_v37 = vmax.f32 %v1258_v35, 0.0 }
 0x29d   : > { %v1389_v60 = vmax.f32 %v1260_v36, 0.0 }
 0x29f   : > { %2295 = vmatprep.mubr.f32.mxu0 %v1389_v60 }
 0x2a0   : > { %2296 = vmatmul.mubr.f32.gmra.mrb[30].mxu0 %v1388_v37 }
 0x337   : > { %v2207_v45 = vpop.f32.mrb[0].mxu0 }
 0x338   : > { %v4268_v38 = vadd.f32 %v2207_v45, %v4261_v49  ;;  %v2209_v46 = vpop.f32.mrb[1].mxu0 }
 0x339   : > { %v4271_v11 = vadd.f32 %v2209_v46, %v4265_v41 }
 0x33a   : > { %v2302_v50 = vmul.f32 %v4268_v38, %v4268_v38 }
 0x33b   : > { %v2213_v53 = vpop.f32.mrb[2].mxu0  ;;  %v2303_v47 = vmul.f32 %v4271_v11, %v4271_v11 }
 0x33c   : > { %v4278_v17 = vadd.f32 %v2213_v53, %v4261_v49  ;;  %v2215_v1 = vpop.f32.mrb[3].mxu0 }
 0x33d   : > { %v4281_v44 = vadd.f32 %v2215_v1, %v4265_v41  ;;  %v2334_v56 = vadd.f32 %v2303_v47, %v2302_v50 }
 0x33e   : > { %v2304_v62 = vmul.f32 %v4278_v17, %v4278_v17 }
 0x33f   : > { %v2305_v33 = vmul.f32 %v4281_v44, %v4281_v44  ;;  %v2219_v19 = vpop.f32.mrb[4].mxu0  ;;  %2335 = vadd.xlane.f32.xlu0 %v2334_v56 }
 0x340   : > { %v4288_v63 = vadd.f32 %v2219_v19, %v4261_v49  ;;  %v2221_v0 = vpop.f32.mrb[5].mxu0 }
 0x341   : > { %v4291_v25 = vadd.f32 %v2221_v0, %v4265_v41  ;;  %v2337_v2 = vadd.f32 %v2305_v33, %v2304_v62 }
 0x342   : > { %v2306_v27 = vmul.f32 %v4288_v63, %v4288_v63 }
 0x343   : > { %v2225_v4 = vpop.f32.mrb[6].mxu0  ;;  %2338 = vadd.xlane.f32.xlu0 %v2337_v2  ;;  %v2307_v5 = vmul.f32 %v4291_v25, %v4291_v25 }
 0x344   : > { %v4298_v6 = vadd.f32 %v2225_v4, %v4261_v49  ;;  %v2227_v7 = vpop.f32.mrb[7].mxu0 }
 0x345   : > { %v4301_v42 = vadd.f32 %v2227_v7, %v4265_v41  ;;  %v2340_v34 = vadd.f32 %v2307_v5, %v2306_v27 }
 0x346   : > { %v2308_v10 = vmul.f32 %v4298_v6, %v4298_v6 }
 0x347   : > { %v2309_v14 = vmul.f32 %v4301_v42, %v4301_v42  ;;  %v2231_v58 = vpop.f32.mrb[8].mxu0  ;;  %2341 = vadd.xlane.f32.xlu1 %v2340_v34 }
 0x348   : > { %v4308_v40 = vadd.f32 %v2231_v58, %v4261_v49  ;;  %v2233_v18 = vpop.f32.mrb[9].mxu0 }
 0x349   : > { %v4311_v16 = vadd.f32 %v2233_v18, %v4265_v41  ;;  %v2343_v30 = vadd.f32 %v2309_v14, %v2308_v10 }
 0x34a   : > { %v2310_v61 = vmul.f32 %v4308_v40, %v4308_v40 }
 0x34b   : > { %v2311_v20 = vmul.f32 %v4311_v16, %v4311_v16  ;;  %v2237_v43 = vpop.f32.mrb[10].mxu0  ;;  %2344 = vadd.xlane.f32.xlu1 %v2343_v30 }
 0x34c   : > { %v4318_v13 = vadd.f32 %v2237_v43, %v4261_v49  ;;  %v2239_v21 = vpop.f32.mrb[11].mxu0 }
 0x34d   : > { %v4321_v22 = vadd.f32 %v2239_v21, %v4265_v41  ;;  %v2346_v15 = vadd.f32 %v2311_v20, %v2310_v61 }
 0x34e   : > { %v2312_v23 = vmul.f32 %v4318_v13, %v4318_v13 }
 0x34f   : > { %v2313_v31 = vmul.f32 %v4321_v22, %v4321_v22  ;;  %v2243_v24 = vpop.f32.mrb[12].mxu0  ;;  %2347 = vadd.xlane.f32.xlu0 %v2346_v15 }
 0x350   : > { %v4328_v51 = vadd.f32 %v2243_v24, %v4261_v49  ;;  %v2245_v26 = vpop.f32.mrb[13].mxu0 }
 0x351   : > { %v4331_v28 = vadd.f32 %v2245_v26, %v4265_v41  ;;  %v2349_v52 = vadd.f32 %v2313_v31, %v2312_v23 }
 0x352   : > { %v2314_v57 = vmul.f32 %v4328_v51, %v4328_v51 }
 0x353   : > { %v2315_v9 = vmul.f32 %v4331_v28, %v4331_v28  ;;  %v2249_v29 = vpop.f32.mrb[14].mxu0  ;;  %2350 = vadd.xlane.f32.xlu1 %v2349_v52 }
 0x354   : > { %v4338_v54 = vadd.f32 %v2249_v29, %v4261_v49  ;;  %v2251_v8 = vpop.f32.mrb[15].mxu0 }
 0x355   : > { %v4341_v32 = vadd.f32 %v2251_v8, %v4265_v41  ;;  %v2352_v12 = vadd.f32 %v2315_v9, %v2314_v57 }
 0x356   : > { %v2316_v59 = vmul.f32 %v4338_v54, %v4338_v54 }
 0x357   : > { %v2317_v48 = vmul.f32 %v4341_v32, %v4341_v32  ;;  %v2255_v3 = vpop.f32.mrb[16].mxu0  ;;  %2353 = vadd.xlane.f32.xlu0 %v2352_v12 }
 0x358   : > { %v4348_v35 = vadd.f32 %v2255_v3, %v4261_v49  ;;  %v2257_v55 = vpop.f32.mrb[17].mxu0 }
 0x359   : > { %v4351_v36 = vadd.f32 %v2257_v55, %v4265_v41  ;;  %v2355_v60 = vadd.f32 %v2317_v48, %v2316_v59 }
 0x35a   : > { %v2318_v37 = vmul.f32 %v4348_v35, %v4348_v35 }
 0x35b   : > { %v2319_v39 = vmul.f32 %v4351_v36, %v4351_v36  ;;  %v2261_v45 = vpop.f32.mrb[18].mxu0  ;;  %2356 = vadd.xlane.f32.xlu1 %v2355_v60 }
 0x35c   : > { %v4358_v46 = vadd.f32 %v2261_v45, %v4261_v49  ;;  %v2263_v50 = vpop.f32.mrb[19].mxu0 }
 0x35d   : > { %v4361_v53 = vadd.f32 %v2263_v50, %v4265_v41  ;;  %v2358_v47 = vadd.f32 %v2319_v39, %v2318_v37 }
 0x35e   : > { %v2320_v1 = vmul.f32 %v4358_v46, %v4358_v46 }
 0x35f   : > { %v2321_v56 = vmul.f32 %v4361_v53, %v4361_v53  ;;  %v2267_v62 = vpop.f32.mrb[20].mxu0  ;;  %2359 = vadd.xlane.f32.xlu0 %v2358_v47 }
 0x360   : > { %v4368_v33 = vadd.f32 %v2267_v62, %v4261_v49  ;;  %v2269_v19 = vpop.f32.mrb[21].mxu0 }
 0x361   : > { %v4371_v0 = vadd.f32 %v2269_v19, %v4265_v41  ;;  %v2361_v2 = vadd.f32 %v2321_v56, %v2320_v1 }
 0x362   : > { %v2322_v27 = vmul.f32 %v4368_v33, %v4368_v33 }
 0x363   : > { %v2323_v4 = vmul.f32 %v4371_v0, %v4371_v0  ;;  %v2273_v5 = vpop.f32.mrb[22].mxu0  ;;  %2362 = vadd.xlane.f32.xlu1 %v2361_v2 }
 0x364   : > { %v4378_v7 = vadd.f32 %v2273_v5, %v4261_v49  ;;  %v2275_v34 = vpop.f32.mrb[23].mxu0 }
 0x365   : > { %v4381_v10 = vadd.f32 %v2275_v34, %v4265_v41  ;;  %v2364_v14 = vadd.f32 %v2323_v4, %v2322_v27 }
 0x366   : > { %v2324_v58 = vmul.f32 %v4378_v7, %v4378_v7 }
 0x367   : > { %v2325_v18 = vmul.f32 %v4381_v10, %v4381_v10  ;;  %v2279_v30 = vpop.f32.mrb[24].mxu0  ;;  %2365 = vadd.xlane.f32.xlu0 %v2364_v14 }
 0x368   : > { %v4388_v61 = vadd.f32 %v2279_v30, %v4261_v49  ;;  %v2281_v20 = vpop.f32.mrb[25].mxu0 }
 0x369   : > { %v4391_v43 = vadd.f32 %v2281_v20, %v4265_v41  ;;  %v2367_v21 = vadd.f32 %v2325_v18, %v2324_v58 }
 0x36a   : > { %v2326_v15 = vmul.f32 %v4388_v61, %v4388_v61 }
 0x36b   : > { %v2327_v23 = vmul.f32 %v4391_v43, %v4391_v43  ;;  %v2285_v31 = vpop.f32.mrb[26].mxu0  ;;  %2368 = vadd.xlane.f32.xlu1 %v2367_v21 }
 0x36c   : > { %v4398_v24 = vadd.f32 %v2285_v31, %v4261_v49  ;;  %v2287_v26 = vpop.f32.mrb[27].mxu0 }
 0x36d   : > { %v4401_v52 = vadd.f32 %v2287_v26, %v4265_v41  ;;  %v2370_v57 = vadd.f32 %v2327_v23, %v2326_v15 }
 0x36e   : > { %v2328_v9 = vmul.f32 %v4398_v24, %v4398_v24 }
 0x36f   : > { %v2329_v29 = vmul.f32 %v4401_v52, %v4401_v52  ;;  %v2291_v8 = vpop.f32.mrb[28].mxu0  ;;  %2371 = vadd.xlane.f32.xlu0 %v2370_v57 }
 0x370   : > { %v4408_v12 = vadd.f32 %v2291_v8, %v4261_v49  ;;  %v2293_v59 = vpop.f32.mrb[29].mxu0 }
 0x371   : > { %v4411_v48 = vadd.f32 %v2293_v59, %v4265_v41  ;;  %v2373_v3 = vadd.f32 %v2329_v29, %v2328_v9 }
 0x372   : > { %v2330_v55 = vmul.f32 %v4408_v12, %v4408_v12 }
 0x373   : > { %v2331_v60 = vmul.f32 %v4411_v48, %v4411_v48  ;;  %v2297_v37 = vpop.f32.mrb[30].mxu0  ;;  %2374 = vadd.xlane.f32.xlu1 %v2373_v3 }
 0x374   : > { %v4418_v39 = vadd.f32 %v2297_v37, %v4261_v49  ;;  %v2299_v45 = vpop.f32.mrb[31].mxu0 }
 0x375   : > { %v4421_v50 = vadd.f32 %v2299_v45, %v4265_v41  ;;  %v2376_v47 = vadd.f32 %v2331_v60, %v2330_v55 }
 0x376   : > { %v2332_v1 = vmul.f32 %v4418_v39, %v4418_v39 }
 0x377   : > { %v2333_v56 = vmul.f32 %v4421_v50, %v4421_v50  ;;  %2377 = vadd.xlane.f32.xlu0 %v2376_v47 }
 0x379   : > { %v2379_v62 = vadd.f32 %v2333_v56, %v2332_v1 }
 0x37b   : > { %2380 = vadd.xlane.f32.xlu1 %v2379_v62 }
 0x3cc   : > { %v2336_v19 = vpop.xlane.xlu0 %2335 }
 0x3cd   : > { %v2382_v2 = vmax.f32 %v2336_v19, 1e-24 }
 0x3cf   : > { %3344 = vrsqrt.f32 %v2382_v2 }
 0x3d0   : > { %v2339_v49 = vpop.xlane.xlu0 %2338 }
 0x3d1   : > { %v2383_v27 = vmax.f32 %v2339_v49, 1e-24 }
 0x3d3   : > { %3346 = vrsqrt.f32 %v2383_v27 }
 0x3d4   : > { %v2342_v4 = vpop.xlane.xlu1 %2341 }
 0x3d5   : > { %v2384_v41 = vmax.f32 %v2342_v4, 1e-24 }
 0x3d7   : > { %3348 = vrsqrt.f32 %v2384_v41 }
 0x3d8   : > { %v2345_v5 = vpop.xlane.xlu1 %2344 }
 0x3d9   : > { %v3345_v34 = vpop.eup %3344  ;;  %v2385_v14 = vmax.f32 %v2345_v5, 1e-24 }
 0x3da   : > { %v2414_v58 = vmul.f32 %v3345_v34, %v4268_v38  ;;  %v2415_v18 = vmul.f32 %v3345_v34, %v4271_v11 }
 0x3db   : > { %3350 = vrsqrt.f32 %v2385_v14 }
 0x3dc   : > { %2446 = vst [vmem:[%s4431_s6] sm:$0xff] %v2414_v58  ;;  %2447 = vst [vmem:[%s4431_s6 + $0x8] sm:$0xff] %v2415_v18  ;;  %v2348_v30 = vpop.xlane.xlu0 %2347 }
 0x3dd   : > { %v3347_v20 = vpop.eup %3346  ;;  %v2386_v21 = vmax.f32 %v2348_v30, 1e-24 }
 0x3de   : > { %v2416_v15 = vmul.f32 %v3347_v20, %v4278_v17  ;;  %v2417_v38 = vmul.f32 %v3347_v20, %v4281_v44 }
 0x3df   : > { %3352 = vrsqrt.f32 %v2386_v21 }
 0x3e0   : > { %2448 = vst [vmem:[%s4431_s6 + $0x10] sm:$0xff] %v2416_v15  ;;  %2449 = vst [vmem:[%s4431_s6 + $0x18] sm:$0xff] %v2417_v38  ;;  %v2351_v11 = vpop.xlane.xlu1 %2350 }
 0x3e1   : > { %v3349_v23 = vpop.eup %3348  ;;  %v2387_v31 = vmax.f32 %v2351_v11, 1e-24 }
 0x3e2   : > { %v2418_v26 = vmul.f32 %v3349_v23, %v4288_v63  ;;  %v2419_v57 = vmul.f32 %v3349_v23, %v4291_v25 }
 0x3e3   : > { %3354 = vrsqrt.f32 %v2387_v31 }
 0x3e4   : > { %2450 = vst [vmem:[%s4431_s6 + $0x20] sm:$0xff] %v2418_v26  ;;  %2451 = vst [vmem:[%s4431_s6 + $0x28] sm:$0xff] %v2419_v57  ;;  %v2354_v17 = vpop.xlane.xlu0 %2353 }
 0x3e5   : > { %v3351_v9 = vpop.eup %3350  ;;  %v2388_v44 = vmax.f32 %v2354_v17, 1e-24 }
 0x3e6   : > { %v2420_v29 = vmul.f32 %v3351_v9, %v4298_v6  ;;  %v2421_v8 = vmul.f32 %v3351_v9, %v4301_v42 }
 0x3e7   : > { %3356 = vrsqrt.f32 %v2388_v44 }
 0x3e8   : > { %2452 = vst [vmem:[%s4431_s6 + $0x30] sm:$0xff] %v2420_v29  ;;  %2453 = vst [vmem:[%s4431_s6 + $0x38] sm:$0xff] %v2421_v8  ;;  %v2357_v63 = vpop.xlane.xlu1 %2356 }
 0x3e9   : > { %v3353_v59 = vpop.eup %3352  ;;  %v2389_v25 = vmax.f32 %v2357_v63, 1e-24 }
 0x3ea   : > { %v2422_v3 = vmul.f32 %v3353_v59, %v4308_v40  ;;  %v2423_v55 = vmul.f32 %v3353_v59, %v4311_v16 }
 0x3eb   : > { %3358 = vrsqrt.f32 %v2389_v25 }
 0x3ec   : > { %2454 = vst [vmem:[%s4431_s6 + $0x40] sm:$0xff] %v2422_v3  ;;  %2455 = vst [vmem:[%s4431_s6 + $0x48] sm:$0xff] %v2423_v55  ;;  %v2360_v6 = vpop.xlane.xlu0 %2359 }
 0x3ed   : > { %v3355_v60 = vpop.eup %3354  ;;  %v2390_v42 = vmax.f32 %v2360_v6, 1e-24 }
 0x3ee   : > { %v2424_v37 = vmul.f32 %v3355_v60, %v4318_v13  ;;  %v2425_v45 = vmul.f32 %v3355_v60, %v4321_v22 }
 0x3ef   : > { %3360 = vrsqrt.f32 %v2390_v42 }
 0x3f0   : > { %2456 = vst [vmem:[%s4431_s6 + $0x50] sm:$0xff] %v2424_v37  ;;  %2457 = vst [vmem:[%s4431_s6 + $0x58] sm:$0xff] %v2425_v45  ;;  %v2363_v40 = vpop.xlane.xlu1 %2362 }
 0x3f1   : > { %v3357_v47 = vpop.eup %3356  ;;  %v2391_v16 = vmax.f32 %v2363_v40, 1e-24 }
 0x3f2   : > { %v2426_v1 = vmul.f32 %v3357_v47, %v4328_v51  ;;  %v2427_v56 = vmul.f32 %v3357_v47, %v4331_v28 }
 0x3f3   : > { %3362 = vrsqrt.f32 %v2391_v16 }
 0x3f4   : > { %2458 = vst [vmem:[%s4431_s6 + $0x60] sm:$0xff] %v2426_v1  ;;  %2459 = vst [vmem:[%s4431_s6 + $0x68] sm:$0xff] %v2427_v56  ;;  %v2366_v13 = vpop.xlane.xlu0 %2365 }
 0x3f5   : > { %v3359_v62 = vpop.eup %3358  ;;  %v2392_v22 = vmax.f32 %v2366_v13, 1e-24 }
 0x3f6   : > { %v2428_v19 = vmul.f32 %v3359_v62, %v4338_v54  ;;  %v2429_v2 = vmul.f32 %v3359_v62, %v4341_v32 }
 0x3f7   : > { %3364 = vrsqrt.f32 %v2392_v22 }
 0x3f8   : > { %2460 = vst [vmem:[%s4431_s6 + $0x70] sm:$0xff] %v2428_v19  ;;  %2461 = vst [vmem:[%s4431_s6 + $0x78] sm:$0xff] %v2429_v2  ;;  %v2369_v51 = vpop.xlane.xlu1 %2368 }
 0x3f9   : > { %v3361_v49 = vpop.eup %3360  ;;  %v2393_v28 = vmax.f32 %v2369_v51, 1e-24 }
 0x3fa   : > { %v2430_v27 = vmul.f32 %v3361_v49, %v4348_v35  ;;  %v2431_v4 = vmul.f32 %v3361_v49, %v4351_v36 }
 0x3fb   : > { %3366 = vrsqrt.f32 %v2393_v28 }
 0x3fc   : > { %2462 = vst [vmem:[%s4431_s6 + $0x80] sm:$0xff] %v2430_v27  ;;  %2463 = vst [vmem:[%s4431_s6 + $0x88] sm:$0xff] %v2431_v4  ;;  %v2372_v54 = vpop.xlane.xlu0 %2371 }
 0x3fd   : > { %v3363_v41 = vpop.eup %3362  ;;  %v2394_v32 = vmax.f32 %v2372_v54, 1e-24 }
 0x3fe   : > { %v2432_v5 = vmul.f32 %v3363_v41, %v4358_v46  ;;  %v2433_v34 = vmul.f32 %v3363_v41, %v4361_v53 }
 0x3ff   : > { %3368 = vrsqrt.f32 %v2394_v32 }
 0x400   : > { %2464 = vst [vmem:[%s4431_s6 + $0x90] sm:$0xff] %v2432_v5  ;;  %2465 = vst [vmem:[%s4431_s6 + $0x98] sm:$0xff] %v2433_v34  ;;  %v2375_v35 = vpop.xlane.xlu1 %2374 }
 0x401   : > { %v3365_v14 = vpop.eup %3364  ;;  %v2395_v36 = vmax.f32 %v2375_v35, 1e-24 }
 0x402   : > { %v2434_v58 = vmul.f32 %v3365_v14, %v4368_v33  ;;  %v2435_v18 = vmul.f32 %v3365_v14, %v4371_v0 }
 0x403   : > { %3370 = vrsqrt.f32 %v2395_v36 }
 0x404   : > { %2466 = vst [vmem:[%s4431_s6 + $0xa0] sm:$0xff] %v2434_v58  ;;  %2467 = vst [vmem:[%s4431_s6 + $0xa8] sm:$0xff] %v2435_v18  ;;  %v2378_v46 = vpop.xlane.xlu0 %2377 }
 0x405   : > { %v3367_v30 = vpop.eup %3366  ;;  %v2396_v53 = vmax.f32 %v2378_v46, 1e-24 }
 0x406   : > { %v2436_v20 = vmul.f32 %v3367_v30, %v4378_v7  ;;  %v2437_v21 = vmul.f32 %v3367_v30, %v4381_v10 }
 0x407   : > { %3372 = vrsqrt.f32 %v2396_v53 }
 0x408   : > { %2468 = vst [vmem:[%s4431_s6 + $0xb0] sm:$0xff] %v2436_v20  ;;  %2469 = vst [vmem:[%s4431_s6 + $0xb8] sm:$0xff] %v2437_v21  ;;  %v2381_v33 = vpop.xlane.xlu1 %2380 }
 0x409   : > { %v3369_v0 = vpop.eup %3368  ;;  %v2397_v15 = vmax.f32 %v2381_v33, 1e-24 }
 0x40a   : > { %v2438_v38 = vmul.f32 %v3369_v0, %v4388_v61  ;;  %v2439_v11 = vmul.f32 %v3369_v0, %v4391_v43 }
 0x40b   : > { %3374 = vrsqrt.f32 %v2397_v15 }
 0x40c   : > { %2470 = vst [vmem:[%s4431_s6 + $0xc0] sm:$0xff] %v2438_v38  ;;  %2471 = vst [vmem:[%s4431_s6 + $0xc8] sm:$0xff] %v2439_v11 }
 0x40d   : > { %v3371_v7 = vpop.eup %3370 }
 0x40e   : > { %v2440_v10 = vmul.f32 %v3371_v7, %v4398_v24  ;;  %v2441_v23 = vmul.f32 %v3371_v7, %v4401_v52 }
 0x410   : > { %2472 = vst [vmem:[%s4431_s6 + $0xd0] sm:$0xff] %v2440_v10  ;;  %2473 = vst [vmem:[%s4431_s6 + $0xd8] sm:$0xff] %v2441_v23 }
 0x411   : > { %v3373_v31 = vpop.eup %3372 }
 0x412   : > { %v2442_v26 = vmul.f32 %v3373_v31, %v4408_v12  ;;  %v2443_v61 = vmul.f32 %v3373_v31, %v4411_v48 }
 0x414   : > { %2474 = vst [vmem:[%s4431_s6 + $0xe0] sm:$0xff] %v2442_v26  ;;  %2475 = vst [vmem:[%s4431_s6 + $0xe8] sm:$0xff] %v2443_v61 }
 0x415   : > { %v3375_v43 = vpop.eup %3374 }
 0x416   : > { %v2444_v24 = vmul.f32 %v3375_v43, %v4418_v39  ;;  %v2445_v52 = vmul.f32 %v3375_v43, %v4421_v50 }
 0x418   : > { %2476 = vst [vmem:[%s4431_s6 + $0xf0] sm:$0xff] %v2444_v24  ;;  %2477 = vst [vmem:[%s4431_s6 + $0xf8] sm:$0xff] %v2445_v52 }
 0x419   : > { %3536 = shalt.err (!%p3533_p4)
}
 0x41a   : > { %s3537_s8 = scalar_lea.hbm %s4496_s10, 4096  ;;  %s3541_s24 = scalar_lea.hbm %s4551_s5, 8192 }
 0x41b   : > { %p3538_p9 = scmp.ne.s32.totalorder %s4496_s10, %s3537_s8  ;;  %p3542_p8 = scmp.lt.u32.totalorder %s4496_s10, %s4551_s5 }
 0x41c   : > { %p3543_p13 = scmp.lt.u32.totalorder %s3541_s24, %s3537_s8  ;;  %p3545_p10 = scmp.lt.u32.totalorder %s3537_s8, %s4496_s10 }
 0x41d   : > { %p3539_p0 = pnand %p3538_p9, %p3788_p5 }
 0x41e   : > { %p3544_p6 = por %p3543_p13, %p3542_p8 }
 0x41f   : > { %p3540_p11 = pneg %p3539_p0 }
 0x420   : > { %p3546_p3 = por %p3545_p10, %p3544_p6 }
 0x422   : > { %p3547_p7 = pnand %p3546_p3, %p3540_p11 }
 0x424   : > { %3550 = shalt.err (!%p3547_p7)
}
 0x425   : > { %s3608_s14 = smov 256   ;;  %s3609_s13 = smov 16  }
 0x426   : > { %3275 = dma.vmem_to_hbm [thread:$0]  (%p3788_p5), %s4498_s11, 4096, %s4496_s10, %s2479_s22, %s3608_s14, %s3608_s14, %s3609_s13  }
 0x427 PF: > { %s2508_s16 = sand.u32 1, %s3585_s18   ;;  %p4569_p12 = scmp.ne.s32.totalorder %s4556_s25, 0 }
 0x428   : > { %p4570_p2 = scmp.ge.s32.totalorder %s3597_s21, 2  ;;  %s2509_s30 = scalar_lea.sflag [#allocation4], %s2508_s16 }
 0x42a   : > { %p3292_p1 = pnand %p4570_p2, %p4569_p12 }
 0x42c   : > { %3580 = dma.done.wait (!%p3292_p1), %s2509_s30, 4096  }
 0x42d   : > { %3582 = vsyncadd (!%p3292_p1), %s2509_s30, 4294963200  ;;  %p20_p4 = scmp.ge.s32.totalorder %s3774_s28, 4   ;;  %s4571_s18 = smov %s3589_s19 }
 0x42e   : > { %s4572_s19 = smov %s3593_s20  ;;  %s4573_s20 = smov %s3784_s27 }
 0x42f   : > { %s4574_s21 = smov %s3774_s28  ;;  %22 = sbr.rel (!%p20_p4) target bundleno = 7 (0x7), region = 97 }
 0x436   :  { %2514 = vsyncpa [#allocation3], 1 }
 0x437   :  { %2516 = vsyncpa [#allocation3 + $0x1], 1 }
 0x438   :  { %2517 = vsyncpa [#allocation6], 1 }
 0x439   :  { %2518 = vsyncpa [#allocation9], 1 }
 0x43a   :  { %2519 = vsyncpa [#allocation4], 1 }
 0x43b   :  { %2521 = vsyncpa [#allocation4 + $0x1], 1 }

</bundles_post_ra>
